<compile_context>
chip_gen: v7x
topology: tpu7x:2x2x1
jax: 0.10.0
libtpu: 0.0.40
codegen_flags: <defaults>
</compile_context>

<pallas_src>
import math
import numpy as np

import jax
import jax.numpy as jnp
from jax import lax
from jax.experimental import pallas as pl
from jax.experimental.pallas import tpu as pltpu

SEG_PER_BLOCK = 8  # segments packed along the sublane axis per grid step
NEG_INF = float("-inf")  # plain Python float: never becomes a captured constant


def _make_fps_kernel(n, n_pad, m, m_pad, d, random_first, seed):
    """Builds the batched FPS kernel with static sizes baked in."""
    S = SEG_PER_BLOCK

    # Fully unroll short selection loops (strictly serial dependency chain —
    # unrolling gives the LLO scheduler visibility); partial unroll otherwise.
    unroll = True if (m - 1) <= 32 else 4

    def kernel(pos_ref, out_ref):
        # pos_ref: (d, S, n_pad) f32  -- per-dim coordinate planes, segments on sublanes
        # out_ref: (S, m_pad)  int32  -- global indices, single lane-dense store
        blk = pl.program_id(0)

        # Hoisted constants (computed once, closed over by the loop body).
        lane = lax.broadcasted_iota(jnp.int32, (S, n_pad), 1)   # point index per lane
        m_lane = lax.broadcasted_iota(jnp.int32, (S, m_pad), 1)
        row = lax.broadcasted_iota(jnp.int32, (S, 1), 0)        # segment row in block
        valid = lane < n                                        # mask out lane padding

        # Global index offset of each segment handled by this block.
        base = (blk * S + row) * n                              # (S, 1) int32

        # Keep the coordinate planes live (registers for small n_pad).
        planes = [pos_ref[k] for k in range(d)]                 # d x (S, n_pad)

        def sq_dist_to(j_vec):
            # j_vec: (S, 1) int32 local index of the last selected point per segment.
            sel = lane == j_vec                                 # (S, n_pad)
            acc = None
            for pk in planes:
                # extract the selected point's k-th coordinate per segment
                # (one lane-reduce amortized over all S segments)
                pj = jnp.sum(jnp.where(sel, pk, 0.0), axis=-1, keepdims=True)  # (S, 1)
                diff = pk - pj
                acc = diff * diff if acc is None else acc + diff * diff
            return acc                                          # (S, n_pad)

        if random_first:
            # deterministic per-run randomness, seeded per grid block
            # TODO(synk): not validated against torch's RNG; uses modulo (slight bias).
            pltpu.prng_seed(seed + blk)
            bits = pltpu.prng_random_bits((S, 128))             # one vreg minimum
            r = (bits[:, 0:1] >> 1).astype(jnp.int32)           # drop sign bit
            start = r % n                                       # (S, 1)
        else:
            start = jnp.zeros((S, 1), jnp.int32)

        # Iteration 0: pick the start point per segment.
        dist0 = jnp.where(valid, sq_dist_to(start), NEG_INF)    # pads stay -inf forever
        idx0 = jnp.where(m_lane == 0, base + start, 0)

        def body(i, carry):
            dist, idx = carry
            mx = jnp.max(dist, axis=-1, keepdims=True)          # (S, 1)
            # first occurrence of the max (matches np.argmax tie-breaking)
            nxt = jnp.min(jnp.where(dist == mx, lane, n_pad),
                          axis=-1, keepdims=True)               # (S, 1) int32
            idx = jnp.where(m_lane == i, base + nxt, idx)       # pure vreg select
            dist = jnp.minimum(dist, sq_dist_to(nxt))
            return dist, idx

        _, idx = lax.fori_loop(1, m, body, (dist0, idx0), unroll=unroll)
        out_ref[...] = idx                                      # single lane-dense store

    return kernel


def fps(pos, ratio, random_first=False, batch=None, seed=0):
    """JAX/Pallas equivalent of FPS(ratio, random_first).forward(pos, batch)."""
    pos = jnp.asarray(pos, jnp.float32)
    n_total, d = pos.shape
    assert n_total < 2 ** 31, "int32 global indices would overflow"

    if batch is None:
        bsz = 1
    else:
        batch_np = np.asarray(batch)
        assert n_total == batch_np.size
        bsz = int(batch_np.max()) + 1
        # TODO(synk): only equal-size contiguous segments are supported here; the
        # general ragged `ptr` case of fps_cpu is not implemented in this kernel.
        assert n_total % bsz == 0
        assert np.array_equal(batch_np, np.repeat(np.arange(bsz), n_total // bsz))

    n = n_total // bsz
    m = int(math.ceil(ratio * n))
    assert m >= 1
    n_pad = ((n + 127) // 128) * 128
    m_pad = ((m + 127) // 128) * 128
    S = SEG_PER_BLOCK
    b_pad = ((bsz + S - 1) // S) * S
    nblocks = b_pad // S

    # (B*n, d) -> (nblocks, d, S, n_pad): per-dim coordinate planes with segments on
    # the sublane axis (fills all 8 sublanes) and points along the 128-lane axis.
    pos_b = pos.reshape(bsz, n, d)
    pos_b = jnp.pad(pos_b, ((0, b_pad - bsz), (0, n_pad - n), (0, 0)))
    pos_b = pos_b.reshape(nblocks, S, n_pad, d).transpose(0, 3, 1, 2)

    kernel = _make_fps_kernel(n, n_pad, m, m_pad, d, bool(random_first), int(seed))

    out = pl.pallas_call(
        kernel,
        out_shape=jax.ShapeDtypeStruct((nblocks, S, m_pad), jnp.int32),
        grid=(nblocks,),
        in_specs=[pl.BlockSpec((None, d, S, n_pad), lambda b: (b, 0, 0, 0))],
        out_specs=pl.BlockSpec((None, S, m_pad), lambda b: (b, 0, 0)),
        compiler_params=pltpu.CompilerParams(
            dimension_semantics=("parallel",)),
    )(pos_b)

    idx = out.reshape(b_pad, m_pad)[:bsz, :m]
    return idx.reshape(bsz * m)


def _fps_reference(pos_np, bsz, n, ratio):
    """Pure-numpy reference with the same semantics (random_first=False)."""
    m = int(math.ceil(ratio * n))
    out = []
    pos_np = pos_np.astype(np.float32)
    for b in range(bsz):
        pts = pos_np[b * n:(b + 1) * n]
        dist = ((pts - pts[0]) ** 2).sum(axis=1)
        sel = [0]
        for _ in range(1, m):
            nxt = int(np.argmax(dist))
            sel.append(nxt)
            dist = np.minimum(dist, ((pts - pts[nxt]) ** 2).sum(axis=1))
        out.extend(b * n + s for s in sel)
    return np.array(out, dtype=np.int32)


if __name__ == "__main__":
    key = jax.random.PRNGKey(0)
    B, N, D = 2, 100, 3          # 2 batch segments of 100 3-D points each
    ratio = 0.25                 # -> 25 samples per segment

    pos = jax.random.normal(key, (B * N, D), dtype=jnp.float32)
    batch = np.repeat(np.arange(B), N)   # mirrors the module's `batch` argument

    idx = fps(pos, ratio, random_first=False, batch=batch)
    idx = jax.block_until_ready(idx)

    ref = _fps_reference(np.asarray(pos), B, N, ratio)
    assert idx.shape == ref.shape, (idx.shape, ref.shape)
    assert np.array_equal(np.asarray(idx), ref), (np.asarray(idx), ref)

    print("KERNEL_OK")
</pallas_src>

<mosaic_0001>
module attributes {stable_mosaic.version = 11 : i64} {
  func.func @kernel(%arg0: i32, %arg1: memref<1x3x8x128xf32, #tpu.memory_space<vmem>>, %arg2: memref<1x8x128xi32, #tpu.memory_space<vmem>>) attributes {dimension_semantics = [#tpu.dimension_semantics<parallel>], iteration_bounds = array<i64: 1>, scalar_prefetch = 0 : i64, scratch_operands = 0 : i64, tpu.core_type = #tpu.core_type<tc>, window_params = [{transform_indices = @transform_0, window_bounds = array<i64: 1, 3, 8, 128>}, {transform_indices = @transform_1, window_bounds = array<i64: 1, 8, 128>}]} {
    %0 = tpu.iota {dimensions = array<i32: 1>} : vector<8x128xi32>
    %1 = tpu.iota {dimensions = array<i32: 1>} : vector<8x128xi32>
    %2 = tpu.iota {dimensions = array<i32: 0>} : vector<8x1xi32>
    %c100_i32 = arith.constant 100 : i32
    %3 = vector.broadcast %c100_i32 : i32 to vector<8x128xi32>
    %4 = arith.cmpi slt, %0, %3 : vector<8x128xi32>
    %c8_i32 = arith.constant 8 : i32
    %5 = arith.muli %arg0, %c8_i32 : i32
    %6 = vector.broadcast %5 : i32 to vector<8x1xi32>
    %7 = arith.addi %6, %2 : vector<8x1xi32>
    %c100_i32_0 = arith.constant 100 : i32
    %8 = vector.broadcast %c100_i32_0 : i32 to vector<8x1xi32>
    %9 = arith.muli %7, %8 : vector<8x1xi32>
    %c0 = arith.constant 0 : index
    %c0_1 = arith.constant 0 : index
    %c0_2 = arith.constant 0 : index
    %c0_3 = arith.constant 0 : index
    %10 = vector.load %arg1[%c0, %c0_1, %c0_2, %c0_3] : memref<1x3x8x128xf32, #tpu.memory_space<vmem>>, vector<1x1x8x128xf32>
    %11 = vector.shape_cast %10 : vector<1x1x8x128xf32> to vector<8x128xf32>
    %c0_4 = arith.constant 0 : index
    %c1 = arith.constant 1 : index
    %c0_5 = arith.constant 0 : index
    %c0_6 = arith.constant 0 : index
    %12 = vector.load %arg1[%c0_4, %c1, %c0_5, %c0_6] : memref<1x3x8x128xf32, #tpu.memory_space<vmem>>, vector<1x1x8x128xf32>
    %13 = vector.shape_cast %12 : vector<1x1x8x128xf32> to vector<8x128xf32>
    %c0_7 = arith.constant 0 : index
    %c2 = arith.constant 2 : index
    %c0_8 = arith.constant 0 : index
    %c0_9 = arith.constant 0 : index
    %14 = vector.load %arg1[%c0_7, %c2, %c0_8, %c0_9] : memref<1x3x8x128xf32, #tpu.memory_space<vmem>>, vector<1x1x8x128xf32>
    %15 = vector.shape_cast %14 : vector<1x1x8x128xf32> to vector<8x128xf32>
    %c0_i32 = arith.constant 0 : i32
    %16 = vector.broadcast %c0_i32 : i32 to vector<8x1xi32>
    %17 = vector.broadcast %16 : vector<8x1xi32> to vector<8x128xi32>
    %18 = arith.cmpi eq, %0, %17 : vector<8x128xi32>
    %cst = arith.constant 0.000000e+00 : f32
    %19 = vector.broadcast %cst : f32 to vector<8x128xf32>
    %20 = arith.select %18, %11, %19 : vector<8x128xi1>, vector<8x128xf32>
    %cst_10 = arith.constant dense<0.000000e+00> : vector<8xf32>
    %21 = vector.multi_reduction <add>, %20, %cst_10 [1] : vector<8x128xf32> to vector<8xf32>
    %22 = vector.shape_cast %21 : vector<8xf32> to vector<8x1xf32>
    %23 = vector.broadcast %22 : vector<8x1xf32> to vector<8x128xf32>
    %24 = arith.subf %11, %23 : vector<8x128xf32>
    %25 = arith.mulf %24, %24 : vector<8x128xf32>
    %cst_11 = arith.constant 0.000000e+00 : f32
    %26 = vector.broadcast %cst_11 : f32 to vector<8x128xf32>
    %27 = arith.select %18, %13, %26 : vector<8x128xi1>, vector<8x128xf32>
    %cst_12 = arith.constant dense<0.000000e+00> : vector<8xf32>
    %28 = vector.multi_reduction <add>, %27, %cst_12 [1] : vector<8x128xf32> to vector<8xf32>
    %29 = vector.shape_cast %28 : vector<8xf32> to vector<8x1xf32>
    %30 = vector.broadcast %29 : vector<8x1xf32> to vector<8x128xf32>
    %31 = arith.subf %13, %30 : vector<8x128xf32>
    %32 = arith.mulf %31, %31 : vector<8x128xf32>
    %33 = arith.addf %25, %32 : vector<8x128xf32>
    %cst_13 = arith.constant 0.000000e+00 : f32
    %34 = vector.broadcast %cst_13 : f32 to vector<8x128xf32>
    %35 = arith.select %18, %15, %34 : vector<8x128xi1>, vector<8x128xf32>
    %cst_14 = arith.constant dense<0.000000e+00> : vector<8xf32>
    %36 = vector.multi_reduction <add>, %35, %cst_14 [1] : vector<8x128xf32> to vector<8xf32>
    %37 = vector.shape_cast %36 : vector<8xf32> to vector<8x1xf32>
    %38 = vector.broadcast %37 : vector<8x1xf32> to vector<8x128xf32>
    %39 = arith.subf %15, %38 : vector<8x128xf32>
    %40 = arith.mulf %39, %39 : vector<8x128xf32>
    %41 = arith.addf %33, %40 : vector<8x128xf32>
    %cst_15 = arith.constant 0xFF800000 : f32
    %42 = vector.broadcast %cst_15 : f32 to vector<8x128xf32>
    %43 = arith.select %4, %41, %42 : vector<8x128xi1>, vector<8x128xf32>
    %c0_i32_16 = arith.constant 0 : i32
    %44 = vector.broadcast %c0_i32_16 : i32 to vector<8x128xi32>
    %45 = arith.cmpi eq, %1, %44 : vector<8x128xi32>
    %46 = arith.addi %9, %16 : vector<8x1xi32>
    %c0_i32_17 = arith.constant 0 : i32
    %47 = vector.shape_cast %46 : vector<8x1xi32> to vector<8x1xi32>
    %48 = vector.broadcast %47 : vector<8x1xi32> to vector<8x128xi32>
    %49 = vector.broadcast %c0_i32_17 : i32 to vector<8x128xi32>
    %50 = arith.select %45, %48, %49 : vector<8x128xi1>, vector<8x128xi32>
    %c1_i32 = arith.constant 1 : i32
    %cst_18 = arith.constant dense<0xFF800000> : vector<8xf32>
    %51 = vector.multi_reduction <maximumf>, %43, %cst_18 [1] : vector<8x128xf32> to vector<8xf32>
    %52 = vector.shape_cast %51 : vector<8xf32> to vector<8x1xf32>
    %53 = vector.broadcast %52 : vector<8x1xf32> to vector<8x128xf32>
    %54 = arith.cmpf oeq, %43, %53 : vector<8x128xf32>
    %c128_i32 = arith.constant 128 : i32
    %55 = vector.broadcast %c128_i32 : i32 to vector<8x128xi32>
    %56 = arith.select %54, %0, %55 : vector<8x128xi1>, vector<8x128xi32>
    %cst_19 = arith.constant dense<2147483647> : vector<8xi32>
    %57 = vector.multi_reduction <minsi>, %56, %cst_19 [1] : vector<8x128xi32> to vector<8xi32>
    %58 = vector.shape_cast %57 : vector<8xi32> to vector<8x1xi32>
    %59 = vector.broadcast %c1_i32 : i32 to vector<8x128xi32>
    %60 = arith.cmpi eq, %1, %59 : vector<8x128xi32>
    %61 = arith.addi %9, %58 : vector<8x1xi32>
    %62 = vector.shape_cast %61 : vector<8x1xi32> to vector<8x1xi32>
    %63 = vector.broadcast %62 : vector<8x1xi32> to vector<8x128xi32>
    %64 = arith.select %60, %63, %50 : vector<8x128xi1>, vector<8x128xi32>
    %65 = vector.broadcast %58 : vector<8x1xi32> to vector<8x128xi32>
    %66 = arith.cmpi eq, %0, %65 : vector<8x128xi32>
    %cst_20 = arith.constant 0.000000e+00 : f32
    %67 = vector.broadcast %cst_20 : f32 to vector<8x128xf32>
    %68 = arith.select %66, %11, %67 : vector<8x128xi1>, vector<8x128xf32>
    %cst_21 = arith.constant dense<0.000000e+00> : vector<8xf32>
    %69 = vector.multi_reduction <add>, %68, %cst_21 [1] : vector<8x128xf32> to vector<8xf32>
    %70 = vector.shape_cast %69 : vector<8xf32> to vector<8x1xf32>
    %71 = vector.broadcast %70 : vector<8x1xf32> to vector<8x128xf32>
    %72 = arith.subf %11, %71 : vector<8x128xf32>
    %73 = arith.mulf %72, %72 : vector<8x128xf32>
    %cst_22 = arith.constant 0.000000e+00 : f32
    %74 = vector.broadcast %cst_22 : f32 to vector<8x128xf32>
    %75 = arith.select %66, %13, %74 : vector<8x128xi1>, vector<8x128xf32>
    %cst_23 = arith.constant dense<0.000000e+00> : vector<8xf32>
    %76 = vector.multi_reduction <add>, %75, %cst_23 [1] : vector<8x128xf32> to vector<8xf32>
    %77 = vector.shape_cast %76 : vector<8xf32> to vector<8x1xf32>
    %78 = vector.broadcast %77 : vector<8x1xf32> to vector<8x128xf32>
    %79 = arith.subf %13, %78 : vector<8x128xf32>
    %80 = arith.mulf %79, %79 : vector<8x128xf32>
    %81 = arith.addf %73, %80 : vector<8x128xf32>
    %cst_24 = arith.constant 0.000000e+00 : f32
    %82 = vector.broadcast %cst_24 : f32 to vector<8x128xf32>
    %83 = arith.select %66, %15, %82 : vector<8x128xi1>, vector<8x128xf32>
    %cst_25 = arith.constant dense<0.000000e+00> : vector<8xf32>
    %84 = vector.multi_reduction <add>, %83, %cst_25 [1] : vector<8x128xf32> to vector<8xf32>
    %85 = vector.shape_cast %84 : vector<8xf32> to vector<8x1xf32>
    %86 = vector.broadcast %85 : vector<8x1xf32> to vector<8x128xf32>
    %87 = arith.subf %15, %86 : vector<8x128xf32>
    %88 = arith.mulf %87, %87 : vector<8x128xf32>
    %89 = arith.addf %81, %88 : vector<8x128xf32>
    %90 = arith.minimumf %43, %89 : vector<8x128xf32>
    %c2_i32 = arith.constant 2 : i32
    %cst_26 = arith.constant dense<0xFF800000> : vector<8xf32>
    %91 = vector.multi_reduction <maximumf>, %90, %cst_26 [1] : vector<8x128xf32> to vector<8xf32>
    %92 = vector.shape_cast %91 : vector<8xf32> to vector<8x1xf32>
    %93 = vector.broadcast %92 : vector<8x1xf32> to vector<8x128xf32>
    %94 = arith.cmpf oeq, %90, %93 : vector<8x128xf32>
    %c128_i32_27 = arith.constant 128 : i32
    %95 = vector.broadcast %c128_i32_27 : i32 to vector<8x128xi32>
    %96 = arith.select %94, %0, %95 : vector<8x128xi1>, vector<8x128xi32>
    %cst_28 = arith.constant dense<2147483647> : vector<8xi32>
    %97 = vector.multi_reduction <minsi>, %96, %cst_28 [1] : vector<8x128xi32> to vector<8xi32>
    %98 = vector.shape_cast %97 : vector<8xi32> to vector<8x1xi32>
    %99 = vector.broadcast %c2_i32 : i32 to vector<8x128xi32>
    %100 = arith.cmpi eq, %1, %99 : vector<8x128xi32>
    %101 = arith.addi %9, %98 : vector<8x1xi32>
    %102 = vector.shape_cast %101 : vector<8x1xi32> to vector<8x1xi32>
    %103 = vector.broadcast %102 : vector<8x1xi32> to vector<8x128xi32>
    %104 = arith.select %100, %103, %64 : vector<8x128xi1>, vector<8x128xi32>
    %105 = vector.broadcast %98 : vector<8x1xi32> to vector<8x128xi32>
    %106 = arith.cmpi eq, %0, %105 : vector<8x128xi32>
    %cst_29 = arith.constant 0.000000e+00 : f32
    %107 = vector.broadcast %cst_29 : f32 to vector<8x128xf32>
    %108 = arith.select %106, %11, %107 : vector<8x128xi1>, vector<8x128xf32>
    %cst_30 = arith.constant dense<0.000000e+00> : vector<8xf32>
    %109 = vector.multi_reduction <add>, %108, %cst_30 [1] : vector<8x128xf32> to vector<8xf32>
    %110 = vector.shape_cast %109 : vector<8xf32> to vector<8x1xf32>
    %111 = vector.broadcast %110 : vector<8x1xf32> to vector<8x128xf32>
    %112 = arith.subf %11, %111 : vector<8x128xf32>
    %113 = arith.mulf %112, %112 : vector<8x128xf32>
    %cst_31 = arith.constant 0.000000e+00 : f32
    %114 = vector.broadcast %cst_31 : f32 to vector<8x128xf32>
    %115 = arith.select %106, %13, %114 : vector<8x128xi1>, vector<8x128xf32>
    %cst_32 = arith.constant dense<0.000000e+00> : vector<8xf32>
    %116 = vector.multi_reduction <add>, %115, %cst_32 [1] : vector<8x128xf32> to vector<8xf32>
    %117 = vector.shape_cast %116 : vector<8xf32> to vector<8x1xf32>
    %118 = vector.broadcast %117 : vector<8x1xf32> to vector<8x128xf32>
    %119 = arith.subf %13, %118 : vector<8x128xf32>
    %120 = arith.mulf %119, %119 : vector<8x128xf32>
    %121 = arith.addf %113, %120 : vector<8x128xf32>
    %cst_33 = arith.constant 0.000000e+00 : f32
    %122 = vector.broadcast %cst_33 : f32 to vector<8x128xf32>
    %123 = arith.select %106, %15, %122 : vector<8x128xi1>, vector<8x128xf32>
    %cst_34 = arith.constant dense<0.000000e+00> : vector<8xf32>
    %124 = vector.multi_reduction <add>, %123, %cst_34 [1] : vector<8x128xf32> to vector<8xf32>
    %125 = vector.shape_cast %124 : vector<8xf32> to vector<8x1xf32>
    %126 = vector.broadcast %125 : vector<8x1xf32> to vector<8x128xf32>
    %127 = arith.subf %15, %126 : vector<8x128xf32>
    %128 = arith.mulf %127, %127 : vector<8x128xf32>
    %129 = arith.addf %121, %128 : vector<8x128xf32>
    %130 = arith.minimumf %90, %129 : vector<8x128xf32>
    %c3_i32 = arith.constant 3 : i32
    %cst_35 = arith.constant dense<0xFF800000> : vector<8xf32>
    %131 = vector.multi_reduction <maximumf>, %130, %cst_35 [1] : vector<8x128xf32> to vector<8xf32>
    %132 = vector.shape_cast %131 : vector<8xf32> to vector<8x1xf32>
    %133 = vector.broadcast %132 : vector<8x1xf32> to vector<8x128xf32>
    %134 = arith.cmpf oeq, %130, %133 : vector<8x128xf32>
    %c128_i32_36 = arith.constant 128 : i32
    %135 = vector.broadcast %c128_i32_36 : i32 to vector<8x128xi32>
    %136 = arith.select %134, %0, %135 : vector<8x128xi1>, vector<8x128xi32>
    %cst_37 = arith.constant dense<2147483647> : vector<8xi32>
    %137 = vector.multi_reduction <minsi>, %136, %cst_37 [1] : vector<8x128xi32> to vector<8xi32>
    %138 = vector.shape_cast %137 : vector<8xi32> to vector<8x1xi32>
    %139 = vector.broadcast %c3_i32 : i32 to vector<8x128xi32>
    %140 = arith.cmpi eq, %1, %139 : vector<8x128xi32>
    %141 = arith.addi %9, %138 : vector<8x1xi32>
    %142 = vector.shape_cast %141 : vector<8x1xi32> to vector<8x1xi32>
    %143 = vector.broadcast %142 : vector<8x1xi32> to vector<8x128xi32>
    %144 = arith.select %140, %143, %104 : vector<8x128xi1>, vector<8x128xi32>
    %145 = vector.broadcast %138 : vector<8x1xi32> to vector<8x128xi32>
    %146 = arith.cmpi eq, %0, %145 : vector<8x128xi32>
    %cst_38 = arith.constant 0.000000e+00 : f32
    %147 = vector.broadcast %cst_38 : f32 to vector<8x128xf32>
    %148 = arith.select %146, %11, %147 : vector<8x128xi1>, vector<8x128xf32>
    %cst_39 = arith.constant dense<0.000000e+00> : vector<8xf32>
    %149 = vector.multi_reduction <add>, %148, %cst_39 [1] : vector<8x128xf32> to vector<8xf32>
    %150 = vector.shape_cast %149 : vector<8xf32> to vector<8x1xf32>
    %151 = vector.broadcast %150 : vector<8x1xf32> to vector<8x128xf32>
    %152 = arith.subf %11, %151 : vector<8x128xf32>
    %153 = arith.mulf %152, %152 : vector<8x128xf32>
    %cst_40 = arith.constant 0.000000e+00 : f32
    %154 = vector.broadcast %cst_40 : f32 to vector<8x128xf32>
    %155 = arith.select %146, %13, %154 : vector<8x128xi1>, vector<8x128xf32>
    %cst_41 = arith.constant dense<0.000000e+00> : vector<8xf32>
    %156 = vector.multi_reduction <add>, %155, %cst_41 [1] : vector<8x128xf32> to vector<8xf32>
    %157 = vector.shape_cast %156 : vector<8xf32> to vector<8x1xf32>
    %158 = vector.broadcast %157 : vector<8x1xf32> to vector<8x128xf32>
    %159 = arith.subf %13, %158 : vector<8x128xf32>
    %160 = arith.mulf %159, %159 : vector<8x128xf32>
    %161 = arith.addf %153, %160 : vector<8x128xf32>
    %cst_42 = arith.constant 0.000000e+00 : f32
    %162 = vector.broadcast %cst_42 : f32 to vector<8x128xf32>
    %163 = arith.select %146, %15, %162 : vector<8x128xi1>, vector<8x128xf32>
    %cst_43 = arith.constant dense<0.000000e+00> : vector<8xf32>
    %164 = vector.multi_reduction <add>, %163, %cst_43 [1] : vector<8x128xf32> to vector<8xf32>
    %165 = vector.shape_cast %164 : vector<8xf32> to vector<8x1xf32>
    %166 = vector.broadcast %165 : vector<8x1xf32> to vector<8x128xf32>
    %167 = arith.subf %15, %166 : vector<8x128xf32>
    %168 = arith.mulf %167, %167 : vector<8x128xf32>
    %169 = arith.addf %161, %168 : vector<8x128xf32>
    %170 = arith.minimumf %130, %169 : vector<8x128xf32>
    %c4_i32 = arith.constant 4 : i32
    %cst_44 = arith.constant dense<0xFF800000> : vector<8xf32>
    %171 = vector.multi_reduction <maximumf>, %170, %cst_44 [1] : vector<8x128xf32> to vector<8xf32>
    %172 = vector.shape_cast %171 : vector<8xf32> to vector<8x1xf32>
    %173 = vector.broadcast %172 : vector<8x1xf32> to vector<8x128xf32>
    %174 = arith.cmpf oeq, %170, %173 : vector<8x128xf32>
    %c128_i32_45 = arith.constant 128 : i32
    %175 = vector.broadcast %c128_i32_45 : i32 to vector<8x128xi32>
    %176 = arith.select %174, %0, %175 : vector<8x128xi1>, vector<8x128xi32>
    %cst_46 = arith.constant dense<2147483647> : vector<8xi32>
    %177 = vector.multi_reduction <minsi>, %176, %cst_46 [1] : vector<8x128xi32> to vector<8xi32>
    %178 = vector.shape_cast %177 : vector<8xi32> to vector<8x1xi32>
    %179 = vector.broadcast %c4_i32 : i32 to vector<8x128xi32>
    %180 = arith.cmpi eq, %1, %179 : vector<8x128xi32>
    %181 = arith.addi %9, %178 : vector<8x1xi32>
    %182 = vector.shape_cast %181 : vector<8x1xi32> to vector<8x1xi32>
    %183 = vector.broadcast %182 : vector<8x1xi32> to vector<8x128xi32>
    %184 = arith.select %180, %183, %144 : vector<8x128xi1>, vector<8x128xi32>
    %185 = vector.broadcast %178 : vector<8x1xi32> to vector<8x128xi32>
    %186 = arith.cmpi eq, %0, %185 : vector<8x128xi32>
    %cst_47 = arith.constant 0.000000e+00 : f32
    %187 = vector.broadcast %cst_47 : f32 to vector<8x128xf32>
    %188 = arith.select %186, %11, %187 : vector<8x128xi1>, vector<8x128xf32>
    %cst_48 = arith.constant dense<0.000000e+00> : vector<8xf32>
    %189 = vector.multi_reduction <add>, %188, %cst_48 [1] : vector<8x128xf32> to vector<8xf32>
    %190 = vector.shape_cast %189 : vector<8xf32> to vector<8x1xf32>
    %191 = vector.broadcast %190 : vector<8x1xf32> to vector<8x128xf32>
    %192 = arith.subf %11, %191 : vector<8x128xf32>
    %193 = arith.mulf %192, %192 : vector<8x128xf32>
    %cst_49 = arith.constant 0.000000e+00 : f32
    %194 = vector.broadcast %cst_49 : f32 to vector<8x128xf32>
    %195 = arith.select %186, %13, %194 : vector<8x128xi1>, vector<8x128xf32>
    %cst_50 = arith.constant dense<0.000000e+00> : vector<8xf32>
    %196 = vector.multi_reduction <add>, %195, %cst_50 [1] : vector<8x128xf32> to vector<8xf32>
    %197 = vector.shape_cast %196 : vector<8xf32> to vector<8x1xf32>
    %198 = vector.broadcast %197 : vector<8x1xf32> to vector<8x128xf32>
    %199 = arith.subf %13, %198 : vector<8x128xf32>
    %200 = arith.mulf %199, %199 : vector<8x128xf32>
    %201 = arith.addf %193, %200 : vector<8x128xf32>
    %cst_51 = arith.constant 0.000000e+00 : f32
    %202 = vector.broadcast %cst_51 : f32 to vector<8x128xf32>
    %203 = arith.select %186, %15, %202 : vector<8x128xi1>, vector<8x128xf32>
    %cst_52 = arith.constant dense<0.000000e+00> : vector<8xf32>
    %204 = vector.multi_reduction <add>, %203, %cst_52 [1] : vector<8x128xf32> to vector<8xf32>
    %205 = vector.shape_cast %204 : vector<8xf32> to vector<8x1xf32>
    %206 = vector.broadcast %205 : vector<8x1xf32> to vector<8x128xf32>
    %207 = arith.subf %15, %206 : vector<8x128xf32>
    %208 = arith.mulf %207, %207 : vector<8x128xf32>
    %209 = arith.addf %201, %208 : vector<8x128xf32>
    %210 = arith.minimumf %170, %209 : vector<8x128xf32>
    %c5_i32 = arith.constant 5 : i32
    %cst_53 = arith.constant dense<0xFF800000> : vector<8xf32>
    %211 = vector.multi_reduction <maximumf>, %210, %cst_53 [1] : vector<8x128xf32> to vector<8xf32>
    %212 = vector.shape_cast %211 : vector<8xf32> to vector<8x1xf32>
    %213 = vector.broadcast %212 : vector<8x1xf32> to vector<8x128xf32>
    %214 = arith.cmpf oeq, %210, %213 : vector<8x128xf32>
    %c128_i32_54 = arith.constant 128 : i32
    %215 = vector.broadcast %c128_i32_54 : i32 to vector<8x128xi32>
    %216 = arith.select %214, %0, %215 : vector<8x128xi1>, vector<8x128xi32>
    %cst_55 = arith.constant dense<2147483647> : vector<8xi32>
    %217 = vector.multi_reduction <minsi>, %216, %cst_55 [1] : vector<8x128xi32> to vector<8xi32>
    %218 = vector.shape_cast %217 : vector<8xi32> to vector<8x1xi32>
    %219 = vector.broadcast %c5_i32 : i32 to vector<8x128xi32>
    %220 = arith.cmpi eq, %1, %219 : vector<8x128xi32>
    %221 = arith.addi %9, %218 : vector<8x1xi32>
    %222 = vector.shape_cast %221 : vector<8x1xi32> to vector<8x1xi32>
    %223 = vector.broadcast %222 : vector<8x1xi32> to vector<8x128xi32>
    %224 = arith.select %220, %223, %184 : vector<8x128xi1>, vector<8x128xi32>
    %225 = vector.broadcast %218 : vector<8x1xi32> to vector<8x128xi32>
    %226 = arith.cmpi eq, %0, %225 : vector<8x128xi32>
    %cst_56 = arith.constant 0.000000e+00 : f32
    %227 = vector.broadcast %cst_56 : f32 to vector<8x128xf32>
    %228 = arith.select %226, %11, %227 : vector<8x128xi1>, vector<8x128xf32>
    %cst_57 = arith.constant dense<0.000000e+00> : vector<8xf32>
    %229 = vector.multi_reduction <add>, %228, %cst_57 [1] : vector<8x128xf32> to vector<8xf32>
    %230 = vector.shape_cast %229 : vector<8xf32> to vector<8x1xf32>
    %231 = vector.broadcast %230 : vector<8x1xf32> to vector<8x128xf32>
    %232 = arith.subf %11, %231 : vector<8x128xf32>
    %233 = arith.mulf %232, %232 : vector<8x128xf32>
    %cst_58 = arith.constant 0.000000e+00 : f32
    %234 = vector.broadcast %cst_58 : f32 to vector<8x128xf32>
    %235 = arith.select %226, %13, %234 : vector<8x128xi1>, vector<8x128xf32>
    %cst_59 = arith.constant dense<0.000000e+00> : vector<8xf32>
    %236 = vector.multi_reduction <add>, %235, %cst_59 [1] : vector<8x128xf32> to vector<8xf32>
    %237 = vector.shape_cast %236 : vector<8xf32> to vector<8x1xf32>
    %238 = vector.broadcast %237 : vector<8x1xf32> to vector<8x128xf32>
    %239 = arith.subf %13, %238 : vector<8x128xf32>
    %240 = arith.mulf %239, %239 : vector<8x128xf32>
    %241 = arith.addf %233, %240 : vector<8x128xf32>
    %cst_60 = arith.constant 0.000000e+00 : f32
    %242 = vector.broadcast %cst_60 : f32 to vector<8x128xf32>
    %243 = arith.select %226, %15, %242 : vector<8x128xi1>, vector<8x128xf32>
    %cst_61 = arith.constant dense<0.000000e+00> : vector<8xf32>
    %244 = vector.multi_reduction <add>, %243, %cst_61 [1] : vector<8x128xf32> to vector<8xf32>
    %245 = vector.shape_cast %244 : vector<8xf32> to vector<8x1xf32>
    %246 = vector.broadcast %245 : vector<8x1xf32> to vector<8x128xf32>
    %247 = arith.subf %15, %246 : vector<8x128xf32>
    %248 = arith.mulf %247, %247 : vector<8x128xf32>
    %249 = arith.addf %241, %248 : vector<8x128xf32>
    %250 = arith.minimumf %210, %249 : vector<8x128xf32>
    %c6_i32 = arith.constant 6 : i32
    %cst_62 = arith.constant dense<0xFF800000> : vector<8xf32>
    %251 = vector.multi_reduction <maximumf>, %250, %cst_62 [1] : vector<8x128xf32> to vector<8xf32>
    %252 = vector.shape_cast %251 : vector<8xf32> to vector<8x1xf32>
    %253 = vector.broadcast %252 : vector<8x1xf32> to vector<8x128xf32>
    %254 = arith.cmpf oeq, %250, %253 : vector<8x128xf32>
    %c128_i32_63 = arith.constant 128 : i32
    %255 = vector.broadcast %c128_i32_63 : i32 to vector<8x128xi32>
    %256 = arith.select %254, %0, %255 : vector<8x128xi1>, vector<8x128xi32>
    %cst_64 = arith.constant dense<2147483647> : vector<8xi32>
    %257 = vector.multi_reduction <minsi>, %256, %cst_64 [1] : vector<8x128xi32> to vector<8xi32>
    %258 = vector.shape_cast %257 : vector<8xi32> to vector<8x1xi32>
    %259 = vector.broadcast %c6_i32 : i32 to vector<8x128xi32>
    %260 = arith.cmpi eq, %1, %259 : vector<8x128xi32>
    %261 = arith.addi %9, %258 : vector<8x1xi32>
    %262 = vector.shape_cast %261 : vector<8x1xi32> to vector<8x1xi32>
    %263 = vector.broadcast %262 : vector<8x1xi32> to vector<8x128xi32>
    %264 = arith.select %260, %263, %224 : vector<8x128xi1>, vector<8x128xi32>
    %265 = vector.broadcast %258 : vector<8x1xi32> to vector<8x128xi32>
    %266 = arith.cmpi eq, %0, %265 : vector<8x128xi32>
    %cst_65 = arith.constant 0.000000e+00 : f32
    %267 = vector.broadcast %cst_65 : f32 to vector<8x128xf32>
    %268 = arith.select %266, %11, %267 : vector<8x128xi1>, vector<8x128xf32>
    %cst_66 = arith.constant dense<0.000000e+00> : vector<8xf32>
    %269 = vector.multi_reduction <add>, %268, %cst_66 [1] : vector<8x128xf32> to vector<8xf32>
    %270 = vector.shape_cast %269 : vector<8xf32> to vector<8x1xf32>
    %271 = vector.broadcast %270 : vector<8x1xf32> to vector<8x128xf32>
    %272 = arith.subf %11, %271 : vector<8x128xf32>
    %273 = arith.mulf %272, %272 : vector<8x128xf32>
    %cst_67 = arith.constant 0.000000e+00 : f32
    %274 = vector.broadcast %cst_67 : f32 to vector<8x128xf32>
    %275 = arith.select %266, %13, %274 : vector<8x128xi1>, vector<8x128xf32>
    %cst_68 = arith.constant dense<0.000000e+00> : vector<8xf32>
    %276 = vector.multi_reduction <add>, %275, %cst_68 [1] : vector<8x128xf32> to vector<8xf32>
    %277 = vector.shape_cast %276 : vector<8xf32> to vector<8x1xf32>
    %278 = vector.broadcast %277 : vector<8x1xf32> to vector<8x128xf32>
    %279 = arith.subf %13, %278 : vector<8x128xf32>
    %280 = arith.mulf %279, %279 : vector<8x128xf32>
    %281 = arith.addf %273, %280 : vector<8x128xf32>
    %cst_69 = arith.constant 0.000000e+00 : f32
    %282 = vector.broadcast %cst_69 : f32 to vector<8x128xf32>
    %283 = arith.select %266, %15, %282 : vector<8x128xi1>, vector<8x128xf32>
    %cst_70 = arith.constant dense<0.000000e+00> : vector<8xf32>
    %284 = vector.multi_reduction <add>, %283, %cst_70 [1] : vector<8x128xf32> to vector<8xf32>
    %285 = vector.shape_cast %284 : vector<8xf32> to vector<8x1xf32>
    %286 = vector.broadcast %285 : vector<8x1xf32> to vector<8x128xf32>
    %287 = arith.subf %15, %286 : vector<8x128xf32>
    %288 = arith.mulf %287, %287 : vector<8x128xf32>
    %289 = arith.addf %281, %288 : vector<8x128xf32>
    %290 = arith.minimumf %250, %289 : vector<8x128xf32>
    %c7_i32 = arith.constant 7 : i32
    %cst_71 = arith.constant dense<0xFF800000> : vector<8xf32>
    %291 = vector.multi_reduction <maximumf>, %290, %cst_71 [1] : vector<8x128xf32> to vector<8xf32>
    %292 = vector.shape_cast %291 : vector<8xf32> to vector<8x1xf32>
    %293 = vector.broadcast %292 : vector<8x1xf32> to vector<8x128xf32>
    %294 = arith.cmpf oeq, %290, %293 : vector<8x128xf32>
    %c128_i32_72 = arith.constant 128 : i32
    %295 = vector.broadcast %c128_i32_72 : i32 to vector<8x128xi32>
    %296 = arith.select %294, %0, %295 : vector<8x128xi1>, vector<8x128xi32>
    %cst_73 = arith.constant dense<2147483647> : vector<8xi32>
    %297 = vector.multi_reduction <minsi>, %296, %cst_73 [1] : vector<8x128xi32> to vector<8xi32>
    %298 = vector.shape_cast %297 : vector<8xi32> to vector<8x1xi32>
    %299 = vector.broadcast %c7_i32 : i32 to vector<8x128xi32>
    %300 = arith.cmpi eq, %1, %299 : vector<8x128xi32>
    %301 = arith.addi %9, %298 : vector<8x1xi32>
    %302 = vector.shape_cast %301 : vector<8x1xi32> to vector<8x1xi32>
    %303 = vector.broadcast %302 : vector<8x1xi32> to vector<8x128xi32>
    %304 = arith.select %300, %303, %264 : vector<8x128xi1>, vector<8x128xi32>
    %305 = vector.broadcast %298 : vector<8x1xi32> to vector<8x128xi32>
    %306 = arith.cmpi eq, %0, %305 : vector<8x128xi32>
    %cst_74 = arith.constant 0.000000e+00 : f32
    %307 = vector.broadcast %cst_74 : f32 to vector<8x128xf32>
    %308 = arith.select %306, %11, %307 : vector<8x128xi1>, vector<8x128xf32>
    %cst_75 = arith.constant dense<0.000000e+00> : vector<8xf32>
    %309 = vector.multi_reduction <add>, %308, %cst_75 [1] : vector<8x128xf32> to vector<8xf32>
    %310 = vector.shape_cast %309 : vector<8xf32> to vector<8x1xf32>
    %311 = vector.broadcast %310 : vector<8x1xf32> to vector<8x128xf32>
    %312 = arith.subf %11, %311 : vector<8x128xf32>
    %313 = arith.mulf %312, %312 : vector<8x128xf32>
    %cst_76 = arith.constant 0.000000e+00 : f32
    %314 = vector.broadcast %cst_76 : f32 to vector<8x128xf32>
    %315 = arith.select %306, %13, %314 : vector<8x128xi1>, vector<8x128xf32>
    %cst_77 = arith.constant dense<0.000000e+00> : vector<8xf32>
    %316 = vector.multi_reduction <add>, %315, %cst_77 [1] : vector<8x128xf32> to vector<8xf32>
    %317 = vector.shape_cast %316 : vector<8xf32> to vector<8x1xf32>
    %318 = vector.broadcast %317 : vector<8x1xf32> to vector<8x128xf32>
    %319 = arith.subf %13, %318 : vector<8x128xf32>
    %320 = arith.mulf %319, %319 : vector<8x128xf32>
    %321 = arith.addf %313, %320 : vector<8x128xf32>
    %cst_78 = arith.constant 0.000000e+00 : f32
    %322 = vector.broadcast %cst_78 : f32 to vector<8x128xf32>
    %323 = arith.select %306, %15, %322 : vector<8x128xi1>, vector<8x128xf32>
    %cst_79 = arith.constant dense<0.000000e+00> : vector<8xf32>
    %324 = vector.multi_reduction <add>, %323, %cst_79 [1] : vector<8x128xf32> to vector<8xf32>
    %325 = vector.shape_cast %324 : vector<8xf32> to vector<8x1xf32>
    %326 = vector.broadcast %325 : vector<8x1xf32> to vector<8x128xf32>
    %327 = arith.subf %15, %326 : vector<8x128xf32>
    %328 = arith.mulf %327, %327 : vector<8x128xf32>
    %329 = arith.addf %321, %328 : vector<8x128xf32>
    %330 = arith.minimumf %290, %329 : vector<8x128xf32>
    %c8_i32_80 = arith.constant 8 : i32
    %cst_81 = arith.constant dense<0xFF800000> : vector<8xf32>
    %331 = vector.multi_reduction <maximumf>, %330, %cst_81 [1] : vector<8x128xf32> to vector<8xf32>
    %332 = vector.shape_cast %331 : vector<8xf32> to vector<8x1xf32>
    %333 = vector.broadcast %332 : vector<8x1xf32> to vector<8x128xf32>
    %334 = arith.cmpf oeq, %330, %333 : vector<8x128xf32>
    %c128_i32_82 = arith.constant 128 : i32
    %335 = vector.broadcast %c128_i32_82 : i32 to vector<8x128xi32>
    %336 = arith.select %334, %0, %335 : vector<8x128xi1>, vector<8x128xi32>
    %cst_83 = arith.constant dense<2147483647> : vector<8xi32>
    %337 = vector.multi_reduction <minsi>, %336, %cst_83 [1] : vector<8x128xi32> to vector<8xi32>
    %338 = vector.shape_cast %337 : vector<8xi32> to vector<8x1xi32>
    %339 = vector.broadcast %c8_i32_80 : i32 to vector<8x128xi32>
    %340 = arith.cmpi eq, %1, %339 : vector<8x128xi32>
    %341 = arith.addi %9, %338 : vector<8x1xi32>
    %342 = vector.shape_cast %341 : vector<8x1xi32> to vector<8x1xi32>
    %343 = vector.broadcast %342 : vector<8x1xi32> to vector<8x128xi32>
    %344 = arith.select %340, %343, %304 : vector<8x128xi1>, vector<8x128xi32>
    %345 = vector.broadcast %338 : vector<8x1xi32> to vector<8x128xi32>
    %346 = arith.cmpi eq, %0, %345 : vector<8x128xi32>
    %cst_84 = arith.constant 0.000000e+00 : f32
    %347 = vector.broadcast %cst_84 : f32 to vector<8x128xf32>
    %348 = arith.select %346, %11, %347 : vector<8x128xi1>, vector<8x128xf32>
    %cst_85 = arith.constant dense<0.000000e+00> : vector<8xf32>
    %349 = vector.multi_reduction <add>, %348, %cst_85 [1] : vector<8x128xf32> to vector<8xf32>
    %350 = vector.shape_cast %349 : vector<8xf32> to vector<8x1xf32>
    %351 = vector.broadcast %350 : vector<8x1xf32> to vector<8x128xf32>
    %352 = arith.subf %11, %351 : vector<8x128xf32>
    %353 = arith.mulf %352, %352 : vector<8x128xf32>
    %cst_86 = arith.constant 0.000000e+00 : f32
    %354 = vector.broadcast %cst_86 : f32 to vector<8x128xf32>
    %355 = arith.select %346, %13, %354 : vector<8x128xi1>, vector<8x128xf32>
    %cst_87 = arith.constant dense<0.000000e+00> : vector<8xf32>
    %356 = vector.multi_reduction <add>, %355, %cst_87 [1] : vector<8x128xf32> to vector<8xf32>
    %357 = vector.shape_cast %356 : vector<8xf32> to vector<8x1xf32>
    %358 = vector.broadcast %357 : vector<8x1xf32> to vector<8x128xf32>
    %359 = arith.subf %13, %358 : vector<8x128xf32>
    %360 = arith.mulf %359, %359 : vector<8x128xf32>
    %361 = arith.addf %353, %360 : vector<8x128xf32>
    %cst_88 = arith.constant 0.000000e+00 : f32
    %362 = vector.broadcast %cst_88 : f32 to vector<8x128xf32>
    %363 = arith.select %346, %15, %362 : vector<8x128xi1>, vector<8x128xf32>
    %cst_89 = arith.constant dense<0.000000e+00> : vector<8xf32>
    %364 = vector.multi_reduction <add>, %363, %cst_89 [1] : vector<8x128xf32> to vector<8xf32>
    %365 = vector.shape_cast %364 : vector<8xf32> to vector<8x1xf32>
    %366 = vector.broadcast %365 : vector<8x1xf32> to vector<8x128xf32>
    %367 = arith.subf %15, %366 : vector<8x128xf32>
    %368 = arith.mulf %367, %367 : vector<8x128xf32>
    %369 = arith.addf %361, %368 : vector<8x128xf32>
    %370 = arith.minimumf %330, %369 : vector<8x128xf32>
    %c9_i32 = arith.constant 9 : i32
    %cst_90 = arith.constant dense<0xFF800000> : vector<8xf32>
    %371 = vector.multi_reduction <maximumf>, %370, %cst_90 [1] : vector<8x128xf32> to vector<8xf32>
    %372 = vector.shape_cast %371 : vector<8xf32> to vector<8x1xf32>
    %373 = vector.broadcast %372 : vector<8x1xf32> to vector<8x128xf32>
    %374 = arith.cmpf oeq, %370, %373 : vector<8x128xf32>
    %c128_i32_91 = arith.constant 128 : i32
    %375 = vector.broadcast %c128_i32_91 : i32 to vector<8x128xi32>
    %376 = arith.select %374, %0, %375 : vector<8x128xi1>, vector<8x128xi32>
    %cst_92 = arith.constant dense<2147483647> : vector<8xi32>
    %377 = vector.multi_reduction <minsi>, %376, %cst_92 [1] : vector<8x128xi32> to vector<8xi32>
    %378 = vector.shape_cast %377 : vector<8xi32> to vector<8x1xi32>
    %379 = vector.broadcast %c9_i32 : i32 to vector<8x128xi32>
    %380 = arith.cmpi eq, %1, %379 : vector<8x128xi32>
    %381 = arith.addi %9, %378 : vector<8x1xi32>
    %382 = vector.shape_cast %381 : vector<8x1xi32> to vector<8x1xi32>
    %383 = vector.broadcast %382 : vector<8x1xi32> to vector<8x128xi32>
    %384 = arith.select %380, %383, %344 : vector<8x128xi1>, vector<8x128xi32>
    %385 = vector.broadcast %378 : vector<8x1xi32> to vector<8x128xi32>
    %386 = arith.cmpi eq, %0, %385 : vector<8x128xi32>
    %cst_93 = arith.constant 0.000000e+00 : f32
    %387 = vector.broadcast %cst_93 : f32 to vector<8x128xf32>
    %388 = arith.select %386, %11, %387 : vector<8x128xi1>, vector<8x128xf32>
    %cst_94 = arith.constant dense<0.000000e+00> : vector<8xf32>
    %389 = vector.multi_reduction <add>, %388, %cst_94 [1] : vector<8x128xf32> to vector<8xf32>
    %390 = vector.shape_cast %389 : vector<8xf32> to vector<8x1xf32>
    %391 = vector.broadcast %390 : vector<8x1xf32> to vector<8x128xf32>
    %392 = arith.subf %11, %391 : vector<8x128xf32>
    %393 = arith.mulf %392, %392 : vector<8x128xf32>
    %cst_95 = arith.constant 0.000000e+00 : f32
    %394 = vector.broadcast %cst_95 : f32 to vector<8x128xf32>
    %395 = arith.select %386, %13, %394 : vector<8x128xi1>, vector<8x128xf32>
    %cst_96 = arith.constant dense<0.000000e+00> : vector<8xf32>
    %396 = vector.multi_reduction <add>, %395, %cst_96 [1] : vector<8x128xf32> to vector<8xf32>
    %397 = vector.shape_cast %396 : vector<8xf32> to vector<8x1xf32>
    %398 = vector.broadcast %397 : vector<8x1xf32> to vector<8x128xf32>
    %399 = arith.subf %13, %398 : vector<8x128xf32>
    %400 = arith.mulf %399, %399 : vector<8x128xf32>
    %401 = arith.addf %393, %400 : vector<8x128xf32>
    %cst_97 = arith.constant 0.000000e+00 : f32
    %402 = vector.broadcast %cst_97 : f32 to vector<8x128xf32>
    %403 = arith.select %386, %15, %402 : vector<8x128xi1>, vector<8x128xf32>
    %cst_98 = arith.constant dense<0.000000e+00> : vector<8xf32>
    %404 = vector.multi_reduction <add>, %403, %cst_98 [1] : vector<8x128xf32> to vector<8xf32>
    %405 = vector.shape_cast %404 : vector<8xf32> to vector<8x1xf32>
    %406 = vector.broadcast %405 : vector<8x1xf32> to vector<8x128xf32>
    %407 = arith.subf %15, %406 : vector<8x128xf32>
    %408 = arith.mulf %407, %407 : vector<8x128xf32>
    %409 = arith.addf %401, %408 : vector<8x128xf32>
    %410 = arith.minimumf %370, %409 : vector<8x128xf32>
    %c10_i32 = arith.constant 10 : i32
    %cst_99 = arith.constant dense<0xFF800000> : vector<8xf32>
    %411 = vector.multi_reduction <maximumf>, %410, %cst_99 [1] : vector<8x128xf32> to vector<8xf32>
    %412 = vector.shape_cast %411 : vector<8xf32> to vector<8x1xf32>
    %413 = vector.broadcast %412 : vector<8x1xf32> to vector<8x128xf32>
    %414 = arith.cmpf oeq, %410, %413 : vector<8x128xf32>
    %c128_i32_100 = arith.constant 128 : i32
    %415 = vector.broadcast %c128_i32_100 : i32 to vector<8x128xi32>
    %416 = arith.select %414, %0, %415 : vector<8x128xi1>, vector<8x128xi32>
    %cst_101 = arith.constant dense<2147483647> : vector<8xi32>
    %417 = vector.multi_reduction <minsi>, %416, %cst_101 [1] : vector<8x128xi32> to vector<8xi32>
    %418 = vector.shape_cast %417 : vector<8xi32> to vector<8x1xi32>
    %419 = vector.broadcast %c10_i32 : i32 to vector<8x128xi32>
    %420 = arith.cmpi eq, %1, %419 : vector<8x128xi32>
    %421 = arith.addi %9, %418 : vector<8x1xi32>
    %422 = vector.shape_cast %421 : vector<8x1xi32> to vector<8x1xi32>
    %423 = vector.broadcast %422 : vector<8x1xi32> to vector<8x128xi32>
    %424 = arith.select %420, %423, %384 : vector<8x128xi1>, vector<8x128xi32>
    %425 = vector.broadcast %418 : vector<8x1xi32> to vector<8x128xi32>
    %426 = arith.cmpi eq, %0, %425 : vector<8x128xi32>
    %cst_102 = arith.constant 0.000000e+00 : f32
    %427 = vector.broadcast %cst_102 : f32 to vector<8x128xf32>
    %428 = arith.select %426, %11, %427 : vector<8x128xi1>, vector<8x128xf32>
    %cst_103 = arith.constant dense<0.000000e+00> : vector<8xf32>
    %429 = vector.multi_reduction <add>, %428, %cst_103 [1] : vector<8x128xf32> to vector<8xf32>
    %430 = vector.shape_cast %429 : vector<8xf32> to vector<8x1xf32>
    %431 = vector.broadcast %430 : vector<8x1xf32> to vector<8x128xf32>
    %432 = arith.subf %11, %431 : vector<8x128xf32>
    %433 = arith.mulf %432, %432 : vector<8x128xf32>
    %cst_104 = arith.constant 0.000000e+00 : f32
    %434 = vector.broadcast %cst_104 : f32 to vector<8x128xf32>
    %435 = arith.select %426, %13, %434 : vector<8x128xi1>, vector<8x128xf32>
    %cst_105 = arith.constant dense<0.000000e+00> : vector<8xf32>
    %436 = vector.multi_reduction <add>, %435, %cst_105 [1] : vector<8x128xf32> to vector<8xf32>
    %437 = vector.shape_cast %436 : vector<8xf32> to vector<8x1xf32>
    %438 = vector.broadcast %437 : vector<8x1xf32> to vector<8x128xf32>
    %439 = arith.subf %13, %438 : vector<8x128xf32>
    %440 = arith.mulf %439, %439 : vector<8x128xf32>
    %441 = arith.addf %433, %440 : vector<8x128xf32>
    %cst_106 = arith.constant 0.000000e+00 : f32
    %442 = vector.broadcast %cst_106 : f32 to vector<8x128xf32>
    %443 = arith.select %426, %15, %442 : vector<8x128xi1>, vector<8x128xf32>
    %cst_107 = arith.constant dense<0.000000e+00> : vector<8xf32>
    %444 = vector.multi_reduction <add>, %443, %cst_107 [1] : vector<8x128xf32> to vector<8xf32>
    %445 = vector.shape_cast %444 : vector<8xf32> to vector<8x1xf32>
    %446 = vector.broadcast %445 : vector<8x1xf32> to vector<8x128xf32>
    %447 = arith.subf %15, %446 : vector<8x128xf32>
    %448 = arith.mulf %447, %447 : vector<8x128xf32>
    %449 = arith.addf %441, %448 : vector<8x128xf32>
    %450 = arith.minimumf %410, %449 : vector<8x128xf32>
    %c11_i32 = arith.constant 11 : i32
    %cst_108 = arith.constant dense<0xFF800000> : vector<8xf32>
    %451 = vector.multi_reduction <maximumf>, %450, %cst_108 [1] : vector<8x128xf32> to vector<8xf32>
    %452 = vector.shape_cast %451 : vector<8xf32> to vector<8x1xf32>
    %453 = vector.broadcast %452 : vector<8x1xf32> to vector<8x128xf32>
    %454 = arith.cmpf oeq, %450, %453 : vector<8x128xf32>
    %c128_i32_109 = arith.constant 128 : i32
    %455 = vector.broadcast %c128_i32_109 : i32 to vector<8x128xi32>
    %456 = arith.select %454, %0, %455 : vector<8x128xi1>, vector<8x128xi32>
    %cst_110 = arith.constant dense<2147483647> : vector<8xi32>
    %457 = vector.multi_reduction <minsi>, %456, %cst_110 [1] : vector<8x128xi32> to vector<8xi32>
    %458 = vector.shape_cast %457 : vector<8xi32> to vector<8x1xi32>
    %459 = vector.broadcast %c11_i32 : i32 to vector<8x128xi32>
    %460 = arith.cmpi eq, %1, %459 : vector<8x128xi32>
    %461 = arith.addi %9, %458 : vector<8x1xi32>
    %462 = vector.shape_cast %461 : vector<8x1xi32> to vector<8x1xi32>
    %463 = vector.broadcast %462 : vector<8x1xi32> to vector<8x128xi32>
    %464 = arith.select %460, %463, %424 : vector<8x128xi1>, vector<8x128xi32>
    %465 = vector.broadcast %458 : vector<8x1xi32> to vector<8x128xi32>
    %466 = arith.cmpi eq, %0, %465 : vector<8x128xi32>
    %cst_111 = arith.constant 0.000000e+00 : f32
    %467 = vector.broadcast %cst_111 : f32 to vector<8x128xf32>
    %468 = arith.select %466, %11, %467 : vector<8x128xi1>, vector<8x128xf32>
    %cst_112 = arith.constant dense<0.000000e+00> : vector<8xf32>
    %469 = vector.multi_reduction <add>, %468, %cst_112 [1] : vector<8x128xf32> to vector<8xf32>
    %470 = vector.shape_cast %469 : vector<8xf32> to vector<8x1xf32>
    %471 = vector.broadcast %470 : vector<8x1xf32> to vector<8x128xf32>
    %472 = arith.subf %11, %471 : vector<8x128xf32>
    %473 = arith.mulf %472, %472 : vector<8x128xf32>
    %cst_113 = arith.constant 0.000000e+00 : f32
    %474 = vector.broadcast %cst_113 : f32 to vector<8x128xf32>
    %475 = arith.select %466, %13, %474 : vector<8x128xi1>, vector<8x128xf32>
    %cst_114 = arith.constant dense<0.000000e+00> : vector<8xf32>
    %476 = vector.multi_reduction <add>, %475, %cst_114 [1] : vector<8x128xf32> to vector<8xf32>
    %477 = vector.shape_cast %476 : vector<8xf32> to vector<8x1xf32>
    %478 = vector.broadcast %477 : vector<8x1xf32> to vector<8x128xf32>
    %479 = arith.subf %13, %478 : vector<8x128xf32>
    %480 = arith.mulf %479, %479 : vector<8x128xf32>
    %481 = arith.addf %473, %480 : vector<8x128xf32>
    %cst_115 = arith.constant 0.000000e+00 : f32
    %482 = vector.broadcast %cst_115 : f32 to vector<8x128xf32>
    %483 = arith.select %466, %15, %482 : vector<8x128xi1>, vector<8x128xf32>
    %cst_116 = arith.constant dense<0.000000e+00> : vector<8xf32>
    %484 = vector.multi_reduction <add>, %483, %cst_116 [1] : vector<8x128xf32> to vector<8xf32>
    %485 = vector.shape_cast %484 : vector<8xf32> to vector<8x1xf32>
    %486 = vector.broadcast %485 : vector<8x1xf32> to vector<8x128xf32>
    %487 = arith.subf %15, %486 : vector<8x128xf32>
    %488 = arith.mulf %487, %487 : vector<8x128xf32>
    %489 = arith.addf %481, %488 : vector<8x128xf32>
    %490 = arith.minimumf %450, %489 : vector<8x128xf32>
    %c12_i32 = arith.constant 12 : i32
    %cst_117 = arith.constant dense<0xFF800000> : vector<8xf32>
    %491 = vector.multi_reduction <maximumf>, %490, %cst_117 [1] : vector<8x128xf32> to vector<8xf32>
    %492 = vector.shape_cast %491 : vector<8xf32> to vector<8x1xf32>
    %493 = vector.broadcast %492 : vector<8x1xf32> to vector<8x128xf32>
    %494 = arith.cmpf oeq, %490, %493 : vector<8x128xf32>
    %c128_i32_118 = arith.constant 128 : i32
    %495 = vector.broadcast %c128_i32_118 : i32 to vector<8x128xi32>
    %496 = arith.select %494, %0, %495 : vector<8x128xi1>, vector<8x128xi32>
    %cst_119 = arith.constant dense<2147483647> : vector<8xi32>
    %497 = vector.multi_reduction <minsi>, %496, %cst_119 [1] : vector<8x128xi32> to vector<8xi32>
    %498 = vector.shape_cast %497 : vector<8xi32> to vector<8x1xi32>
    %499 = vector.broadcast %c12_i32 : i32 to vector<8x128xi32>
    %500 = arith.cmpi eq, %1, %499 : vector<8x128xi32>
    %501 = arith.addi %9, %498 : vector<8x1xi32>
    %502 = vector.shape_cast %501 : vector<8x1xi32> to vector<8x1xi32>
    %503 = vector.broadcast %502 : vector<8x1xi32> to vector<8x128xi32>
    %504 = arith.select %500, %503, %464 : vector<8x128xi1>, vector<8x128xi32>
    %505 = vector.broadcast %498 : vector<8x1xi32> to vector<8x128xi32>
    %506 = arith.cmpi eq, %0, %505 : vector<8x128xi32>
    %cst_120 = arith.constant 0.000000e+00 : f32
    %507 = vector.broadcast %cst_120 : f32 to vector<8x128xf32>
    %508 = arith.select %506, %11, %507 : vector<8x128xi1>, vector<8x128xf32>
    %cst_121 = arith.constant dense<0.000000e+00> : vector<8xf32>
    %509 = vector.multi_reduction <add>, %508, %cst_121 [1] : vector<8x128xf32> to vector<8xf32>
    %510 = vector.shape_cast %509 : vector<8xf32> to vector<8x1xf32>
    %511 = vector.broadcast %510 : vector<8x1xf32> to vector<8x128xf32>
    %512 = arith.subf %11, %511 : vector<8x128xf32>
    %513 = arith.mulf %512, %512 : vector<8x128xf32>
    %cst_122 = arith.constant 0.000000e+00 : f32
    %514 = vector.broadcast %cst_122 : f32 to vector<8x128xf32>
    %515 = arith.select %506, %13, %514 : vector<8x128xi1>, vector<8x128xf32>
    %cst_123 = arith.constant dense<0.000000e+00> : vector<8xf32>
    %516 = vector.multi_reduction <add>, %515, %cst_123 [1] : vector<8x128xf32> to vector<8xf32>
    %517 = vector.shape_cast %516 : vector<8xf32> to vector<8x1xf32>
    %518 = vector.broadcast %517 : vector<8x1xf32> to vector<8x128xf32>
    %519 = arith.subf %13, %518 : vector<8x128xf32>
    %520 = arith.mulf %519, %519 : vector<8x128xf32>
    %521 = arith.addf %513, %520 : vector<8x128xf32>
    %cst_124 = arith.constant 0.000000e+00 : f32
    %522 = vector.broadcast %cst_124 : f32 to vector<8x128xf32>
    %523 = arith.select %506, %15, %522 : vector<8x128xi1>, vector<8x128xf32>
    %cst_125 = arith.constant dense<0.000000e+00> : vector<8xf32>
    %524 = vector.multi_reduction <add>, %523, %cst_125 [1] : vector<8x128xf32> to vector<8xf32>
    %525 = vector.shape_cast %524 : vector<8xf32> to vector<8x1xf32>
    %526 = vector.broadcast %525 : vector<8x1xf32> to vector<8x128xf32>
    %527 = arith.subf %15, %526 : vector<8x128xf32>
    %528 = arith.mulf %527, %527 : vector<8x128xf32>
    %529 = arith.addf %521, %528 : vector<8x128xf32>
    %530 = arith.minimumf %490, %529 : vector<8x128xf32>
    %c13_i32 = arith.constant 13 : i32
    %cst_126 = arith.constant dense<0xFF800000> : vector<8xf32>
    %531 = vector.multi_reduction <maximumf>, %530, %cst_126 [1] : vector<8x128xf32> to vector<8xf32>
    %532 = vector.shape_cast %531 : vector<8xf32> to vector<8x1xf32>
    %533 = vector.broadcast %532 : vector<8x1xf32> to vector<8x128xf32>
    %534 = arith.cmpf oeq, %530, %533 : vector<8x128xf32>
    %c128_i32_127 = arith.constant 128 : i32
    %535 = vector.broadcast %c128_i32_127 : i32 to vector<8x128xi32>
    %536 = arith.select %534, %0, %535 : vector<8x128xi1>, vector<8x128xi32>
    %cst_128 = arith.constant dense<2147483647> : vector<8xi32>
    %537 = vector.multi_reduction <minsi>, %536, %cst_128 [1] : vector<8x128xi32> to vector<8xi32>
    %538 = vector.shape_cast %537 : vector<8xi32> to vector<8x1xi32>
    %539 = vector.broadcast %c13_i32 : i32 to vector<8x128xi32>
    %540 = arith.cmpi eq, %1, %539 : vector<8x128xi32>
    %541 = arith.addi %9, %538 : vector<8x1xi32>
    %542 = vector.shape_cast %541 : vector<8x1xi32> to vector<8x1xi32>
    %543 = vector.broadcast %542 : vector<8x1xi32> to vector<8x128xi32>
    %544 = arith.select %540, %543, %504 : vector<8x128xi1>, vector<8x128xi32>
    %545 = vector.broadcast %538 : vector<8x1xi32> to vector<8x128xi32>
    %546 = arith.cmpi eq, %0, %545 : vector<8x128xi32>
    %cst_129 = arith.constant 0.000000e+00 : f32
    %547 = vector.broadcast %cst_129 : f32 to vector<8x128xf32>
    %548 = arith.select %546, %11, %547 : vector<8x128xi1>, vector<8x128xf32>
    %cst_130 = arith.constant dense<0.000000e+00> : vector<8xf32>
    %549 = vector.multi_reduction <add>, %548, %cst_130 [1] : vector<8x128xf32> to vector<8xf32>
    %550 = vector.shape_cast %549 : vector<8xf32> to vector<8x1xf32>
    %551 = vector.broadcast %550 : vector<8x1xf32> to vector<8x128xf32>
    %552 = arith.subf %11, %551 : vector<8x128xf32>
    %553 = arith.mulf %552, %552 : vector<8x128xf32>
    %cst_131 = arith.constant 0.000000e+00 : f32
    %554 = vector.broadcast %cst_131 : f32 to vector<8x128xf32>
    %555 = arith.select %546, %13, %554 : vector<8x128xi1>, vector<8x128xf32>
    %cst_132 = arith.constant dense<0.000000e+00> : vector<8xf32>
    %556 = vector.multi_reduction <add>, %555, %cst_132 [1] : vector<8x128xf32> to vector<8xf32>
    %557 = vector.shape_cast %556 : vector<8xf32> to vector<8x1xf32>
    %558 = vector.broadcast %557 : vector<8x1xf32> to vector<8x128xf32>
    %559 = arith.subf %13, %558 : vector<8x128xf32>
    %560 = arith.mulf %559, %559 : vector<8x128xf32>
    %561 = arith.addf %553, %560 : vector<8x128xf32>
    %cst_133 = arith.constant 0.000000e+00 : f32
    %562 = vector.broadcast %cst_133 : f32 to vector<8x128xf32>
    %563 = arith.select %546, %15, %562 : vector<8x128xi1>, vector<8x128xf32>
    %cst_134 = arith.constant dense<0.000000e+00> : vector<8xf32>
    %564 = vector.multi_reduction <add>, %563, %cst_134 [1] : vector<8x128xf32> to vector<8xf32>
    %565 = vector.shape_cast %564 : vector<8xf32> to vector<8x1xf32>
    %566 = vector.broadcast %565 : vector<8x1xf32> to vector<8x128xf32>
    %567 = arith.subf %15, %566 : vector<8x128xf32>
    %568 = arith.mulf %567, %567 : vector<8x128xf32>
    %569 = arith.addf %561, %568 : vector<8x128xf32>
    %570 = arith.minimumf %530, %569 : vector<8x128xf32>
    %c14_i32 = arith.constant 14 : i32
    %cst_135 = arith.constant dense<0xFF800000> : vector<8xf32>
    %571 = vector.multi_reduction <maximumf>, %570, %cst_135 [1] : vector<8x128xf32> to vector<8xf32>
    %572 = vector.shape_cast %571 : vector<8xf32> to vector<8x1xf32>
    %573 = vector.broadcast %572 : vector<8x1xf32> to vector<8x128xf32>
    %574 = arith.cmpf oeq, %570, %573 : vector<8x128xf32>
    %c128_i32_136 = arith.constant 128 : i32
    %575 = vector.broadcast %c128_i32_136 : i32 to vector<8x128xi32>
    %576 = arith.select %574, %0, %575 : vector<8x128xi1>, vector<8x128xi32>
    %cst_137 = arith.constant dense<2147483647> : vector<8xi32>
    %577 = vector.multi_reduction <minsi>, %576, %cst_137 [1] : vector<8x128xi32> to vector<8xi32>
    %578 = vector.shape_cast %577 : vector<8xi32> to vector<8x1xi32>
    %579 = vector.broadcast %c14_i32 : i32 to vector<8x128xi32>
    %580 = arith.cmpi eq, %1, %579 : vector<8x128xi32>
    %581 = arith.addi %9, %578 : vector<8x1xi32>
    %582 = vector.shape_cast %581 : vector<8x1xi32> to vector<8x1xi32>
    %583 = vector.broadcast %582 : vector<8x1xi32> to vector<8x128xi32>
    %584 = arith.select %580, %583, %544 : vector<8x128xi1>, vector<8x128xi32>
    %585 = vector.broadcast %578 : vector<8x1xi32> to vector<8x128xi32>
    %586 = arith.cmpi eq, %0, %585 : vector<8x128xi32>
    %cst_138 = arith.constant 0.000000e+00 : f32
    %587 = vector.broadcast %cst_138 : f32 to vector<8x128xf32>
    %588 = arith.select %586, %11, %587 : vector<8x128xi1>, vector<8x128xf32>
    %cst_139 = arith.constant dense<0.000000e+00> : vector<8xf32>
    %589 = vector.multi_reduction <add>, %588, %cst_139 [1] : vector<8x128xf32> to vector<8xf32>
    %590 = vector.shape_cast %589 : vector<8xf32> to vector<8x1xf32>
    %591 = vector.broadcast %590 : vector<8x1xf32> to vector<8x128xf32>
    %592 = arith.subf %11, %591 : vector<8x128xf32>
    %593 = arith.mulf %592, %592 : vector<8x128xf32>
    %cst_140 = arith.constant 0.000000e+00 : f32
    %594 = vector.broadcast %cst_140 : f32 to vector<8x128xf32>
    %595 = arith.select %586, %13, %594 : vector<8x128xi1>, vector<8x128xf32>
    %cst_141 = arith.constant dense<0.000000e+00> : vector<8xf32>
    %596 = vector.multi_reduction <add>, %595, %cst_141 [1] : vector<8x128xf32> to vector<8xf32>
    %597 = vector.shape_cast %596 : vector<8xf32> to vector<8x1xf32>
    %598 = vector.broadcast %597 : vector<8x1xf32> to vector<8x128xf32>
    %599 = arith.subf %13, %598 : vector<8x128xf32>
    %600 = arith.mulf %599, %599 : vector<8x128xf32>
    %601 = arith.addf %593, %600 : vector<8x128xf32>
    %cst_142 = arith.constant 0.000000e+00 : f32
    %602 = vector.broadcast %cst_142 : f32 to vector<8x128xf32>
    %603 = arith.select %586, %15, %602 : vector<8x128xi1>, vector<8x128xf32>
    %cst_143 = arith.constant dense<0.000000e+00> : vector<8xf32>
    %604 = vector.multi_reduction <add>, %603, %cst_143 [1] : vector<8x128xf32> to vector<8xf32>
    %605 = vector.shape_cast %604 : vector<8xf32> to vector<8x1xf32>
    %606 = vector.broadcast %605 : vector<8x1xf32> to vector<8x128xf32>
    %607 = arith.subf %15, %606 : vector<8x128xf32>
    %608 = arith.mulf %607, %607 : vector<8x128xf32>
    %609 = arith.addf %601, %608 : vector<8x128xf32>
    %610 = arith.minimumf %570, %609 : vector<8x128xf32>
    %c15_i32 = arith.constant 15 : i32
    %cst_144 = arith.constant dense<0xFF800000> : vector<8xf32>
    %611 = vector.multi_reduction <maximumf>, %610, %cst_144 [1] : vector<8x128xf32> to vector<8xf32>
    %612 = vector.shape_cast %611 : vector<8xf32> to vector<8x1xf32>
    %613 = vector.broadcast %612 : vector<8x1xf32> to vector<8x128xf32>
    %614 = arith.cmpf oeq, %610, %613 : vector<8x128xf32>
    %c128_i32_145 = arith.constant 128 : i32
    %615 = vector.broadcast %c128_i32_145 : i32 to vector<8x128xi32>
    %616 = arith.select %614, %0, %615 : vector<8x128xi1>, vector<8x128xi32>
    %cst_146 = arith.constant dense<2147483647> : vector<8xi32>
    %617 = vector.multi_reduction <minsi>, %616, %cst_146 [1] : vector<8x128xi32> to vector<8xi32>
    %618 = vector.shape_cast %617 : vector<8xi32> to vector<8x1xi32>
    %619 = vector.broadcast %c15_i32 : i32 to vector<8x128xi32>
    %620 = arith.cmpi eq, %1, %619 : vector<8x128xi32>
    %621 = arith.addi %9, %618 : vector<8x1xi32>
    %622 = vector.shape_cast %621 : vector<8x1xi32> to vector<8x1xi32>
    %623 = vector.broadcast %622 : vector<8x1xi32> to vector<8x128xi32>
    %624 = arith.select %620, %623, %584 : vector<8x128xi1>, vector<8x128xi32>
    %625 = vector.broadcast %618 : vector<8x1xi32> to vector<8x128xi32>
    %626 = arith.cmpi eq, %0, %625 : vector<8x128xi32>
    %cst_147 = arith.constant 0.000000e+00 : f32
    %627 = vector.broadcast %cst_147 : f32 to vector<8x128xf32>
    %628 = arith.select %626, %11, %627 : vector<8x128xi1>, vector<8x128xf32>
    %cst_148 = arith.constant dense<0.000000e+00> : vector<8xf32>
    %629 = vector.multi_reduction <add>, %628, %cst_148 [1] : vector<8x128xf32> to vector<8xf32>
    %630 = vector.shape_cast %629 : vector<8xf32> to vector<8x1xf32>
    %631 = vector.broadcast %630 : vector<8x1xf32> to vector<8x128xf32>
    %632 = arith.subf %11, %631 : vector<8x128xf32>
    %633 = arith.mulf %632, %632 : vector<8x128xf32>
    %cst_149 = arith.constant 0.000000e+00 : f32
    %634 = vector.broadcast %cst_149 : f32 to vector<8x128xf32>
    %635 = arith.select %626, %13, %634 : vector<8x128xi1>, vector<8x128xf32>
    %cst_150 = arith.constant dense<0.000000e+00> : vector<8xf32>
    %636 = vector.multi_reduction <add>, %635, %cst_150 [1] : vector<8x128xf32> to vector<8xf32>
    %637 = vector.shape_cast %636 : vector<8xf32> to vector<8x1xf32>
    %638 = vector.broadcast %637 : vector<8x1xf32> to vector<8x128xf32>
    %639 = arith.subf %13, %638 : vector<8x128xf32>
    %640 = arith.mulf %639, %639 : vector<8x128xf32>
    %641 = arith.addf %633, %640 : vector<8x128xf32>
    %cst_151 = arith.constant 0.000000e+00 : f32
    %642 = vector.broadcast %cst_151 : f32 to vector<8x128xf32>
    %643 = arith.select %626, %15, %642 : vector<8x128xi1>, vector<8x128xf32>
    %cst_152 = arith.constant dense<0.000000e+00> : vector<8xf32>
    %644 = vector.multi_reduction <add>, %643, %cst_152 [1] : vector<8x128xf32> to vector<8xf32>
    %645 = vector.shape_cast %644 : vector<8xf32> to vector<8x1xf32>
    %646 = vector.broadcast %645 : vector<8x1xf32> to vector<8x128xf32>
    %647 = arith.subf %15, %646 : vector<8x128xf32>
    %648 = arith.mulf %647, %647 : vector<8x128xf32>
    %649 = arith.addf %641, %648 : vector<8x128xf32>
    %650 = arith.minimumf %610, %649 : vector<8x128xf32>
    %c16_i32 = arith.constant 16 : i32
    %cst_153 = arith.constant dense<0xFF800000> : vector<8xf32>
    %651 = vector.multi_reduction <maximumf>, %650, %cst_153 [1] : vector<8x128xf32> to vector<8xf32>
    %652 = vector.shape_cast %651 : vector<8xf32> to vector<8x1xf32>
    %653 = vector.broadcast %652 : vector<8x1xf32> to vector<8x128xf32>
    %654 = arith.cmpf oeq, %650, %653 : vector<8x128xf32>
    %c128_i32_154 = arith.constant 128 : i32
    %655 = vector.broadcast %c128_i32_154 : i32 to vector<8x128xi32>
    %656 = arith.select %654, %0, %655 : vector<8x128xi1>, vector<8x128xi32>
    %cst_155 = arith.constant dense<2147483647> : vector<8xi32>
    %657 = vector.multi_reduction <minsi>, %656, %cst_155 [1] : vector<8x128xi32> to vector<8xi32>
    %658 = vector.shape_cast %657 : vector<8xi32> to vector<8x1xi32>
    %659 = vector.broadcast %c16_i32 : i32 to vector<8x128xi32>
    %660 = arith.cmpi eq, %1, %659 : vector<8x128xi32>
    %661 = arith.addi %9, %658 : vector<8x1xi32>
    %662 = vector.shape_cast %661 : vector<8x1xi32> to vector<8x1xi32>
    %663 = vector.broadcast %662 : vector<8x1xi32> to vector<8x128xi32>
    %664 = arith.select %660, %663, %624 : vector<8x128xi1>, vector<8x128xi32>
    %665 = vector.broadcast %658 : vector<8x1xi32> to vector<8x128xi32>
    %666 = arith.cmpi eq, %0, %665 : vector<8x128xi32>
    %cst_156 = arith.constant 0.000000e+00 : f32
    %667 = vector.broadcast %cst_156 : f32 to vector<8x128xf32>
    %668 = arith.select %666, %11, %667 : vector<8x128xi1>, vector<8x128xf32>
    %cst_157 = arith.constant dense<0.000000e+00> : vector<8xf32>
    %669 = vector.multi_reduction <add>, %668, %cst_157 [1] : vector<8x128xf32> to vector<8xf32>
    %670 = vector.shape_cast %669 : vector<8xf32> to vector<8x1xf32>
    %671 = vector.broadcast %670 : vector<8x1xf32> to vector<8x128xf32>
    %672 = arith.subf %11, %671 : vector<8x128xf32>
    %673 = arith.mulf %672, %672 : vector<8x128xf32>
    %cst_158 = arith.constant 0.000000e+00 : f32
    %674 = vector.broadcast %cst_158 : f32 to vector<8x128xf32>
    %675 = arith.select %666, %13, %674 : vector<8x128xi1>, vector<8x128xf32>
    %cst_159 = arith.constant dense<0.000000e+00> : vector<8xf32>
    %676 = vector.multi_reduction <add>, %675, %cst_159 [1] : vector<8x128xf32> to vector<8xf32>
    %677 = vector.shape_cast %676 : vector<8xf32> to vector<8x1xf32>
    %678 = vector.broadcast %677 : vector<8x1xf32> to vector<8x128xf32>
    %679 = arith.subf %13, %678 : vector<8x128xf32>
    %680 = arith.mulf %679, %679 : vector<8x128xf32>
    %681 = arith.addf %673, %680 : vector<8x128xf32>
    %cst_160 = arith.constant 0.000000e+00 : f32
    %682 = vector.broadcast %cst_160 : f32 to vector<8x128xf32>
    %683 = arith.select %666, %15, %682 : vector<8x128xi1>, vector<8x128xf32>
    %cst_161 = arith.constant dense<0.000000e+00> : vector<8xf32>
    %684 = vector.multi_reduction <add>, %683, %cst_161 [1] : vector<8x128xf32> to vector<8xf32>
    %685 = vector.shape_cast %684 : vector<8xf32> to vector<8x1xf32>
    %686 = vector.broadcast %685 : vector<8x1xf32> to vector<8x128xf32>
    %687 = arith.subf %15, %686 : vector<8x128xf32>
    %688 = arith.mulf %687, %687 : vector<8x128xf32>
    %689 = arith.addf %681, %688 : vector<8x128xf32>
    %690 = arith.minimumf %650, %689 : vector<8x128xf32>
    %c17_i32 = arith.constant 17 : i32
    %cst_162 = arith.constant dense<0xFF800000> : vector<8xf32>
    %691 = vector.multi_reduction <maximumf>, %690, %cst_162 [1] : vector<8x128xf32> to vector<8xf32>
    %692 = vector.shape_cast %691 : vector<8xf32> to vector<8x1xf32>
    %693 = vector.broadcast %692 : vector<8x1xf32> to vector<8x128xf32>
    %694 = arith.cmpf oeq, %690, %693 : vector<8x128xf32>
    %c128_i32_163 = arith.constant 128 : i32
    %695 = vector.broadcast %c128_i32_163 : i32 to vector<8x128xi32>
    %696 = arith.select %694, %0, %695 : vector<8x128xi1>, vector<8x128xi32>
    %cst_164 = arith.constant dense<2147483647> : vector<8xi32>
    %697 = vector.multi_reduction <minsi>, %696, %cst_164 [1] : vector<8x128xi32> to vector<8xi32>
    %698 = vector.shape_cast %697 : vector<8xi32> to vector<8x1xi32>
    %699 = vector.broadcast %c17_i32 : i32 to vector<8x128xi32>
    %700 = arith.cmpi eq, %1, %699 : vector<8x128xi32>
    %701 = arith.addi %9, %698 : vector<8x1xi32>
    %702 = vector.shape_cast %701 : vector<8x1xi32> to vector<8x1xi32>
    %703 = vector.broadcast %702 : vector<8x1xi32> to vector<8x128xi32>
    %704 = arith.select %700, %703, %664 : vector<8x128xi1>, vector<8x128xi32>
    %705 = vector.broadcast %698 : vector<8x1xi32> to vector<8x128xi32>
    %706 = arith.cmpi eq, %0, %705 : vector<8x128xi32>
    %cst_165 = arith.constant 0.000000e+00 : f32
    %707 = vector.broadcast %cst_165 : f32 to vector<8x128xf32>
    %708 = arith.select %706, %11, %707 : vector<8x128xi1>, vector<8x128xf32>
    %cst_166 = arith.constant dense<0.000000e+00> : vector<8xf32>
    %709 = vector.multi_reduction <add>, %708, %cst_166 [1] : vector<8x128xf32> to vector<8xf32>
    %710 = vector.shape_cast %709 : vector<8xf32> to vector<8x1xf32>
    %711 = vector.broadcast %710 : vector<8x1xf32> to vector<8x128xf32>
    %712 = arith.subf %11, %711 : vector<8x128xf32>
    %713 = arith.mulf %712, %712 : vector<8x128xf32>
    %cst_167 = arith.constant 0.000000e+00 : f32
    %714 = vector.broadcast %cst_167 : f32 to vector<8x128xf32>
    %715 = arith.select %706, %13, %714 : vector<8x128xi1>, vector<8x128xf32>
    %cst_168 = arith.constant dense<0.000000e+00> : vector<8xf32>
    %716 = vector.multi_reduction <add>, %715, %cst_168 [1] : vector<8x128xf32> to vector<8xf32>
    %717 = vector.shape_cast %716 : vector<8xf32> to vector<8x1xf32>
    %718 = vector.broadcast %717 : vector<8x1xf32> to vector<8x128xf32>
    %719 = arith.subf %13, %718 : vector<8x128xf32>
    %720 = arith.mulf %719, %719 : vector<8x128xf32>
    %721 = arith.addf %713, %720 : vector<8x128xf32>
    %cst_169 = arith.constant 0.000000e+00 : f32
    %722 = vector.broadcast %cst_169 : f32 to vector<8x128xf32>
    %723 = arith.select %706, %15, %722 : vector<8x128xi1>, vector<8x128xf32>
    %cst_170 = arith.constant dense<0.000000e+00> : vector<8xf32>
    %724 = vector.multi_reduction <add>, %723, %cst_170 [1] : vector<8x128xf32> to vector<8xf32>
    %725 = vector.shape_cast %724 : vector<8xf32> to vector<8x1xf32>
    %726 = vector.broadcast %725 : vector<8x1xf32> to vector<8x128xf32>
    %727 = arith.subf %15, %726 : vector<8x128xf32>
    %728 = arith.mulf %727, %727 : vector<8x128xf32>
    %729 = arith.addf %721, %728 : vector<8x128xf32>
    %730 = arith.minimumf %690, %729 : vector<8x128xf32>
    %c18_i32 = arith.constant 18 : i32
    %cst_171 = arith.constant dense<0xFF800000> : vector<8xf32>
    %731 = vector.multi_reduction <maximumf>, %730, %cst_171 [1] : vector<8x128xf32> to vector<8xf32>
    %732 = vector.shape_cast %731 : vector<8xf32> to vector<8x1xf32>
    %733 = vector.broadcast %732 : vector<8x1xf32> to vector<8x128xf32>
    %734 = arith.cmpf oeq, %730, %733 : vector<8x128xf32>
    %c128_i32_172 = arith.constant 128 : i32
    %735 = vector.broadcast %c128_i32_172 : i32 to vector<8x128xi32>
    %736 = arith.select %734, %0, %735 : vector<8x128xi1>, vector<8x128xi32>
    %cst_173 = arith.constant dense<2147483647> : vector<8xi32>
    %737 = vector.multi_reduction <minsi>, %736, %cst_173 [1] : vector<8x128xi32> to vector<8xi32>
    %738 = vector.shape_cast %737 : vector<8xi32> to vector<8x1xi32>
    %739 = vector.broadcast %c18_i32 : i32 to vector<8x128xi32>
    %740 = arith.cmpi eq, %1, %739 : vector<8x128xi32>
    %741 = arith.addi %9, %738 : vector<8x1xi32>
    %742 = vector.shape_cast %741 : vector<8x1xi32> to vector<8x1xi32>
    %743 = vector.broadcast %742 : vector<8x1xi32> to vector<8x128xi32>
    %744 = arith.select %740, %743, %704 : vector<8x128xi1>, vector<8x128xi32>
    %745 = vector.broadcast %738 : vector<8x1xi32> to vector<8x128xi32>
    %746 = arith.cmpi eq, %0, %745 : vector<8x128xi32>
    %cst_174 = arith.constant 0.000000e+00 : f32
    %747 = vector.broadcast %cst_174 : f32 to vector<8x128xf32>
    %748 = arith.select %746, %11, %747 : vector<8x128xi1>, vector<8x128xf32>
    %cst_175 = arith.constant dense<0.000000e+00> : vector<8xf32>
    %749 = vector.multi_reduction <add>, %748, %cst_175 [1] : vector<8x128xf32> to vector<8xf32>
    %750 = vector.shape_cast %749 : vector<8xf32> to vector<8x1xf32>
    %751 = vector.broadcast %750 : vector<8x1xf32> to vector<8x128xf32>
    %752 = arith.subf %11, %751 : vector<8x128xf32>
    %753 = arith.mulf %752, %752 : vector<8x128xf32>
    %cst_176 = arith.constant 0.000000e+00 : f32
    %754 = vector.broadcast %cst_176 : f32 to vector<8x128xf32>
    %755 = arith.select %746, %13, %754 : vector<8x128xi1>, vector<8x128xf32>
    %cst_177 = arith.constant dense<0.000000e+00> : vector<8xf32>
    %756 = vector.multi_reduction <add>, %755, %cst_177 [1] : vector<8x128xf32> to vector<8xf32>
    %757 = vector.shape_cast %756 : vector<8xf32> to vector<8x1xf32>
    %758 = vector.broadcast %757 : vector<8x1xf32> to vector<8x128xf32>
    %759 = arith.subf %13, %758 : vector<8x128xf32>
    %760 = arith.mulf %759, %759 : vector<8x128xf32>
    %761 = arith.addf %753, %760 : vector<8x128xf32>
    %cst_178 = arith.constant 0.000000e+00 : f32
    %762 = vector.broadcast %cst_178 : f32 to vector<8x128xf32>
    %763 = arith.select %746, %15, %762 : vector<8x128xi1>, vector<8x128xf32>
    %cst_179 = arith.constant dense<0.000000e+00> : vector<8xf32>
    %764 = vector.multi_reduction <add>, %763, %cst_179 [1] : vector<8x128xf32> to vector<8xf32>
    %765 = vector.shape_cast %764 : vector<8xf32> to vector<8x1xf32>
    %766 = vector.broadcast %765 : vector<8x1xf32> to vector<8x128xf32>
    %767 = arith.subf %15, %766 : vector<8x128xf32>
    %768 = arith.mulf %767, %767 : vector<8x128xf32>
    %769 = arith.addf %761, %768 : vector<8x128xf32>
    %770 = arith.minimumf %730, %769 : vector<8x128xf32>
    %c19_i32 = arith.constant 19 : i32
    %cst_180 = arith.constant dense<0xFF800000> : vector<8xf32>
    %771 = vector.multi_reduction <maximumf>, %770, %cst_180 [1] : vector<8x128xf32> to vector<8xf32>
    %772 = vector.shape_cast %771 : vector<8xf32> to vector<8x1xf32>
    %773 = vector.broadcast %772 : vector<8x1xf32> to vector<8x128xf32>
    %774 = arith.cmpf oeq, %770, %773 : vector<8x128xf32>
    %c128_i32_181 = arith.constant 128 : i32
    %775 = vector.broadcast %c128_i32_181 : i32 to vector<8x128xi32>
    %776 = arith.select %774, %0, %775 : vector<8x128xi1>, vector<8x128xi32>
    %cst_182 = arith.constant dense<2147483647> : vector<8xi32>
    %777 = vector.multi_reduction <minsi>, %776, %cst_182 [1] : vector<8x128xi32> to vector<8xi32>
    %778 = vector.shape_cast %777 : vector<8xi32> to vector<8x1xi32>
    %779 = vector.broadcast %c19_i32 : i32 to vector<8x128xi32>
    %780 = arith.cmpi eq, %1, %779 : vector<8x128xi32>
    %781 = arith.addi %9, %778 : vector<8x1xi32>
    %782 = vector.shape_cast %781 : vector<8x1xi32> to vector<8x1xi32>
    %783 = vector.broadcast %782 : vector<8x1xi32> to vector<8x128xi32>
    %784 = arith.select %780, %783, %744 : vector<8x128xi1>, vector<8x128xi32>
    %785 = vector.broadcast %778 : vector<8x1xi32> to vector<8x128xi32>
    %786 = arith.cmpi eq, %0, %785 : vector<8x128xi32>
    %cst_183 = arith.constant 0.000000e+00 : f32
    %787 = vector.broadcast %cst_183 : f32 to vector<8x128xf32>
    %788 = arith.select %786, %11, %787 : vector<8x128xi1>, vector<8x128xf32>
    %cst_184 = arith.constant dense<0.000000e+00> : vector<8xf32>
    %789 = vector.multi_reduction <add>, %788, %cst_184 [1] : vector<8x128xf32> to vector<8xf32>
    %790 = vector.shape_cast %789 : vector<8xf32> to vector<8x1xf32>
    %791 = vector.broadcast %790 : vector<8x1xf32> to vector<8x128xf32>
    %792 = arith.subf %11, %791 : vector<8x128xf32>
    %793 = arith.mulf %792, %792 : vector<8x128xf32>
    %cst_185 = arith.constant 0.000000e+00 : f32
    %794 = vector.broadcast %cst_185 : f32 to vector<8x128xf32>
    %795 = arith.select %786, %13, %794 : vector<8x128xi1>, vector<8x128xf32>
    %cst_186 = arith.constant dense<0.000000e+00> : vector<8xf32>
    %796 = vector.multi_reduction <add>, %795, %cst_186 [1] : vector<8x128xf32> to vector<8xf32>
    %797 = vector.shape_cast %796 : vector<8xf32> to vector<8x1xf32>
    %798 = vector.broadcast %797 : vector<8x1xf32> to vector<8x128xf32>
    %799 = arith.subf %13, %798 : vector<8x128xf32>
    %800 = arith.mulf %799, %799 : vector<8x128xf32>
    %801 = arith.addf %793, %800 : vector<8x128xf32>
    %cst_187 = arith.constant 0.000000e+00 : f32
    %802 = vector.broadcast %cst_187 : f32 to vector<8x128xf32>
    %803 = arith.select %786, %15, %802 : vector<8x128xi1>, vector<8x128xf32>
    %cst_188 = arith.constant dense<0.000000e+00> : vector<8xf32>
    %804 = vector.multi_reduction <add>, %803, %cst_188 [1] : vector<8x128xf32> to vector<8xf32>
    %805 = vector.shape_cast %804 : vector<8xf32> to vector<8x1xf32>
    %806 = vector.broadcast %805 : vector<8x1xf32> to vector<8x128xf32>
    %807 = arith.subf %15, %806 : vector<8x128xf32>
    %808 = arith.mulf %807, %807 : vector<8x128xf32>
    %809 = arith.addf %801, %808 : vector<8x128xf32>
    %810 = arith.minimumf %770, %809 : vector<8x128xf32>
    %c20_i32 = arith.constant 20 : i32
    %cst_189 = arith.constant dense<0xFF800000> : vector<8xf32>
    %811 = vector.multi_reduction <maximumf>, %810, %cst_189 [1] : vector<8x128xf32> to vector<8xf32>
    %812 = vector.shape_cast %811 : vector<8xf32> to vector<8x1xf32>
    %813 = vector.broadcast %812 : vector<8x1xf32> to vector<8x128xf32>
    %814 = arith.cmpf oeq, %810, %813 : vector<8x128xf32>
    %c128_i32_190 = arith.constant 128 : i32
    %815 = vector.broadcast %c128_i32_190 : i32 to vector<8x128xi32>
    %816 = arith.select %814, %0, %815 : vector<8x128xi1>, vector<8x128xi32>
    %cst_191 = arith.constant dense<2147483647> : vector<8xi32>
    %817 = vector.multi_reduction <minsi>, %816, %cst_191 [1] : vector<8x128xi32> to vector<8xi32>
    %818 = vector.shape_cast %817 : vector<8xi32> to vector<8x1xi32>
    %819 = vector.broadcast %c20_i32 : i32 to vector<8x128xi32>
    %820 = arith.cmpi eq, %1, %819 : vector<8x128xi32>
    %821 = arith.addi %9, %818 : vector<8x1xi32>
    %822 = vector.shape_cast %821 : vector<8x1xi32> to vector<8x1xi32>
    %823 = vector.broadcast %822 : vector<8x1xi32> to vector<8x128xi32>
    %824 = arith.select %820, %823, %784 : vector<8x128xi1>, vector<8x128xi32>
    %825 = vector.broadcast %818 : vector<8x1xi32> to vector<8x128xi32>
    %826 = arith.cmpi eq, %0, %825 : vector<8x128xi32>
    %cst_192 = arith.constant 0.000000e+00 : f32
    %827 = vector.broadcast %cst_192 : f32 to vector<8x128xf32>
    %828 = arith.select %826, %11, %827 : vector<8x128xi1>, vector<8x128xf32>
    %cst_193 = arith.constant dense<0.000000e+00> : vector<8xf32>
    %829 = vector.multi_reduction <add>, %828, %cst_193 [1] : vector<8x128xf32> to vector<8xf32>
    %830 = vector.shape_cast %829 : vector<8xf32> to vector<8x1xf32>
    %831 = vector.broadcast %830 : vector<8x1xf32> to vector<8x128xf32>
    %832 = arith.subf %11, %831 : vector<8x128xf32>
    %833 = arith.mulf %832, %832 : vector<8x128xf32>
    %cst_194 = arith.constant 0.000000e+00 : f32
    %834 = vector.broadcast %cst_194 : f32 to vector<8x128xf32>
    %835 = arith.select %826, %13, %834 : vector<8x128xi1>, vector<8x128xf32>
    %cst_195 = arith.constant dense<0.000000e+00> : vector<8xf32>
    %836 = vector.multi_reduction <add>, %835, %cst_195 [1] : vector<8x128xf32> to vector<8xf32>
    %837 = vector.shape_cast %836 : vector<8xf32> to vector<8x1xf32>
    %838 = vector.broadcast %837 : vector<8x1xf32> to vector<8x128xf32>
    %839 = arith.subf %13, %838 : vector<8x128xf32>
    %840 = arith.mulf %839, %839 : vector<8x128xf32>
    %841 = arith.addf %833, %840 : vector<8x128xf32>
    %cst_196 = arith.constant 0.000000e+00 : f32
    %842 = vector.broadcast %cst_196 : f32 to vector<8x128xf32>
    %843 = arith.select %826, %15, %842 : vector<8x128xi1>, vector<8x128xf32>
    %cst_197 = arith.constant dense<0.000000e+00> : vector<8xf32>
    %844 = vector.multi_reduction <add>, %843, %cst_197 [1] : vector<8x128xf32> to vector<8xf32>
    %845 = vector.shape_cast %844 : vector<8xf32> to vector<8x1xf32>
    %846 = vector.broadcast %845 : vector<8x1xf32> to vector<8x128xf32>
    %847 = arith.subf %15, %846 : vector<8x128xf32>
    %848 = arith.mulf %847, %847 : vector<8x128xf32>
    %849 = arith.addf %841, %848 : vector<8x128xf32>
    %850 = arith.minimumf %810, %849 : vector<8x128xf32>
    %c21_i32 = arith.constant 21 : i32
    %cst_198 = arith.constant dense<0xFF800000> : vector<8xf32>
    %851 = vector.multi_reduction <maximumf>, %850, %cst_198 [1] : vector<8x128xf32> to vector<8xf32>
    %852 = vector.shape_cast %851 : vector<8xf32> to vector<8x1xf32>
    %853 = vector.broadcast %852 : vector<8x1xf32> to vector<8x128xf32>
    %854 = arith.cmpf oeq, %850, %853 : vector<8x128xf32>
    %c128_i32_199 = arith.constant 128 : i32
    %855 = vector.broadcast %c128_i32_199 : i32 to vector<8x128xi32>
    %856 = arith.select %854, %0, %855 : vector<8x128xi1>, vector<8x128xi32>
    %cst_200 = arith.constant dense<2147483647> : vector<8xi32>
    %857 = vector.multi_reduction <minsi>, %856, %cst_200 [1] : vector<8x128xi32> to vector<8xi32>
    %858 = vector.shape_cast %857 : vector<8xi32> to vector<8x1xi32>
    %859 = vector.broadcast %c21_i32 : i32 to vector<8x128xi32>
    %860 = arith.cmpi eq, %1, %859 : vector<8x128xi32>
    %861 = arith.addi %9, %858 : vector<8x1xi32>
    %862 = vector.shape_cast %861 : vector<8x1xi32> to vector<8x1xi32>
    %863 = vector.broadcast %862 : vector<8x1xi32> to vector<8x128xi32>
    %864 = arith.select %860, %863, %824 : vector<8x128xi1>, vector<8x128xi32>
    %865 = vector.broadcast %858 : vector<8x1xi32> to vector<8x128xi32>
    %866 = arith.cmpi eq, %0, %865 : vector<8x128xi32>
    %cst_201 = arith.constant 0.000000e+00 : f32
    %867 = vector.broadcast %cst_201 : f32 to vector<8x128xf32>
    %868 = arith.select %866, %11, %867 : vector<8x128xi1>, vector<8x128xf32>
    %cst_202 = arith.constant dense<0.000000e+00> : vector<8xf32>
    %869 = vector.multi_reduction <add>, %868, %cst_202 [1] : vector<8x128xf32> to vector<8xf32>
    %870 = vector.shape_cast %869 : vector<8xf32> to vector<8x1xf32>
    %871 = vector.broadcast %870 : vector<8x1xf32> to vector<8x128xf32>
    %872 = arith.subf %11, %871 : vector<8x128xf32>
    %873 = arith.mulf %872, %872 : vector<8x128xf32>
    %cst_203 = arith.constant 0.000000e+00 : f32
    %874 = vector.broadcast %cst_203 : f32 to vector<8x128xf32>
    %875 = arith.select %866, %13, %874 : vector<8x128xi1>, vector<8x128xf32>
    %cst_204 = arith.constant dense<0.000000e+00> : vector<8xf32>
    %876 = vector.multi_reduction <add>, %875, %cst_204 [1] : vector<8x128xf32> to vector<8xf32>
    %877 = vector.shape_cast %876 : vector<8xf32> to vector<8x1xf32>
    %878 = vector.broadcast %877 : vector<8x1xf32> to vector<8x128xf32>
    %879 = arith.subf %13, %878 : vector<8x128xf32>
    %880 = arith.mulf %879, %879 : vector<8x128xf32>
    %881 = arith.addf %873, %880 : vector<8x128xf32>
    %cst_205 = arith.constant 0.000000e+00 : f32
    %882 = vector.broadcast %cst_205 : f32 to vector<8x128xf32>
    %883 = arith.select %866, %15, %882 : vector<8x128xi1>, vector<8x128xf32>
    %cst_206 = arith.constant dense<0.000000e+00> : vector<8xf32>
    %884 = vector.multi_reduction <add>, %883, %cst_206 [1] : vector<8x128xf32> to vector<8xf32>
    %885 = vector.shape_cast %884 : vector<8xf32> to vector<8x1xf32>
    %886 = vector.broadcast %885 : vector<8x1xf32> to vector<8x128xf32>
    %887 = arith.subf %15, %886 : vector<8x128xf32>
    %888 = arith.mulf %887, %887 : vector<8x128xf32>
    %889 = arith.addf %881, %888 : vector<8x128xf32>
    %890 = arith.minimumf %850, %889 : vector<8x128xf32>
    %c22_i32 = arith.constant 22 : i32
    %cst_207 = arith.constant dense<0xFF800000> : vector<8xf32>
    %891 = vector.multi_reduction <maximumf>, %890, %cst_207 [1] : vector<8x128xf32> to vector<8xf32>
    %892 = vector.shape_cast %891 : vector<8xf32> to vector<8x1xf32>
    %893 = vector.broadcast %892 : vector<8x1xf32> to vector<8x128xf32>
    %894 = arith.cmpf oeq, %890, %893 : vector<8x128xf32>
    %c128_i32_208 = arith.constant 128 : i32
    %895 = vector.broadcast %c128_i32_208 : i32 to vector<8x128xi32>
    %896 = arith.select %894, %0, %895 : vector<8x128xi1>, vector<8x128xi32>
    %cst_209 = arith.constant dense<2147483647> : vector<8xi32>
    %897 = vector.multi_reduction <minsi>, %896, %cst_209 [1] : vector<8x128xi32> to vector<8xi32>
    %898 = vector.shape_cast %897 : vector<8xi32> to vector<8x1xi32>
    %899 = vector.broadcast %c22_i32 : i32 to vector<8x128xi32>
    %900 = arith.cmpi eq, %1, %899 : vector<8x128xi32>
    %901 = arith.addi %9, %898 : vector<8x1xi32>
    %902 = vector.shape_cast %901 : vector<8x1xi32> to vector<8x1xi32>
    %903 = vector.broadcast %902 : vector<8x1xi32> to vector<8x128xi32>
    %904 = arith.select %900, %903, %864 : vector<8x128xi1>, vector<8x128xi32>
    %905 = vector.broadcast %898 : vector<8x1xi32> to vector<8x128xi32>
    %906 = arith.cmpi eq, %0, %905 : vector<8x128xi32>
    %cst_210 = arith.constant 0.000000e+00 : f32
    %907 = vector.broadcast %cst_210 : f32 to vector<8x128xf32>
    %908 = arith.select %906, %11, %907 : vector<8x128xi1>, vector<8x128xf32>
    %cst_211 = arith.constant dense<0.000000e+00> : vector<8xf32>
    %909 = vector.multi_reduction <add>, %908, %cst_211 [1] : vector<8x128xf32> to vector<8xf32>
    %910 = vector.shape_cast %909 : vector<8xf32> to vector<8x1xf32>
    %911 = vector.broadcast %910 : vector<8x1xf32> to vector<8x128xf32>
    %912 = arith.subf %11, %911 : vector<8x128xf32>
    %913 = arith.mulf %912, %912 : vector<8x128xf32>
    %cst_212 = arith.constant 0.000000e+00 : f32
    %914 = vector.broadcast %cst_212 : f32 to vector<8x128xf32>
    %915 = arith.select %906, %13, %914 : vector<8x128xi1>, vector<8x128xf32>
    %cst_213 = arith.constant dense<0.000000e+00> : vector<8xf32>
    %916 = vector.multi_reduction <add>, %915, %cst_213 [1] : vector<8x128xf32> to vector<8xf32>
    %917 = vector.shape_cast %916 : vector<8xf32> to vector<8x1xf32>
    %918 = vector.broadcast %917 : vector<8x1xf32> to vector<8x128xf32>
    %919 = arith.subf %13, %918 : vector<8x128xf32>
    %920 = arith.mulf %919, %919 : vector<8x128xf32>
    %921 = arith.addf %913, %920 : vector<8x128xf32>
    %cst_214 = arith.constant 0.000000e+00 : f32
    %922 = vector.broadcast %cst_214 : f32 to vector<8x128xf32>
    %923 = arith.select %906, %15, %922 : vector<8x128xi1>, vector<8x128xf32>
    %cst_215 = arith.constant dense<0.000000e+00> : vector<8xf32>
    %924 = vector.multi_reduction <add>, %923, %cst_215 [1] : vector<8x128xf32> to vector<8xf32>
    %925 = vector.shape_cast %924 : vector<8xf32> to vector<8x1xf32>
    %926 = vector.broadcast %925 : vector<8x1xf32> to vector<8x128xf32>
    %927 = arith.subf %15, %926 : vector<8x128xf32>
    %928 = arith.mulf %927, %927 : vector<8x128xf32>
    %929 = arith.addf %921, %928 : vector<8x128xf32>
    %930 = arith.minimumf %890, %929 : vector<8x128xf32>
    %c23_i32 = arith.constant 23 : i32
    %cst_216 = arith.constant dense<0xFF800000> : vector<8xf32>
    %931 = vector.multi_reduction <maximumf>, %930, %cst_216 [1] : vector<8x128xf32> to vector<8xf32>
    %932 = vector.shape_cast %931 : vector<8xf32> to vector<8x1xf32>
    %933 = vector.broadcast %932 : vector<8x1xf32> to vector<8x128xf32>
    %934 = arith.cmpf oeq, %930, %933 : vector<8x128xf32>
    %c128_i32_217 = arith.constant 128 : i32
    %935 = vector.broadcast %c128_i32_217 : i32 to vector<8x128xi32>
    %936 = arith.select %934, %0, %935 : vector<8x128xi1>, vector<8x128xi32>
    %cst_218 = arith.constant dense<2147483647> : vector<8xi32>
    %937 = vector.multi_reduction <minsi>, %936, %cst_218 [1] : vector<8x128xi32> to vector<8xi32>
    %938 = vector.shape_cast %937 : vector<8xi32> to vector<8x1xi32>
    %939 = vector.broadcast %c23_i32 : i32 to vector<8x128xi32>
    %940 = arith.cmpi eq, %1, %939 : vector<8x128xi32>
    %941 = arith.addi %9, %938 : vector<8x1xi32>
    %942 = vector.shape_cast %941 : vector<8x1xi32> to vector<8x1xi32>
    %943 = vector.broadcast %942 : vector<8x1xi32> to vector<8x128xi32>
    %944 = arith.select %940, %943, %904 : vector<8x128xi1>, vector<8x128xi32>
    %945 = vector.broadcast %938 : vector<8x1xi32> to vector<8x128xi32>
    %946 = arith.cmpi eq, %0, %945 : vector<8x128xi32>
    %cst_219 = arith.constant 0.000000e+00 : f32
    %947 = vector.broadcast %cst_219 : f32 to vector<8x128xf32>
    %948 = arith.select %946, %11, %947 : vector<8x128xi1>, vector<8x128xf32>
    %cst_220 = arith.constant dense<0.000000e+00> : vector<8xf32>
    %949 = vector.multi_reduction <add>, %948, %cst_220 [1] : vector<8x128xf32> to vector<8xf32>
    %950 = vector.shape_cast %949 : vector<8xf32> to vector<8x1xf32>
    %951 = vector.broadcast %950 : vector<8x1xf32> to vector<8x128xf32>
    %952 = arith.subf %11, %951 : vector<8x128xf32>
    %953 = arith.mulf %952, %952 : vector<8x128xf32>
    %cst_221 = arith.constant 0.000000e+00 : f32
    %954 = vector.broadcast %cst_221 : f32 to vector<8x128xf32>
    %955 = arith.select %946, %13, %954 : vector<8x128xi1>, vector<8x128xf32>
    %cst_222 = arith.constant dense<0.000000e+00> : vector<8xf32>
    %956 = vector.multi_reduction <add>, %955, %cst_222 [1] : vector<8x128xf32> to vector<8xf32>
    %957 = vector.shape_cast %956 : vector<8xf32> to vector<8x1xf32>
    %958 = vector.broadcast %957 : vector<8x1xf32> to vector<8x128xf32>
    %959 = arith.subf %13, %958 : vector<8x128xf32>
    %960 = arith.mulf %959, %959 : vector<8x128xf32>
    %961 = arith.addf %953, %960 : vector<8x128xf32>
    %cst_223 = arith.constant 0.000000e+00 : f32
    %962 = vector.broadcast %cst_223 : f32 to vector<8x128xf32>
    %963 = arith.select %946, %15, %962 : vector<8x128xi1>, vector<8x128xf32>
    %cst_224 = arith.constant dense<0.000000e+00> : vector<8xf32>
    %964 = vector.multi_reduction <add>, %963, %cst_224 [1] : vector<8x128xf32> to vector<8xf32>
    %965 = vector.shape_cast %964 : vector<8xf32> to vector<8x1xf32>
    %966 = vector.broadcast %965 : vector<8x1xf32> to vector<8x128xf32>
    %967 = arith.subf %15, %966 : vector<8x128xf32>
    %968 = arith.mulf %967, %967 : vector<8x128xf32>
    %969 = arith.addf %961, %968 : vector<8x128xf32>
    %970 = arith.minimumf %930, %969 : vector<8x128xf32>
    %c24_i32 = arith.constant 24 : i32
    %cst_225 = arith.constant dense<0xFF800000> : vector<8xf32>
    %971 = vector.multi_reduction <maximumf>, %970, %cst_225 [1] : vector<8x128xf32> to vector<8xf32>
    %972 = vector.shape_cast %971 : vector<8xf32> to vector<8x1xf32>
    %973 = vector.broadcast %972 : vector<8x1xf32> to vector<8x128xf32>
    %974 = arith.cmpf oeq, %970, %973 : vector<8x128xf32>
    %c128_i32_226 = arith.constant 128 : i32
    %975 = vector.broadcast %c128_i32_226 : i32 to vector<8x128xi32>
    %976 = arith.select %974, %0, %975 : vector<8x128xi1>, vector<8x128xi32>
    %cst_227 = arith.constant dense<2147483647> : vector<8xi32>
    %977 = vector.multi_reduction <minsi>, %976, %cst_227 [1] : vector<8x128xi32> to vector<8xi32>
    %978 = vector.shape_cast %977 : vector<8xi32> to vector<8x1xi32>
    %979 = vector.broadcast %c24_i32 : i32 to vector<8x128xi32>
    %980 = arith.cmpi eq, %1, %979 : vector<8x128xi32>
    %981 = arith.addi %9, %978 : vector<8x1xi32>
    %982 = vector.shape_cast %981 : vector<8x1xi32> to vector<8x1xi32>
    %983 = vector.broadcast %982 : vector<8x1xi32> to vector<8x128xi32>
    %984 = arith.select %980, %983, %944 : vector<8x128xi1>, vector<8x128xi32>
    %985 = vector.broadcast %978 : vector<8x1xi32> to vector<8x128xi32>
    %986 = arith.cmpi eq, %0, %985 : vector<8x128xi32>
    %cst_228 = arith.constant 0.000000e+00 : f32
    %987 = vector.broadcast %cst_228 : f32 to vector<8x128xf32>
    %988 = arith.select %986, %11, %987 : vector<8x128xi1>, vector<8x128xf32>
    %cst_229 = arith.constant dense<0.000000e+00> : vector<8xf32>
    %989 = vector.multi_reduction <add>, %988, %cst_229 [1] : vector<8x128xf32> to vector<8xf32>
    %990 = vector.shape_cast %989 : vector<8xf32> to vector<8x1xf32>
    %991 = vector.broadcast %990 : vector<8x1xf32> to vector<8x128xf32>
    %992 = arith.subf %11, %991 : vector<8x128xf32>
    %993 = arith.mulf %992, %992 : vector<8x128xf32>
    %cst_230 = arith.constant 0.000000e+00 : f32
    %994 = vector.broadcast %cst_230 : f32 to vector<8x128xf32>
    %995 = arith.select %986, %13, %994 : vector<8x128xi1>, vector<8x128xf32>
    %cst_231 = arith.constant dense<0.000000e+00> : vector<8xf32>
    %996 = vector.multi_reduction <add>, %995, %cst_231 [1] : vector<8x128xf32> to vector<8xf32>
    %997 = vector.shape_cast %996 : vector<8xf32> to vector<8x1xf32>
    %998 = vector.broadcast %997 : vector<8x1xf32> to vector<8x128xf32>
    %999 = arith.subf %13, %998 : vector<8x128xf32>
    %1000 = arith.mulf %999, %999 : vector<8x128xf32>
    %1001 = arith.addf %993, %1000 : vector<8x128xf32>
    %cst_232 = arith.constant 0.000000e+00 : f32
    %1002 = vector.broadcast %cst_232 : f32 to vector<8x128xf32>
    %1003 = arith.select %986, %15, %1002 : vector<8x128xi1>, vector<8x128xf32>
    %cst_233 = arith.constant dense<0.000000e+00> : vector<8xf32>
    %1004 = vector.multi_reduction <add>, %1003, %cst_233 [1] : vector<8x128xf32> to vector<8xf32>
    %1005 = vector.shape_cast %1004 : vector<8xf32> to vector<8x1xf32>
    %1006 = vector.broadcast %1005 : vector<8x1xf32> to vector<8x128xf32>
    %1007 = arith.subf %15, %1006 : vector<8x128xf32>
    %1008 = arith.mulf %1007, %1007 : vector<8x128xf32>
    %1009 = arith.addf %1001, %1008 : vector<8x128xf32>
    %1010 = arith.minimumf %970, %1009 : vector<8x128xf32>
    %c24_i32_234 = arith.constant 24 : i32
    %c0_235 = arith.constant 0 : index
    %c0_236 = arith.constant 0 : index
    %c0_237 = arith.constant 0 : index
    %1011 = vector.load %arg2[%c0_235, %c0_236, %c0_237] : memref<1x8x128xi32, #tpu.memory_space<vmem>>, vector<1x8x128xi32>
    %1012 = vector.shape_cast %1011 : vector<1x8x128xi32> to vector<8x128xi32>
    %1013 = vector.shape_cast %984 : vector<8x128xi32> to vector<1x8x128xi32>
    tpu.vector_store %arg2[%c0_235, %c0_236, %c0_237], %1013 {strides = array<i32>} : memref<1x8x128xi32, #tpu.memory_space<vmem>>, vector<1x8x128xi32>,
    return
  }
  func.func @transform_0(%arg0: i32) -> (i32, i32, i32, i32) {
    %c0_i32 = arith.constant 0 : i32
    %c0_i32_0 = arith.constant 0 : i32
    %c0_i32_1 = arith.constant 0 : i32
    %c0_i32_2 = arith.constant 0 : i32
    return %arg0, %c0_i32, %c0_i32_0, %c0_i32_1 : i32, i32, i32, i32
  }
  func.func @transform_1(%arg0: i32) -> (i32, i32, i32) {
    %c0_i32 = arith.constant 0 : i32
    %c0_i32_0 = arith.constant 0 : i32
    %c0_i32_1 = arith.constant 0 : i32
    return %arg0, %c0_i32, %c0_i32_0 : i32, i32, i32
  }
}

</mosaic_0001>

<bundles_post_ra>
// kernel: tpu_custom_call.1
= control target key start
LH: loop header
LB: loop body
LE: loop exit
PB: predicated region body
PF: predicated region fallthrough
CT: control target
= control target key end

     0   :  { %6 = vsyncpa [#allocation3], 0  ;;  %s1365_s0 = inlined_call_operand.hbm [shape: f32[1,3,8,128], index: 0, kind: input, shape index: {}]   ;;  %s1366_s1 = inlined_call_operand.hbm [shape: s32[1,8,128], index: 1, kind: output, shape index: {}]  }
   0x1   :  { %7 = vsyncpa [#allocation4], 0  ;;  %s1069_s6 = smov [#allocation2]   ;;  %s1021_s10 = scalar_lea.hbm %s1365_s0, 384 }
   0x2   :  { %s13_s7 = sshll.u32 %s1069_s6, 4  ;;  %p1022_p0 = scmp.ne.s32.totalorder %s1365_s0, %s1021_s10  ;;  %s14_s7 = int_to_ptr.vmem [resolvable:$true] %s13_s7 }
   0x3   :  { %p1025_p1 = scmp.lt.u32.totalorder %s1021_s10, %s1365_s0 }
   0x5   :  { %p1027_p2 = pnand %p1025_p1, %p1022_p0 }
   0x7   :  { %1030 = shalt.err (!%p1027_p2)
}
   0x8   :  { %s1031_s15 = scalar_lea.vmem %s14_s7, 384  ;;  %p1036_p4 = scmp.lt.s32.totalorder %s14_s7, %s14_s7 }
   0x9   :  { %p1032_p3 = scmp.ne.s32.totalorder %s14_s7, %s1031_s15  ;;  %p1037_p5 = scmp.lt.s32.totalorder %s1031_s15, %s1031_s15 }
   0xb   :  { %p1038_p6 = por %p1037_p5, %p1036_p4 }
   0xd   :  { %p1039_p7 = pnand %p1038_p6, %p1032_p3 }
   0xf   :  { %1042 = shalt.err (!%p1039_p7)
}
  0x10   :  { %s1070_s16 = smov 128   ;;  %s1071_s17 = smov 8  }
  0x11   :  { %19 = dma.hbm_to_vmem [thread:$0]  %s1365_s0, 384, %s14_s7, [#allocation3], %s1070_s16, %s1070_s16, %s1071_s17  }
  0x12   :  { %1065 = dma.done.wait [#allocation3], 384  }
  0x13   :  { %1066 = vsyncadd [#allocation3], 4294966912  ;;  %v23_v0 = vlaneseq  ;;  %v1101_v5 = vld [vmem:[#allocation2] sm:$0xff]  ;;  %v1103_v6 = vld [vmem:[#allocation2 + $0x8] sm:$0xff]  ;;  %s1072_s0 = smov [#allocation5]  }
  0x14   :  { %v1105_v7 = vld [vmem:[#allocation2 + $0x10] sm:$0xff]  ;;  %s1005_s20 = sshll.u32 %s1072_s0, 4  ;;  %s1006_s20 = int_to_ptr.vmem [resolvable:$true] %s1005_s20 }
  0x15   :  { %v1095_v1 = vand.u32 127, %v23_v0  ;;  %v26_v2 = vshrl.u32 %v23_v0, 7  ;;  %s1043_s21 = scalar_lea.vmem %s1006_s20, 128  ;;  %p1048_p9 = scmp.lt.s32.totalorder %s1006_s20, %s1006_s20 }
  0x16   :  { %p1044_p8 = scmp.ne.s32.totalorder %s1006_s20, %s1043_s21  ;;  %p1049_p10 = scmp.lt.s32.totalorder %s1043_s21, %s1043_s21 }
  0x17   :  { %v1097_v3 = vmul.u32 100, %v26_v2  ;;  %vm37_vm0 = vcmp.eq.s32.totalorder %v1095_v1, 0  ;;  %vm27_vm1 = vcmp.lt.s32.totalorder %v1095_v1, 100  ;;  %vm75_vm4 = vcmp.eq.s32.totalorder %v1095_v1, 1 }
  0x18   :  { %v38_v8 = vsel %vm37_vm0, %v1101_v5, 0.0  ;;  %v49_v9 = vsel %vm37_vm0, %v1105_v7, 0.0  ;;  %v43_v10 = vsel %vm37_vm0, %v1103_v6, 0.0  ;;  %vm115_vm8 = vcmp.eq.s32.totalorder %v1095_v1, 2  ;;  %p1050_p11 = por %p1049_p10, %p1048_p9 }
  0x19   :  { %v56_v4 = vsel %vm37_vm0, %v1097_v3, 0  ;;  %39 = vadd.xlane.f32.xlu0 %v38_v8  ;;  %50 = vadd.xlane.f32.xlu1 %v49_v9  ;;  %vm155_vm12 = vcmp.eq.s32.totalorder %v1095_v1, 3  ;;  %vm195_vm0 = vcmp.eq.s32.totalorder %v1095_v1, 4 }
  0x1a   :  { %p1051_p12 = pnand %p1050_p11, %p1044_p8 }
  0x1d   :  { %44 = vadd.xlane.f32.xlu0 %v43_v10 }
  0xa6   :  { %v40_v11 = vpop.xlane.xlu0 %39  ;;  %v51_v12 = vpop.xlane.xlu1 %50 }
  0xa7   :  { %v41_v13 = vsub.f32 %v1101_v5, %v40_v11  ;;  %v52_v14 = vsub.f32 %v1105_v7, %v51_v12 }
  0xa9   :  { %v42_v17 = vmul.f32 %v41_v13, %v41_v13  ;;  %v53_v19 = vmul.f32 %v52_v14, %v52_v14 }
  0xaa   :  { %v45_v15 = vpop.xlane.xlu0 %44 }
  0xab   :  { %v46_v16 = vsub.f32 %v1103_v6, %v45_v15 }
  0xad   :  { %v47_v18 = vmul.f32 %v46_v16, %v46_v16 }
  0xaf   :  { %v48_v20 = vadd.f32 %v47_v18, %v42_v17 }
  0xb1   :  { %v54_v21 = vadd.f32 %v53_v19, %v48_v20 }
  0xb3   :  { %v55_v22 = vsel %vm27_vm1, %v54_v21, -inf }
  0xb4   :  { %57 = vmax.xlane.f32.xlu1 %v55_v22 }
 0x141   :  { %v58_v23 = vpop.xlane.xlu1 %57 }
 0x142   :  { %vm59_vm2 = vcmp.eq.f32.partialorder %v55_v22, %v58_v23 }
 0x143   :  { %v60_v24 = vsel %vm59_vm2, %v1095_v1, 128 }
 0x144   :  { %v62_v25 = vshra.s32 %v60_v24, 16  ;;  %v61_v27 = vand.u32 65535, %v60_v24 }
 0x146   :  { %v64_v26 = vcvt.s32.f32 %v62_v25  ;;  %v63_v29 = vcvt.s32.f32 %v61_v27 }
 0x148   :  { %65 = vmin.xlane.f32.xlu0 %v64_v26 }
 0x1d5   :  { %v66_v28 = vpop.xlane.xlu0 %65 }
 0x1d6   :  { %vm67_vm3 = vcmp.eq.f32.partialorder %v64_v26, %v66_v28  ;;  %v72_v31 = vcvt.f32.s32 %v66_v28 }
 0x1d7   :  { %v68_v30 = vsel %vm67_vm3, %v63_v29, inf }
 0x1d8   :  { %69 = vmin.xlane.f32.xlu1 %v68_v30  ;;  %v73_v33 = vshll.u32 %v72_v31, 16 }
 0x265   :  { %v70_v32 = vpop.xlane.xlu1 %69 }
 0x266   :  { %v71_v34 = vcvt.f32.s32 %v70_v32 }
 0x268   :  { %v74_v35 = vadd.s32 %v73_v33, %v71_v34 }
 0x26a   :  { %v76_v36 = vadd.s32 %v74_v35, %v1097_v3  ;;  %vm78_vm5 = vcmp.eq.s32.totalorder %v1095_v1, %v74_v35 }
 0x26b   :  { %v84_v37 = vsel %vm78_vm5, %v1103_v6, 0.0  ;;  %v79_v38 = vsel %vm78_vm5, %v1101_v5, 0.0  ;;  %v90_v40 = vsel %vm78_vm5, %v1105_v7, 0.0 }
 0x26c   :  { %v77_v39 = vsel %vm75_vm4, %v76_v36, %v56_v4  ;;  %85 = vadd.xlane.f32.xlu1 %v84_v37  ;;  %80 = vadd.xlane.f32.xlu0 %v79_v38  ;;  %vm235_vm4 = vcmp.eq.s32.totalorder %v1095_v1, 5 }
 0x270   :  { %91 = vadd.xlane.f32.xlu0 %v90_v40 }
 0x2f9   :  { %v86_v41 = vpop.xlane.xlu1 %85  ;;  %v81_v42 = vpop.xlane.xlu0 %80 }
 0x2fa   :  { %v87_v43 = vsub.f32 %v1103_v6, %v86_v41  ;;  %v82_v44 = vsub.f32 %v1101_v5, %v81_v42 }
 0x2fc   :  { %v88_v45 = vmul.f32 %v87_v43, %v87_v43  ;;  %v83_v46 = vmul.f32 %v82_v44, %v82_v44 }
 0x2fd   :  { %v92_v47 = vpop.xlane.xlu0 %91 }
 0x2fe   :  { %v93_v48 = vsub.f32 %v1105_v7, %v92_v47  ;;  %v89_v49 = vadd.f32 %v88_v45, %v83_v46 }
 0x300   :  { %v94_v50 = vmul.f32 %v93_v48, %v93_v48 }
 0x302   :  { %v95_v51 = vadd.f32 %v94_v50, %v89_v49 }
 0x304   :  { %v96_v52 = vmin.f32 %v55_v22, %v95_v51 }
 0x306   :  { %97 = vmax.xlane.f32.xlu1 %v96_v52 }
 0x393   :  { %v98_v53 = vpop.xlane.xlu1 %97 }
 0x394   :  { %vm99_vm6 = vcmp.eq.f32.partialorder %v96_v52, %v98_v53 }
 0x395   :  { %v100_v54 = vsel %vm99_vm6, %v1095_v1, 128 }
 0x396   :  { %v102_v55 = vshra.s32 %v100_v54, 16  ;;  %v101_v57 = vand.u32 65535, %v100_v54 }
 0x398   :  { %v104_v56 = vcvt.s32.f32 %v102_v55  ;;  %v103_v59 = vcvt.s32.f32 %v101_v57 }
 0x39a   :  { %105 = vmin.xlane.f32.xlu0 %v104_v56 }
 0x427   :  { %v106_v58 = vpop.xlane.xlu0 %105 }
 0x428   :  { %vm107_vm7 = vcmp.eq.f32.partialorder %v104_v56, %v106_v58  ;;  %v112_v61 = vcvt.f32.s32 %v106_v58 }
 0x429   :  { %v108_v60 = vsel %vm107_vm7, %v103_v59, inf }
 0x42a   :  { %109 = vmin.xlane.f32.xlu1 %v108_v60  ;;  %v113_v63 = vshll.u32 %v112_v61, 16 }
 0x4b7   :  { %v110_v62 = vpop.xlane.xlu1 %109 }
 0x4b8   :  { %v111_v0 = vcvt.f32.s32 %v110_v62 }
 0x4ba   :  { %v114_v2 = vadd.s32 %v113_v63, %v111_v0 }
 0x4bc   :  { %v116_v4 = vadd.s32 %v114_v2, %v1097_v3  ;;  %vm118_vm9 = vcmp.eq.s32.totalorder %v1095_v1, %v114_v2 }
 0x4bd   :  { %v124_v8 = vsel %vm118_vm9, %v1103_v6, 0.0  ;;  %v119_v9 = vsel %vm118_vm9, %v1101_v5, 0.0  ;;  %v130_v11 = vsel %vm118_vm9, %v1105_v7, 0.0 }
 0x4be   :  { %v117_v10 = vsel %vm115_vm8, %v116_v4, %v77_v39  ;;  %125 = vadd.xlane.f32.xlu1 %v124_v8  ;;  %120 = vadd.xlane.f32.xlu0 %v119_v9  ;;  %vm275_vm8 = vcmp.eq.s32.totalorder %v1095_v1, 6 }
 0x4c2   :  { %131 = vadd.xlane.f32.xlu0 %v130_v11 }
 0x54b   :  { %v126_v12 = vpop.xlane.xlu1 %125  ;;  %v121_v13 = vpop.xlane.xlu0 %120 }
 0x54c   :  { %v127_v14 = vsub.f32 %v1103_v6, %v126_v12  ;;  %v122_v15 = vsub.f32 %v1101_v5, %v121_v13 }
 0x54e   :  { %v128_v16 = vmul.f32 %v127_v14, %v127_v14  ;;  %v123_v17 = vmul.f32 %v122_v15, %v122_v15 }
 0x54f   :  { %v132_v18 = vpop.xlane.xlu0 %131 }
 0x550   :  { %v133_v19 = vsub.f32 %v1105_v7, %v132_v18  ;;  %v129_v20 = vadd.f32 %v128_v16, %v123_v17 }
 0x552   :  { %v134_v21 = vmul.f32 %v133_v19, %v133_v19 }
 0x554   :  { %v135_v22 = vadd.f32 %v134_v21, %v129_v20 }
 0x556   :  { %v136_v23 = vmin.f32 %v96_v52, %v135_v22 }
 0x558   :  { %137 = vmax.xlane.f32.xlu1 %v136_v23 }
 0x5e5   :  { %v138_v24 = vpop.xlane.xlu1 %137 }
 0x5e6   :  { %vm139_vm10 = vcmp.eq.f32.partialorder %v136_v23, %v138_v24 }
 0x5e7   :  { %v140_v25 = vsel %vm139_vm10, %v1095_v1, 128 }
 0x5e8   :  { %v142_v26 = vshra.s32 %v140_v25, 16  ;;  %v141_v28 = vand.u32 65535, %v140_v25 }
 0x5ea   :  { %v144_v27 = vcvt.s32.f32 %v142_v26  ;;  %v143_v30 = vcvt.s32.f32 %v141_v28 }
 0x5ec   :  { %145 = vmin.xlane.f32.xlu0 %v144_v27 }
 0x679   :  { %v146_v29 = vpop.xlane.xlu0 %145 }
 0x67a   :  { %vm147_vm11 = vcmp.eq.f32.partialorder %v144_v27, %v146_v29  ;;  %v152_v32 = vcvt.f32.s32 %v146_v29 }
 0x67b   :  { %v148_v31 = vsel %vm147_vm11, %v143_v30, inf }
 0x67c   :  { %149 = vmin.xlane.f32.xlu1 %v148_v31  ;;  %v153_v34 = vshll.u32 %v152_v32, 16 }
 0x709   :  { %v150_v33 = vpop.xlane.xlu1 %149 }
 0x70a   :  { %v151_v35 = vcvt.f32.s32 %v150_v33 }
 0x70c   :  { %v154_v36 = vadd.s32 %v153_v34, %v151_v35 }
 0x70e   :  { %v156_v37 = vadd.s32 %v154_v36, %v1097_v3  ;;  %vm158_vm13 = vcmp.eq.s32.totalorder %v1095_v1, %v154_v36 }
 0x70f   :  { %v164_v38 = vsel %vm158_vm13, %v1103_v6, 0.0  ;;  %v159_v39 = vsel %vm158_vm13, %v1101_v5, 0.0  ;;  %v170_v41 = vsel %vm158_vm13, %v1105_v7, 0.0 }
 0x710   :  { %v157_v40 = vsel %vm155_vm12, %v156_v37, %v117_v10  ;;  %165 = vadd.xlane.f32.xlu1 %v164_v38  ;;  %160 = vadd.xlane.f32.xlu0 %v159_v39  ;;  %vm315_vm12 = vcmp.eq.s32.totalorder %v1095_v1, 7 }
 0x714   :  { %171 = vadd.xlane.f32.xlu0 %v170_v41 }
 0x79d   :  { %v166_v42 = vpop.xlane.xlu1 %165  ;;  %v161_v43 = vpop.xlane.xlu0 %160 }
 0x79e   :  { %v167_v44 = vsub.f32 %v1103_v6, %v166_v42  ;;  %v162_v45 = vsub.f32 %v1101_v5, %v161_v43 }
 0x7a0   :  { %v168_v46 = vmul.f32 %v167_v44, %v167_v44  ;;  %v163_v47 = vmul.f32 %v162_v45, %v162_v45 }
 0x7a1   :  { %v172_v48 = vpop.xlane.xlu0 %171 }
 0x7a2   :  { %v173_v49 = vsub.f32 %v1105_v7, %v172_v48  ;;  %v169_v50 = vadd.f32 %v168_v46, %v163_v47 }
 0x7a4   :  { %v174_v51 = vmul.f32 %v173_v49, %v173_v49 }
 0x7a6   :  { %v175_v52 = vadd.f32 %v174_v51, %v169_v50 }
 0x7a8   :  { %v176_v53 = vmin.f32 %v136_v23, %v175_v52 }
 0x7aa   :  { %177 = vmax.xlane.f32.xlu1 %v176_v53 }
 0x837   :  { %v178_v54 = vpop.xlane.xlu1 %177 }
 0x838   :  { %vm179_vm14 = vcmp.eq.f32.partialorder %v176_v53, %v178_v54 }
 0x839   :  { %v180_v55 = vsel %vm179_vm14, %v1095_v1, 128 }
 0x83a   :  { %v182_v56 = vshra.s32 %v180_v55, 16  ;;  %v181_v58 = vand.u32 65535, %v180_v55 }
 0x83c   :  { %v184_v57 = vcvt.s32.f32 %v182_v56  ;;  %v183_v60 = vcvt.s32.f32 %v181_v58 }
 0x83e   :  { %185 = vmin.xlane.f32.xlu0 %v184_v57 }
 0x8cb   :  { %v186_v59 = vpop.xlane.xlu0 %185 }
 0x8cc   :  { %vm187_vm15 = vcmp.eq.f32.partialorder %v184_v57, %v186_v59  ;;  %v192_v62 = vcvt.f32.s32 %v186_v59 }
 0x8cd   :  { %v188_v61 = vsel %vm187_vm15, %v183_v60, inf }
 0x8ce   :  { %189 = vmin.xlane.f32.xlu1 %v188_v61  ;;  %v193_v0 = vshll.u32 %v192_v62, 16 }
 0x95b   :  { %v190_v63 = vpop.xlane.xlu1 %189 }
 0x95c   :  { %v191_v2 = vcvt.f32.s32 %v190_v63 }
 0x95e   :  { %v194_v4 = vadd.s32 %v193_v0, %v191_v2 }
 0x960   :  { %v196_v8 = vadd.s32 %v194_v4, %v1097_v3  ;;  %vm198_vm1 = vcmp.eq.s32.totalorder %v1095_v1, %v194_v4 }
 0x961   :  { %v204_v9 = vsel %vm198_vm1, %v1103_v6, 0.0  ;;  %v199_v10 = vsel %vm198_vm1, %v1101_v5, 0.0  ;;  %v210_v12 = vsel %vm198_vm1, %v1105_v7, 0.0 }
 0x962   :  { %v197_v11 = vsel %vm195_vm0, %v196_v8, %v157_v40  ;;  %205 = vadd.xlane.f32.xlu1 %v204_v9  ;;  %200 = vadd.xlane.f32.xlu0 %v199_v10  ;;  %vm355_vm0 = vcmp.eq.s32.totalorder %v1095_v1, 8 }
 0x966   :  { %211 = vadd.xlane.f32.xlu0 %v210_v12 }
 0x9ef   :  { %v206_v13 = vpop.xlane.xlu1 %205  ;;  %v201_v14 = vpop.xlane.xlu0 %200 }
 0x9f0   :  { %v207_v15 = vsub.f32 %v1103_v6, %v206_v13  ;;  %v202_v16 = vsub.f32 %v1101_v5, %v201_v14 }
 0x9f2   :  { %v208_v17 = vmul.f32 %v207_v15, %v207_v15  ;;  %v203_v18 = vmul.f32 %v202_v16, %v202_v16 }
 0x9f3   :  { %v212_v19 = vpop.xlane.xlu0 %211 }
 0x9f4   :  { %v213_v20 = vsub.f32 %v1105_v7, %v212_v19  ;;  %v209_v21 = vadd.f32 %v208_v17, %v203_v18 }
 0x9f6   :  { %v214_v22 = vmul.f32 %v213_v20, %v213_v20 }
 0x9f8   :  { %v215_v23 = vadd.f32 %v214_v22, %v209_v21 }
 0x9fa   :  { %v216_v24 = vmin.f32 %v176_v53, %v215_v23 }
 0x9fc   :  { %217 = vmax.xlane.f32.xlu1 %v216_v24 }
 0xa89   :  { %v218_v25 = vpop.xlane.xlu1 %217 }
 0xa8a   :  { %vm219_vm2 = vcmp.eq.f32.partialorder %v216_v24, %v218_v25 }
 0xa8b   :  { %v220_v26 = vsel %vm219_vm2, %v1095_v1, 128 }
 0xa8c   :  { %v222_v27 = vshra.s32 %v220_v26, 16  ;;  %v221_v29 = vand.u32 65535, %v220_v26 }
 0xa8e   :  { %v224_v28 = vcvt.s32.f32 %v222_v27  ;;  %v223_v31 = vcvt.s32.f32 %v221_v29 }
 0xa90   :  { %225 = vmin.xlane.f32.xlu0 %v224_v28 }
 0xb1d   :  { %v226_v30 = vpop.xlane.xlu0 %225 }
 0xb1e   :  { %vm227_vm3 = vcmp.eq.f32.partialorder %v224_v28, %v226_v30  ;;  %v232_v33 = vcvt.f32.s32 %v226_v30 }
 0xb1f   :  { %v228_v32 = vsel %vm227_vm3, %v223_v31, inf }
 0xb20   :  { %229 = vmin.xlane.f32.xlu1 %v228_v32  ;;  %v233_v35 = vshll.u32 %v232_v33, 16 }
 0xbad   :  { %v230_v34 = vpop.xlane.xlu1 %229 }
 0xbae   :  { %v231_v36 = vcvt.f32.s32 %v230_v34 }
 0xbb0   :  { %v234_v37 = vadd.s32 %v233_v35, %v231_v36 }
 0xbb2   :  { %v236_v38 = vadd.s32 %v234_v37, %v1097_v3  ;;  %vm238_vm5 = vcmp.eq.s32.totalorder %v1095_v1, %v234_v37 }
 0xbb3   :  { %v244_v39 = vsel %vm238_vm5, %v1103_v6, 0.0  ;;  %v239_v40 = vsel %vm238_vm5, %v1101_v5, 0.0  ;;  %v250_v42 = vsel %vm238_vm5, %v1105_v7, 0.0 }
 0xbb4   :  { %v237_v41 = vsel %vm235_vm4, %v236_v38, %v197_v11  ;;  %245 = vadd.xlane.f32.xlu1 %v244_v39  ;;  %240 = vadd.xlane.f32.xlu0 %v239_v40  ;;  %vm395_vm4 = vcmp.eq.s32.totalorder %v1095_v1, 9 }
 0xbb8   :  { %251 = vadd.xlane.f32.xlu0 %v250_v42 }
 0xc41   :  { %v246_v43 = vpop.xlane.xlu1 %245  ;;  %v241_v44 = vpop.xlane.xlu0 %240 }
 0xc42   :  { %v247_v45 = vsub.f32 %v1103_v6, %v246_v43  ;;  %v242_v46 = vsub.f32 %v1101_v5, %v241_v44 }
 0xc44   :  { %v248_v47 = vmul.f32 %v247_v45, %v247_v45  ;;  %v243_v48 = vmul.f32 %v242_v46, %v242_v46 }
 0xc45   :  { %v252_v49 = vpop.xlane.xlu0 %251 }
 0xc46   :  { %v253_v50 = vsub.f32 %v1105_v7, %v252_v49  ;;  %v249_v51 = vadd.f32 %v248_v47, %v243_v48 }
 0xc48   :  { %v254_v52 = vmul.f32 %v253_v50, %v253_v50 }
 0xc4a   :  { %v255_v53 = vadd.f32 %v254_v52, %v249_v51 }
 0xc4c   :  { %v256_v54 = vmin.f32 %v216_v24, %v255_v53 }
 0xc4e   :  { %257 = vmax.xlane.f32.xlu1 %v256_v54 }
 0xcdb   :  { %v258_v55 = vpop.xlane.xlu1 %257 }
 0xcdc   :  { %vm259_vm6 = vcmp.eq.f32.partialorder %v256_v54, %v258_v55 }
 0xcdd   :  { %v260_v56 = vsel %vm259_vm6, %v1095_v1, 128 }
 0xcde   :  { %v262_v57 = vshra.s32 %v260_v56, 16  ;;  %v261_v59 = vand.u32 65535, %v260_v56 }
 0xce0   :  { %v264_v58 = vcvt.s32.f32 %v262_v57  ;;  %v263_v61 = vcvt.s32.f32 %v261_v59 }
 0xce2   :  { %265 = vmin.xlane.f32.xlu0 %v264_v58 }
 0xd6f   :  { %v266_v60 = vpop.xlane.xlu0 %265 }
 0xd70   :  { %vm267_vm7 = vcmp.eq.f32.partialorder %v264_v58, %v266_v60  ;;  %v272_v63 = vcvt.f32.s32 %v266_v60 }
 0xd71   :  { %v268_v62 = vsel %vm267_vm7, %v263_v61, inf }
 0xd72   :  { %269 = vmin.xlane.f32.xlu1 %v268_v62  ;;  %v273_v2 = vshll.u32 %v272_v63, 16 }
 0xdff   :  { %v270_v0 = vpop.xlane.xlu1 %269 }
 0xe00   :  { %v271_v4 = vcvt.f32.s32 %v270_v0 }
 0xe02   :  { %v274_v8 = vadd.s32 %v273_v2, %v271_v4 }
 0xe04   :  { %v276_v9 = vadd.s32 %v274_v8, %v1097_v3  ;;  %vm278_vm9 = vcmp.eq.s32.totalorder %v1095_v1, %v274_v8 }
 0xe05   :  { %v284_v10 = vsel %vm278_vm9, %v1103_v6, 0.0  ;;  %v279_v11 = vsel %vm278_vm9, %v1101_v5, 0.0  ;;  %v290_v13 = vsel %vm278_vm9, %v1105_v7, 0.0 }
 0xe06   :  { %v277_v12 = vsel %vm275_vm8, %v276_v9, %v237_v41  ;;  %285 = vadd.xlane.f32.xlu1 %v284_v10  ;;  %280 = vadd.xlane.f32.xlu0 %v279_v11  ;;  %vm435_vm8 = vcmp.eq.s32.totalorder %v1095_v1, 10 }
 0xe0a   :  { %291 = vadd.xlane.f32.xlu0 %v290_v13 }
 0xe93   :  { %v286_v14 = vpop.xlane.xlu1 %285  ;;  %v281_v15 = vpop.xlane.xlu0 %280 }
 0xe94   :  { %v287_v16 = vsub.f32 %v1103_v6, %v286_v14  ;;  %v282_v17 = vsub.f32 %v1101_v5, %v281_v15 }
 0xe96   :  { %v288_v18 = vmul.f32 %v287_v16, %v287_v16  ;;  %v283_v19 = vmul.f32 %v282_v17, %v282_v17 }
 0xe97   :  { %v292_v20 = vpop.xlane.xlu0 %291 }
 0xe98   :  { %v293_v21 = vsub.f32 %v1105_v7, %v292_v20  ;;  %v289_v22 = vadd.f32 %v288_v18, %v283_v19 }
 0xe9a   :  { %v294_v23 = vmul.f32 %v293_v21, %v293_v21 }
 0xe9c   :  { %v295_v24 = vadd.f32 %v294_v23, %v289_v22 }
 0xe9e   :  { %v296_v25 = vmin.f32 %v256_v54, %v295_v24 }
 0xea0   :  { %297 = vmax.xlane.f32.xlu1 %v296_v25 }
 0xf2d   :  { %v298_v26 = vpop.xlane.xlu1 %297 }
 0xf2e   :  { %vm299_vm10 = vcmp.eq.f32.partialorder %v296_v25, %v298_v26 }
 0xf2f   :  { %v300_v27 = vsel %vm299_vm10, %v1095_v1, 128 }
 0xf30   :  { %v302_v28 = vshra.s32 %v300_v27, 16  ;;  %v301_v30 = vand.u32 65535, %v300_v27 }
 0xf32   :  { %v304_v29 = vcvt.s32.f32 %v302_v28  ;;  %v303_v32 = vcvt.s32.f32 %v301_v30 }
 0xf34   :  { %305 = vmin.xlane.f32.xlu0 %v304_v29 }
 0xfc1   :  { %v306_v31 = vpop.xlane.xlu0 %305 }
 0xfc2   :  { %vm307_vm11 = vcmp.eq.f32.partialorder %v304_v29, %v306_v31  ;;  %v312_v34 = vcvt.f32.s32 %v306_v31 }
 0xfc3   :  { %v308_v33 = vsel %vm307_vm11, %v303_v32, inf }
 0xfc4   :  { %309 = vmin.xlane.f32.xlu1 %v308_v33  ;;  %v313_v36 = vshll.u32 %v312_v34, 16 }
0x1051   :  { %v310_v35 = vpop.xlane.xlu1 %309 }
0x1052   :  { %v311_v37 = vcvt.f32.s32 %v310_v35 }
0x1054   :  { %v314_v38 = vadd.s32 %v313_v36, %v311_v37 }
0x1056   :  { %v316_v39 = vadd.s32 %v314_v38, %v1097_v3  ;;  %vm318_vm13 = vcmp.eq.s32.totalorder %v1095_v1, %v314_v38 }
0x1057   :  { %v324_v40 = vsel %vm318_vm13, %v1103_v6, 0.0  ;;  %v319_v41 = vsel %vm318_vm13, %v1101_v5, 0.0  ;;  %v330_v43 = vsel %vm318_vm13, %v1105_v7, 0.0 }
0x1058   :  { %v317_v42 = vsel %vm315_vm12, %v316_v39, %v277_v12  ;;  %325 = vadd.xlane.f32.xlu1 %v324_v40  ;;  %320 = vadd.xlane.f32.xlu0 %v319_v41  ;;  %vm475_vm12 = vcmp.eq.s32.totalorder %v1095_v1, 11 }
0x105c   :  { %331 = vadd.xlane.f32.xlu0 %v330_v43 }
0x10e5   :  { %v326_v44 = vpop.xlane.xlu1 %325  ;;  %v321_v45 = vpop.xlane.xlu0 %320 }
0x10e6   :  { %v327_v46 = vsub.f32 %v1103_v6, %v326_v44  ;;  %v322_v47 = vsub.f32 %v1101_v5, %v321_v45 }
0x10e8   :  { %v328_v48 = vmul.f32 %v327_v46, %v327_v46  ;;  %v323_v49 = vmul.f32 %v322_v47, %v322_v47 }
0x10e9   :  { %v332_v50 = vpop.xlane.xlu0 %331 }
0x10ea   :  { %v333_v51 = vsub.f32 %v1105_v7, %v332_v50  ;;  %v329_v52 = vadd.f32 %v328_v48, %v323_v49 }
0x10ec   :  { %v334_v53 = vmul.f32 %v333_v51, %v333_v51 }
0x10ee   :  { %v335_v54 = vadd.f32 %v334_v53, %v329_v52 }
0x10f0   :  { %v336_v55 = vmin.f32 %v296_v25, %v335_v54 }
0x10f2   :  { %337 = vmax.xlane.f32.xlu1 %v336_v55 }
0x117f   :  { %v338_v56 = vpop.xlane.xlu1 %337 }
0x1180   :  { %vm339_vm14 = vcmp.eq.f32.partialorder %v336_v55, %v338_v56 }
0x1181   :  { %v340_v57 = vsel %vm339_vm14, %v1095_v1, 128 }
0x1182   :  { %v342_v58 = vshra.s32 %v340_v57, 16  ;;  %v341_v60 = vand.u32 65535, %v340_v57 }
0x1184   :  { %v344_v59 = vcvt.s32.f32 %v342_v58  ;;  %v343_v62 = vcvt.s32.f32 %v341_v60 }
0x1186   :  { %345 = vmin.xlane.f32.xlu0 %v344_v59 }
0x1213   :  { %v346_v61 = vpop.xlane.xlu0 %345 }
0x1214   :  { %vm347_vm15 = vcmp.eq.f32.partialorder %v344_v59, %v346_v61  ;;  %v352_v0 = vcvt.f32.s32 %v346_v61 }
0x1215   :  { %v348_v63 = vsel %vm347_vm15, %v343_v62, inf }
0x1216   :  { %349 = vmin.xlane.f32.xlu1 %v348_v63  ;;  %v353_v4 = vshll.u32 %v352_v0, 16 }
0x12a3   :  { %v350_v2 = vpop.xlane.xlu1 %349 }
0x12a4   :  { %v351_v8 = vcvt.f32.s32 %v350_v2 }
0x12a6   :  { %v354_v9 = vadd.s32 %v353_v4, %v351_v8 }
0x12a8   :  { %v356_v10 = vadd.s32 %v354_v9, %v1097_v3  ;;  %vm358_vm1 = vcmp.eq.s32.totalorder %v1095_v1, %v354_v9 }
0x12a9   :  { %v364_v11 = vsel %vm358_vm1, %v1103_v6, 0.0  ;;  %v359_v12 = vsel %vm358_vm1, %v1101_v5, 0.0  ;;  %v370_v14 = vsel %vm358_vm1, %v1105_v7, 0.0 }
0x12aa   :  { %v357_v13 = vsel %vm355_vm0, %v356_v10, %v317_v42  ;;  %365 = vadd.xlane.f32.xlu1 %v364_v11  ;;  %360 = vadd.xlane.f32.xlu0 %v359_v12  ;;  %vm515_vm0 = vcmp.eq.s32.totalorder %v1095_v1, 12 }
0x12ae   :  { %371 = vadd.xlane.f32.xlu0 %v370_v14 }
0x1337   :  { %v366_v15 = vpop.xlane.xlu1 %365  ;;  %v361_v16 = vpop.xlane.xlu0 %360 }
0x1338   :  { %v367_v17 = vsub.f32 %v1103_v6, %v366_v15  ;;  %v362_v18 = vsub.f32 %v1101_v5, %v361_v16 }
0x133a   :  { %v368_v19 = vmul.f32 %v367_v17, %v367_v17  ;;  %v363_v20 = vmul.f32 %v362_v18, %v362_v18 }
0x133b   :  { %v372_v21 = vpop.xlane.xlu0 %371 }
0x133c   :  { %v373_v22 = vsub.f32 %v1105_v7, %v372_v21  ;;  %v369_v23 = vadd.f32 %v368_v19, %v363_v20 }
0x133e   :  { %v374_v24 = vmul.f32 %v373_v22, %v373_v22 }
0x1340   :  { %v375_v25 = vadd.f32 %v374_v24, %v369_v23 }
0x1342   :  { %v376_v26 = vmin.f32 %v336_v55, %v375_v25 }
0x1344   :  { %377 = vmax.xlane.f32.xlu1 %v376_v26 }
0x13d1   :  { %v378_v27 = vpop.xlane.xlu1 %377 }
0x13d2   :  { %vm379_vm2 = vcmp.eq.f32.partialorder %v376_v26, %v378_v27 }
0x13d3   :  { %v380_v28 = vsel %vm379_vm2, %v1095_v1, 128 }
0x13d4   :  { %v382_v29 = vshra.s32 %v380_v28, 16  ;;  %v381_v31 = vand.u32 65535, %v380_v28 }
0x13d6   :  { %v384_v30 = vcvt.s32.f32 %v382_v29  ;;  %v383_v33 = vcvt.s32.f32 %v381_v31 }
0x13d8   :  { %385 = vmin.xlane.f32.xlu0 %v384_v30 }
0x1465   :  { %v386_v32 = vpop.xlane.xlu0 %385 }
0x1466   :  { %vm387_vm3 = vcmp.eq.f32.partialorder %v384_v30, %v386_v32  ;;  %v392_v35 = vcvt.f32.s32 %v386_v32 }
0x1467   :  { %v388_v34 = vsel %vm387_vm3, %v383_v33, inf }
0x1468   :  { %389 = vmin.xlane.f32.xlu1 %v388_v34  ;;  %v393_v37 = vshll.u32 %v392_v35, 16 }
0x14f5   :  { %v390_v36 = vpop.xlane.xlu1 %389 }
0x14f6   :  { %v391_v38 = vcvt.f32.s32 %v390_v36 }
0x14f8   :  { %v394_v39 = vadd.s32 %v393_v37, %v391_v38 }
0x14fa   :  { %v396_v40 = vadd.s32 %v394_v39, %v1097_v3  ;;  %vm398_vm5 = vcmp.eq.s32.totalorder %v1095_v1, %v394_v39 }
0x14fb   :  { %v404_v41 = vsel %vm398_vm5, %v1103_v6, 0.0  ;;  %v399_v42 = vsel %vm398_vm5, %v1101_v5, 0.0  ;;  %v410_v44 = vsel %vm398_vm5, %v1105_v7, 0.0 }
0x14fc   :  { %v397_v43 = vsel %vm395_vm4, %v396_v40, %v357_v13  ;;  %405 = vadd.xlane.f32.xlu1 %v404_v41  ;;  %400 = vadd.xlane.f32.xlu0 %v399_v42  ;;  %vm555_vm4 = vcmp.eq.s32.totalorder %v1095_v1, 13 }
0x1500   :  { %411 = vadd.xlane.f32.xlu0 %v410_v44 }
0x1589   :  { %v406_v45 = vpop.xlane.xlu1 %405  ;;  %v401_v46 = vpop.xlane.xlu0 %400 }
0x158a   :  { %v407_v47 = vsub.f32 %v1103_v6, %v406_v45  ;;  %v402_v48 = vsub.f32 %v1101_v5, %v401_v46 }
0x158c   :  { %v408_v49 = vmul.f32 %v407_v47, %v407_v47  ;;  %v403_v50 = vmul.f32 %v402_v48, %v402_v48 }
0x158d   :  { %v412_v51 = vpop.xlane.xlu0 %411 }
0x158e   :  { %v413_v52 = vsub.f32 %v1105_v7, %v412_v51  ;;  %v409_v53 = vadd.f32 %v408_v49, %v403_v50 }
0x1590   :  { %v414_v54 = vmul.f32 %v413_v52, %v413_v52 }
0x1592   :  { %v415_v55 = vadd.f32 %v414_v54, %v409_v53 }
0x1594   :  { %v416_v56 = vmin.f32 %v376_v26, %v415_v55 }
0x1596   :  { %417 = vmax.xlane.f32.xlu1 %v416_v56 }
0x1623   :  { %v418_v57 = vpop.xlane.xlu1 %417 }
0x1624   :  { %vm419_vm6 = vcmp.eq.f32.partialorder %v416_v56, %v418_v57 }
0x1625   :  { %v420_v58 = vsel %vm419_vm6, %v1095_v1, 128 }
0x1626   :  { %v422_v59 = vshra.s32 %v420_v58, 16  ;;  %v421_v61 = vand.u32 65535, %v420_v58 }
0x1628   :  { %v424_v60 = vcvt.s32.f32 %v422_v59  ;;  %v423_v63 = vcvt.s32.f32 %v421_v61 }
0x162a   :  { %425 = vmin.xlane.f32.xlu0 %v424_v60 }
0x16b7   :  { %v426_v62 = vpop.xlane.xlu0 %425 }
0x16b8   :  { %vm427_vm7 = vcmp.eq.f32.partialorder %v424_v60, %v426_v62  ;;  %v432_v2 = vcvt.f32.s32 %v426_v62 }
0x16b9   :  { %v428_v0 = vsel %vm427_vm7, %v423_v63, inf }
0x16ba   :  { %429 = vmin.xlane.f32.xlu1 %v428_v0  ;;  %v433_v8 = vshll.u32 %v432_v2, 16 }
0x1747   :  { %v430_v4 = vpop.xlane.xlu1 %429 }
0x1748   :  { %v431_v9 = vcvt.f32.s32 %v430_v4 }
0x174a   :  { %v434_v10 = vadd.s32 %v433_v8, %v431_v9 }
0x174c   :  { %v436_v11 = vadd.s32 %v434_v10, %v1097_v3  ;;  %vm438_vm9 = vcmp.eq.s32.totalorder %v1095_v1, %v434_v10 }
0x174d   :  { %v444_v12 = vsel %vm438_vm9, %v1103_v6, 0.0  ;;  %v439_v13 = vsel %vm438_vm9, %v1101_v5, 0.0  ;;  %v450_v15 = vsel %vm438_vm9, %v1105_v7, 0.0 }
0x174e   :  { %v437_v14 = vsel %vm435_vm8, %v436_v11, %v397_v43  ;;  %445 = vadd.xlane.f32.xlu1 %v444_v12  ;;  %440 = vadd.xlane.f32.xlu0 %v439_v13  ;;  %vm595_vm8 = vcmp.eq.s32.totalorder %v1095_v1, 14 }
0x1752   :  { %451 = vadd.xlane.f32.xlu0 %v450_v15 }
0x17db   :  { %v446_v16 = vpop.xlane.xlu1 %445  ;;  %v441_v17 = vpop.xlane.xlu0 %440 }
0x17dc   :  { %v447_v18 = vsub.f32 %v1103_v6, %v446_v16  ;;  %v442_v19 = vsub.f32 %v1101_v5, %v441_v17 }
0x17de   :  { %v448_v20 = vmul.f32 %v447_v18, %v447_v18  ;;  %v443_v21 = vmul.f32 %v442_v19, %v442_v19 }
0x17df   :  { %v452_v22 = vpop.xlane.xlu0 %451 }
0x17e0   :  { %v453_v23 = vsub.f32 %v1105_v7, %v452_v22  ;;  %v449_v24 = vadd.f32 %v448_v20, %v443_v21 }
0x17e2   :  { %v454_v25 = vmul.f32 %v453_v23, %v453_v23 }
0x17e4   :  { %v455_v26 = vadd.f32 %v454_v25, %v449_v24 }
0x17e6   :  { %v456_v27 = vmin.f32 %v416_v56, %v455_v26 }
0x17e8   :  { %457 = vmax.xlane.f32.xlu1 %v456_v27 }
0x1875   :  { %v458_v28 = vpop.xlane.xlu1 %457 }
0x1876   :  { %vm459_vm10 = vcmp.eq.f32.partialorder %v456_v27, %v458_v28 }
0x1877   :  { %v460_v29 = vsel %vm459_vm10, %v1095_v1, 128 }
0x1878   :  { %v462_v30 = vshra.s32 %v460_v29, 16  ;;  %v461_v32 = vand.u32 65535, %v460_v29 }
0x187a   :  { %v464_v31 = vcvt.s32.f32 %v462_v30  ;;  %v463_v34 = vcvt.s32.f32 %v461_v32 }
0x187c   :  { %465 = vmin.xlane.f32.xlu0 %v464_v31 }
0x1909   :  { %v466_v33 = vpop.xlane.xlu0 %465 }
0x190a   :  { %vm467_vm11 = vcmp.eq.f32.partialorder %v464_v31, %v466_v33  ;;  %v472_v36 = vcvt.f32.s32 %v466_v33 }
0x190b   :  { %v468_v35 = vsel %vm467_vm11, %v463_v34, inf }
0x190c   :  { %469 = vmin.xlane.f32.xlu1 %v468_v35  ;;  %v473_v38 = vshll.u32 %v472_v36, 16 }
0x1999   :  { %v470_v37 = vpop.xlane.xlu1 %469 }
0x199a   :  { %v471_v39 = vcvt.f32.s32 %v470_v37 }
0x199c   :  { %v474_v40 = vadd.s32 %v473_v38, %v471_v39 }
0x199e   :  { %v476_v41 = vadd.s32 %v474_v40, %v1097_v3  ;;  %vm478_vm13 = vcmp.eq.s32.totalorder %v1095_v1, %v474_v40  ;;  %v1238_v40 = vld [vmem:[#allocation2 + $0x8] sm:$0xff] }
0x199f   :  { %v484_v42 = vsel %vm478_vm13, %v1103_v6, 0.0  ;;  %v479_v43 = vsel %vm478_vm13, %v1101_v5, 0.0  ;;  %v490_v45 = vsel %vm478_vm13, %v1105_v7, 0.0 }
0x19a0   :  { %v477_v44 = vsel %vm475_vm12, %v476_v41, %v437_v14  ;;  %485 = vadd.xlane.f32.xlu1 %v484_v42  ;;  %480 = vadd.xlane.f32.xlu0 %v479_v43  ;;  %v1241_v42 = vld [vmem:[#allocation2] sm:$0xff]  ;;  %vm635_vm12 = vcmp.eq.s32.totalorder %v1095_v1, 15 }
0x19a4   :  { %491 = vadd.xlane.f32.xlu0 %v490_v45  ;;  %v1244_v45 = vld [vmem:[#allocation2 + $0x10] sm:$0xff] }
0x1a2d   :  { %v486_v46 = vpop.xlane.xlu1 %485  ;;  %v481_v47 = vpop.xlane.xlu0 %480 }
0x1a2e   :  { %v487_v48 = vsub.f32 %v1103_v6, %v486_v46  ;;  %v482_v49 = vsub.f32 %v1101_v5, %v481_v47 }
0x1a30   :  { %v488_v50 = vmul.f32 %v487_v48, %v487_v48  ;;  %v483_v51 = vmul.f32 %v482_v49, %v482_v49 }
0x1a31   :  { %v492_v52 = vpop.xlane.xlu0 %491 }
0x1a32   :  { %v493_v53 = vsub.f32 %v1105_v7, %v492_v52  ;;  %v489_v54 = vadd.f32 %v488_v50, %v483_v51 }
0x1a34   :  { %v494_v55 = vmul.f32 %v493_v53, %v493_v53 }
0x1a36   :  { %v495_v56 = vadd.f32 %v494_v55, %v489_v54 }
0x1a38   :  { %v496_v57 = vmin.f32 %v456_v27, %v495_v56 }
0x1a3a   :  { %497 = vmax.xlane.f32.xlu1 %v496_v57 }
0x1ac7   :  { %v498_v58 = vpop.xlane.xlu1 %497 }
0x1ac8   :  { %vm499_vm14 = vcmp.eq.f32.partialorder %v496_v57, %v498_v58 }
0x1ac9   :  { %v500_v59 = vsel %vm499_vm14, %v1095_v1, 128 }
0x1aca   :  { %v502_v60 = vshra.s32 %v500_v59, 16  ;;  %v501_v62 = vand.u32 65535, %v500_v59 }
0x1acc   :  { %v504_v61 = vcvt.s32.f32 %v502_v60  ;;  %v503_v0 = vcvt.s32.f32 %v501_v62 }
0x1ace   :  { %505 = vmin.xlane.f32.xlu0 %v504_v61 }
0x1b5b   :  { %v506_v63 = vpop.xlane.xlu0 %505 }
0x1b5c   :  { %vm507_vm15 = vcmp.eq.f32.partialorder %v504_v61, %v506_v63  ;;  %v512_v4 = vcvt.f32.s32 %v506_v63 }
0x1b5d   :  { %v508_v2 = vsel %vm507_vm15, %v503_v0, inf }
0x1b5e   :  { %509 = vmin.xlane.f32.xlu1 %v508_v2  ;;  %v513_v9 = vshll.u32 %v512_v4, 16 }
0x1beb   :  { %v510_v8 = vpop.xlane.xlu1 %509 }
0x1bec   :  { %v511_v10 = vcvt.f32.s32 %v510_v8 }
0x1bee   :  { %v514_v11 = vadd.s32 %v513_v9, %v511_v10 }
0x1bf0   :  { %v516_v12 = vadd.s32 %v514_v11, %v1097_v3  ;;  %vm518_vm1 = vcmp.eq.s32.totalorder %v1095_v1, %v514_v11 }
0x1bf1   :  { %v524_v13 = vsel %vm518_vm1, %v1103_v6, 0.0  ;;  %v519_v14 = vsel %vm518_vm1, %v1101_v5, 0.0  ;;  %v530_v16 = vsel %vm518_vm1, %v1105_v7, 0.0 }
0x1bf2   :  { %v517_v15 = vsel %vm515_vm0, %v516_v12, %v477_v44  ;;  %525 = vadd.xlane.f32.xlu1 %v524_v13  ;;  %520 = vadd.xlane.f32.xlu0 %v519_v14  ;;  %vm675_vm0 = vcmp.eq.s32.totalorder %v1095_v1, 16 }
0x1bf6   :  { %531 = vadd.xlane.f32.xlu0 %v530_v16 }
0x1c7f   :  { %v526_v17 = vpop.xlane.xlu1 %525  ;;  %v521_v18 = vpop.xlane.xlu0 %520 }
0x1c80   :  { %v527_v19 = vsub.f32 %v1103_v6, %v526_v17  ;;  %v522_v20 = vsub.f32 %v1101_v5, %v521_v18 }
0x1c82   :  { %v528_v21 = vmul.f32 %v527_v19, %v527_v19  ;;  %v523_v22 = vmul.f32 %v522_v20, %v522_v20 }
0x1c83   :  { %v532_v23 = vpop.xlane.xlu0 %531 }
0x1c84   :  { %v533_v24 = vsub.f32 %v1105_v7, %v532_v23  ;;  %v529_v25 = vadd.f32 %v528_v21, %v523_v22 }
0x1c86   :  { %v534_v26 = vmul.f32 %v533_v24, %v533_v24 }
0x1c88   :  { %v535_v27 = vadd.f32 %v534_v26, %v529_v25 }
0x1c8a   :  { %v536_v28 = vmin.f32 %v496_v57, %v535_v27 }
0x1c8c   :  { %537 = vmax.xlane.f32.xlu1 %v536_v28 }
0x1d19   :  { %v538_v29 = vpop.xlane.xlu1 %537 }
0x1d1a   :  { %vm539_vm2 = vcmp.eq.f32.partialorder %v536_v28, %v538_v29 }
0x1d1b   :  { %v540_v30 = vsel %vm539_vm2, %v1095_v1, 128 }
0x1d1c   :  { %v542_v31 = vshra.s32 %v540_v30, 16  ;;  %v541_v6 = vand.u32 65535, %v540_v30 }
0x1d1e   :  { %v544_v32 = vcvt.s32.f32 %v542_v31  ;;  %v543_v5 = vcvt.s32.f32 %v541_v6 }
0x1d20   :  { %545 = vmin.xlane.f32.xlu0 %v544_v32 }
0x1dad   :  { %v546_v33 = vpop.xlane.xlu0 %545 }
0x1dae   :  { %vm547_vm3 = vcmp.eq.f32.partialorder %v544_v32, %v546_v33  ;;  %v552_v35 = vcvt.f32.s32 %v546_v33 }
0x1daf   :  { %v548_v34 = vsel %vm547_vm3, %v543_v5, inf }
0x1db0   :  { %549 = vmin.xlane.f32.xlu1 %v548_v34  ;;  %v553_v36 = vshll.u32 %v552_v35, 16 }
0x1e3d   :  { %v550_v7 = vpop.xlane.xlu1 %549 }
0x1e3e   :  { %v551_v37 = vcvt.f32.s32 %v550_v7 }
0x1e40   :  { %v554_v38 = vadd.s32 %v553_v36, %v551_v37 }
0x1e42   :  { %v556_v39 = vadd.s32 %v554_v38, %v1097_v3  ;;  %vm558_vm5 = vcmp.eq.s32.totalorder %v1095_v1, %v554_v38 }
0x1e43   :  { %v564_v41 = vsel %vm558_vm5, %v1238_v40, 0.0  ;;  %v559_v43 = vsel %vm558_vm5, %v1241_v42, 0.0  ;;  %v570_v46 = vsel %vm558_vm5, %v1244_v45, 0.0 }
0x1e44   :  { %v557_v44 = vsel %vm555_vm4, %v556_v39, %v517_v15  ;;  %565 = vadd.xlane.f32.xlu1 %v564_v41  ;;  %560 = vadd.xlane.f32.xlu0 %v559_v43  ;;  %vm715_vm4 = vcmp.eq.s32.totalorder %v1095_v1, 17 }
0x1e48   :  { %571 = vadd.xlane.f32.xlu0 %v570_v46 }
0x1ed1   :  { %v566_v47 = vpop.xlane.xlu1 %565  ;;  %v561_v48 = vpop.xlane.xlu0 %560 }
0x1ed2   :  { %v567_v49 = vsub.f32 %v1238_v40, %v566_v47  ;;  %v562_v50 = vsub.f32 %v1241_v42, %v561_v48 }
0x1ed4   :  { %v568_v51 = vmul.f32 %v567_v49, %v567_v49  ;;  %v563_v52 = vmul.f32 %v562_v50, %v562_v50 }
0x1ed5   :  { %v572_v53 = vpop.xlane.xlu0 %571 }
0x1ed6   :  { %v573_v54 = vsub.f32 %v1244_v45, %v572_v53  ;;  %v569_v55 = vadd.f32 %v568_v51, %v563_v52 }
0x1ed8   :  { %v574_v56 = vmul.f32 %v573_v54, %v573_v54 }
0x1eda   :  { %v575_v57 = vadd.f32 %v574_v56, %v569_v55 }
0x1edc   :  { %v576_v58 = vmin.f32 %v536_v28, %v575_v57 }
0x1ede   :  { %577 = vmax.xlane.f32.xlu1 %v576_v58 }
0x1f6b   :  { %v578_v59 = vpop.xlane.xlu1 %577 }
0x1f6c   :  { %vm579_vm6 = vcmp.eq.f32.partialorder %v576_v58, %v578_v59 }
0x1f6d   :  { %v580_v60 = vsel %vm579_vm6, %v1095_v1, 128 }
0x1f6e   :  { %v582_v61 = vshra.s32 %v580_v60, 16  ;;  %v581_v63 = vand.u32 65535, %v580_v60 }
0x1f70   :  { %v584_v62 = vcvt.s32.f32 %v582_v61  ;;  %v583_v2 = vcvt.s32.f32 %v581_v63 }
0x1f72   :  { %585 = vmin.xlane.f32.xlu0 %v584_v62 }
0x1fff   :  { %v586_v0 = vpop.xlane.xlu0 %585 }
0x2000   :  { %vm587_vm7 = vcmp.eq.f32.partialorder %v584_v62, %v586_v0  ;;  %v592_v8 = vcvt.f32.s32 %v586_v0 }
0x2001   :  { %v588_v4 = vsel %vm587_vm7, %v583_v2, inf }
0x2002   :  { %589 = vmin.xlane.f32.xlu1 %v588_v4  ;;  %v593_v10 = vshll.u32 %v592_v8, 16 }
0x208f   :  { %v590_v9 = vpop.xlane.xlu1 %589 }
0x2090   :  { %v591_v11 = vcvt.f32.s32 %v590_v9 }
0x2092   :  { %v594_v12 = vadd.s32 %v593_v10, %v591_v11 }
0x2094   :  { %v596_v13 = vadd.s32 %v594_v12, %v1097_v3  ;;  %vm598_vm9 = vcmp.eq.s32.totalorder %v1095_v1, %v594_v12 }
0x2095   :  { %v604_v14 = vsel %vm598_vm9, %v1238_v40, 0.0  ;;  %v599_v15 = vsel %vm598_vm9, %v1241_v42, 0.0  ;;  %v610_v17 = vsel %vm598_vm9, %v1244_v45, 0.0 }
0x2096   :  { %v597_v16 = vsel %vm595_vm8, %v596_v13, %v557_v44  ;;  %605 = vadd.xlane.f32.xlu1 %v604_v14  ;;  %600 = vadd.xlane.f32.xlu0 %v599_v15  ;;  %vm755_vm8 = vcmp.eq.s32.totalorder %v1095_v1, 18 }
0x209a   :  { %611 = vadd.xlane.f32.xlu0 %v610_v17 }
0x2123   :  { %v606_v18 = vpop.xlane.xlu1 %605  ;;  %v601_v19 = vpop.xlane.xlu0 %600 }
0x2124   :  { %v607_v20 = vsub.f32 %v1238_v40, %v606_v18  ;;  %v602_v21 = vsub.f32 %v1241_v42, %v601_v19 }
0x2126   :  { %v608_v22 = vmul.f32 %v607_v20, %v607_v20  ;;  %v603_v23 = vmul.f32 %v602_v21, %v602_v21 }
0x2127   :  { %v612_v24 = vpop.xlane.xlu0 %611 }
0x2128   :  { %v613_v25 = vsub.f32 %v1244_v45, %v612_v24  ;;  %v609_v26 = vadd.f32 %v608_v22, %v603_v23 }
0x212a   :  { %v614_v27 = vmul.f32 %v613_v25, %v613_v25 }
0x212c   :  { %v615_v28 = vadd.f32 %v614_v27, %v609_v26 }
0x212e   :  { %v616_v29 = vmin.f32 %v576_v58, %v615_v28 }
0x2130   :  { %617 = vmax.xlane.f32.xlu1 %v616_v29 }
0x21bd   :  { %v618_v30 = vpop.xlane.xlu1 %617 }
0x21be   :  { %vm619_vm10 = vcmp.eq.f32.partialorder %v616_v29, %v618_v30 }
0x21bf   :  { %v620_v31 = vsel %vm619_vm10, %v1095_v1, 128 }
0x21c0   :  { %v622_v32 = vshra.s32 %v620_v31, 16  ;;  %v621_v33 = vand.u32 65535, %v620_v31 }
0x21c2   :  { %v624_v6 = vcvt.s32.f32 %v622_v32  ;;  %v623_v34 = vcvt.s32.f32 %v621_v33 }
0x21c4   :  { %625 = vmin.xlane.f32.xlu0 %v624_v6 }
0x2251   :  { %v626_v5 = vpop.xlane.xlu0 %625 }
0x2252   :  { %vm627_vm11 = vcmp.eq.f32.partialorder %v624_v6, %v626_v5  ;;  %v632_v7 = vcvt.f32.s32 %v626_v5 }
0x2253   :  { %v628_v35 = vsel %vm627_vm11, %v623_v34, inf }
0x2254   :  { %629 = vmin.xlane.f32.xlu1 %v628_v35  ;;  %v633_v37 = vshll.u32 %v632_v7, 16 }
0x22e1   :  { %v630_v36 = vpop.xlane.xlu1 %629 }
0x22e2   :  { %v631_v38 = vcvt.f32.s32 %v630_v36 }
0x22e4   :  { %v634_v39 = vadd.s32 %v633_v37, %v631_v38 }
0x22e6   :  { %v636_v41 = vadd.s32 %v634_v39, %v1097_v3  ;;  %vm638_vm13 = vcmp.eq.s32.totalorder %v1095_v1, %v634_v39 }
0x22e7   :  { %v644_v43 = vsel %vm638_vm13, %v1238_v40, 0.0  ;;  %v639_v44 = vsel %vm638_vm13, %v1241_v42, 0.0  ;;  %v650_v47 = vsel %vm638_vm13, %v1244_v45, 0.0 }
0x22e8   :  { %v637_v46 = vsel %vm635_vm12, %v636_v41, %v597_v16  ;;  %645 = vadd.xlane.f32.xlu1 %v644_v43  ;;  %640 = vadd.xlane.f32.xlu0 %v639_v44  ;;  %vm795_vm12 = vcmp.eq.s32.totalorder %v1095_v1, 19 }
0x22ec   :  { %651 = vadd.xlane.f32.xlu0 %v650_v47 }
0x2375   :  { %v646_v48 = vpop.xlane.xlu1 %645  ;;  %v641_v49 = vpop.xlane.xlu0 %640 }
0x2376   :  { %v647_v50 = vsub.f32 %v1238_v40, %v646_v48  ;;  %v642_v51 = vsub.f32 %v1241_v42, %v641_v49 }
0x2378   :  { %v648_v52 = vmul.f32 %v647_v50, %v647_v50  ;;  %v643_v53 = vmul.f32 %v642_v51, %v642_v51 }
0x2379   :  { %v652_v54 = vpop.xlane.xlu0 %651 }
0x237a   :  { %v653_v55 = vsub.f32 %v1244_v45, %v652_v54  ;;  %v649_v56 = vadd.f32 %v648_v52, %v643_v53 }
0x237c   :  { %v654_v57 = vmul.f32 %v653_v55, %v653_v55 }
0x237e   :  { %v655_v58 = vadd.f32 %v654_v57, %v649_v56 }
0x2380   :  { %v656_v59 = vmin.f32 %v616_v29, %v655_v58 }
0x2382   :  { %657 = vmax.xlane.f32.xlu1 %v656_v59 }
0x240f   :  { %v658_v60 = vpop.xlane.xlu1 %657 }
0x2410   :  { %vm659_vm14 = vcmp.eq.f32.partialorder %v656_v59, %v658_v60 }
0x2411   :  { %v660_v61 = vsel %vm659_vm14, %v1095_v1, 128 }
0x2412   :  { %v662_v62 = vshra.s32 %v660_v61, 16  ;;  %v661_v0 = vand.u32 65535, %v660_v61 }
0x2414   :  { %v664_v63 = vcvt.s32.f32 %v662_v62  ;;  %v663_v4 = vcvt.s32.f32 %v661_v0 }
0x2416   :  { %665 = vmin.xlane.f32.xlu0 %v664_v63 }
0x24a3   :  { %v666_v2 = vpop.xlane.xlu0 %665 }
0x24a4   :  { %vm667_vm15 = vcmp.eq.f32.partialorder %v664_v63, %v666_v2  ;;  %v672_v9 = vcvt.f32.s32 %v666_v2 }
0x24a5   :  { %v668_v8 = vsel %vm667_vm15, %v663_v4, inf }
0x24a6   :  { %669 = vmin.xlane.f32.xlu1 %v668_v8  ;;  %v673_v11 = vshll.u32 %v672_v9, 16 }
0x2533   :  { %v670_v10 = vpop.xlane.xlu1 %669 }
0x2534   :  { %v671_v12 = vcvt.f32.s32 %v670_v10 }
0x2536   :  { %v674_v13 = vadd.s32 %v673_v11, %v671_v12 }
0x2538   :  { %v676_v14 = vadd.s32 %v674_v13, %v1097_v3  ;;  %vm678_vm1 = vcmp.eq.s32.totalorder %v1095_v1, %v674_v13 }
0x2539   :  { %v684_v15 = vsel %vm678_vm1, %v1238_v40, 0.0  ;;  %v679_v16 = vsel %vm678_vm1, %v1241_v42, 0.0  ;;  %v690_v18 = vsel %vm678_vm1, %v1244_v45, 0.0 }
0x253a   :  { %v677_v17 = vsel %vm675_vm0, %v676_v14, %v637_v46  ;;  %685 = vadd.xlane.f32.xlu1 %v684_v15  ;;  %680 = vadd.xlane.f32.xlu0 %v679_v16  ;;  %vm835_vm0 = vcmp.eq.s32.totalorder %v1095_v1, 20 }
0x253e   :  { %691 = vadd.xlane.f32.xlu0 %v690_v18 }
0x25c7   :  { %v686_v19 = vpop.xlane.xlu1 %685  ;;  %v681_v20 = vpop.xlane.xlu0 %680 }
0x25c8   :  { %v687_v21 = vsub.f32 %v1238_v40, %v686_v19  ;;  %v682_v22 = vsub.f32 %v1241_v42, %v681_v20 }
0x25ca   :  { %v688_v23 = vmul.f32 %v687_v21, %v687_v21  ;;  %v683_v24 = vmul.f32 %v682_v22, %v682_v22 }
0x25cb   :  { %v692_v25 = vpop.xlane.xlu0 %691 }
0x25cc   :  { %v693_v26 = vsub.f32 %v1244_v45, %v692_v25  ;;  %v689_v27 = vadd.f32 %v688_v23, %v683_v24 }
0x25ce   :  { %v694_v28 = vmul.f32 %v693_v26, %v693_v26 }
0x25d0   :  { %v695_v29 = vadd.f32 %v694_v28, %v689_v27 }
0x25d2   :  { %v696_v30 = vmin.f32 %v656_v59, %v695_v29 }
0x25d4   :  { %697 = vmax.xlane.f32.xlu1 %v696_v30 }
0x2661   :  { %v698_v31 = vpop.xlane.xlu1 %697 }
0x2662   :  { %vm699_vm2 = vcmp.eq.f32.partialorder %v696_v30, %v698_v31 }
0x2663   :  { %v700_v32 = vsel %vm699_vm2, %v1095_v1, 128 }
0x2664   :  { %v702_v6 = vshra.s32 %v700_v32, 16  ;;  %v701_v5 = vand.u32 65535, %v700_v32 }
0x2666   :  { %v704_v33 = vcvt.s32.f32 %v702_v6  ;;  %v703_v34 = vcvt.s32.f32 %v701_v5 }
0x2668   :  { %705 = vmin.xlane.f32.xlu0 %v704_v33 }
0x26f5   :  { %v706_v35 = vpop.xlane.xlu0 %705 }
0x26f6   :  { %vm707_vm3 = vcmp.eq.f32.partialorder %v704_v33, %v706_v35  ;;  %v712_v36 = vcvt.f32.s32 %v706_v35 }
0x26f7   :  { %v708_v7 = vsel %vm707_vm3, %v703_v34, inf }
0x26f8   :  { %709 = vmin.xlane.f32.xlu1 %v708_v7  ;;  %v713_v38 = vshll.u32 %v712_v36, 16 }
0x2785   :  { %v710_v37 = vpop.xlane.xlu1 %709 }
0x2786   :  { %v711_v39 = vcvt.f32.s32 %v710_v37 }
0x2788   :  { %v714_v41 = vadd.s32 %v713_v38, %v711_v39 }
0x278a   :  { %v716_v43 = vadd.s32 %v714_v41, %v1097_v3  ;;  %vm718_vm5 = vcmp.eq.s32.totalorder %v1095_v1, %v714_v41 }
0x278b   :  { %v724_v44 = vsel %vm718_vm5, %v1238_v40, 0.0  ;;  %v719_v46 = vsel %vm718_vm5, %v1241_v42, 0.0  ;;  %v730_v48 = vsel %vm718_vm5, %v1244_v45, 0.0 }
0x278c   :  { %v717_v47 = vsel %vm715_vm4, %v716_v43, %v677_v17  ;;  %725 = vadd.xlane.f32.xlu1 %v724_v44  ;;  %720 = vadd.xlane.f32.xlu0 %v719_v46  ;;  %vm875_vm4 = vcmp.eq.s32.totalorder %v1095_v1, 21 }
0x2790   :  { %731 = vadd.xlane.f32.xlu0 %v730_v48 }
0x2819   :  { %v726_v49 = vpop.xlane.xlu1 %725  ;;  %v721_v50 = vpop.xlane.xlu0 %720 }
0x281a   :  { %v727_v51 = vsub.f32 %v1238_v40, %v726_v49  ;;  %v722_v52 = vsub.f32 %v1241_v42, %v721_v50 }
0x281c   :  { %v728_v53 = vmul.f32 %v727_v51, %v727_v51  ;;  %v723_v54 = vmul.f32 %v722_v52, %v722_v52 }
0x281d   :  { %v732_v55 = vpop.xlane.xlu0 %731 }
0x281e   :  { %v733_v56 = vsub.f32 %v1244_v45, %v732_v55  ;;  %v729_v57 = vadd.f32 %v728_v53, %v723_v54 }
0x2820   :  { %v734_v58 = vmul.f32 %v733_v56, %v733_v56 }
0x2822   :  { %v735_v59 = vadd.f32 %v734_v58, %v729_v57 }
0x2824   :  { %v736_v60 = vmin.f32 %v696_v30, %v735_v59 }
0x2826   :  { %737 = vmax.xlane.f32.xlu1 %v736_v60 }
0x28b3   :  { %v738_v61 = vpop.xlane.xlu1 %737 }
0x28b4   :  { %vm739_vm6 = vcmp.eq.f32.partialorder %v736_v60, %v738_v61 }
0x28b5   :  { %v740_v62 = vsel %vm739_vm6, %v1095_v1, 128 }
0x28b6   :  { %v742_v63 = vshra.s32 %v740_v62, 16  ;;  %v741_v2 = vand.u32 65535, %v740_v62 }
0x28b8   :  { %v744_v0 = vcvt.s32.f32 %v742_v63  ;;  %v743_v4 = vcvt.s32.f32 %v741_v2 }
0x28ba   :  { %745 = vmin.xlane.f32.xlu0 %v744_v0 }
0x2947   :  { %v746_v8 = vpop.xlane.xlu0 %745 }
0x2948   :  { %vm747_vm7 = vcmp.eq.f32.partialorder %v744_v0, %v746_v8  ;;  %v752_v10 = vcvt.f32.s32 %v746_v8 }
0x2949   :  { %v748_v9 = vsel %vm747_vm7, %v743_v4, inf }
0x294a   :  { %749 = vmin.xlane.f32.xlu1 %v748_v9  ;;  %v753_v12 = vshll.u32 %v752_v10, 16 }
0x29d7   :  { %v750_v11 = vpop.xlane.xlu1 %749 }
0x29d8   :  { %v751_v13 = vcvt.f32.s32 %v750_v11 }
0x29da   :  { %v754_v14 = vadd.s32 %v753_v12, %v751_v13 }
0x29dc   :  { %v756_v15 = vadd.s32 %v754_v14, %v1097_v3  ;;  %vm758_vm9 = vcmp.eq.s32.totalorder %v1095_v1, %v754_v14 }
0x29dd   :  { %v764_v16 = vsel %vm758_vm9, %v1238_v40, 0.0  ;;  %v759_v17 = vsel %vm758_vm9, %v1241_v42, 0.0  ;;  %v770_v19 = vsel %vm758_vm9, %v1244_v45, 0.0 }
0x29de   :  { %v757_v18 = vsel %vm755_vm8, %v756_v15, %v717_v47  ;;  %765 = vadd.xlane.f32.xlu1 %v764_v16  ;;  %760 = vadd.xlane.f32.xlu0 %v759_v17  ;;  %vm915_vm8 = vcmp.eq.s32.totalorder %v1095_v1, 22 }
0x29e2   :  { %771 = vadd.xlane.f32.xlu0 %v770_v19 }
0x2a6b   :  { %v766_v20 = vpop.xlane.xlu1 %765  ;;  %v761_v21 = vpop.xlane.xlu0 %760 }
0x2a6c   :  { %v767_v22 = vsub.f32 %v1238_v40, %v766_v20  ;;  %v762_v23 = vsub.f32 %v1241_v42, %v761_v21 }
0x2a6e   :  { %v768_v24 = vmul.f32 %v767_v22, %v767_v22  ;;  %v763_v25 = vmul.f32 %v762_v23, %v762_v23 }
0x2a6f   :  { %v772_v26 = vpop.xlane.xlu0 %771 }
0x2a70   :  { %v773_v27 = vsub.f32 %v1244_v45, %v772_v26  ;;  %v769_v28 = vadd.f32 %v768_v24, %v763_v25 }
0x2a72   :  { %v774_v29 = vmul.f32 %v773_v27, %v773_v27 }
0x2a74   :  { %v775_v30 = vadd.f32 %v774_v29, %v769_v28 }
0x2a76   :  { %v776_v31 = vmin.f32 %v736_v60, %v775_v30 }
0x2a78   :  { %777 = vmax.xlane.f32.xlu1 %v776_v31 }
0x2b05   :  { %v778_v32 = vpop.xlane.xlu1 %777 }
0x2b06   :  { %vm779_vm10 = vcmp.eq.f32.partialorder %v776_v31, %v778_v32 }
0x2b07   :  { %v780_v6 = vsel %vm779_vm10, %v1095_v1, 128 }
0x2b08   :  { %v782_v33 = vshra.s32 %v780_v6, 16  ;;  %v781_v34 = vand.u32 65535, %v780_v6 }
0x2b0a   :  { %v784_v5 = vcvt.s32.f32 %v782_v33  ;;  %v783_v35 = vcvt.s32.f32 %v781_v34 }
0x2b0c   :  { %785 = vmin.xlane.f32.xlu0 %v784_v5 }
0x2b99   :  { %v786_v7 = vpop.xlane.xlu0 %785 }
0x2b9a   :  { %vm787_vm11 = vcmp.eq.f32.partialorder %v784_v5, %v786_v7  ;;  %v792_v37 = vcvt.f32.s32 %v786_v7 }
0x2b9b   :  { %v788_v36 = vsel %vm787_vm11, %v783_v35, inf }
0x2b9c   :  { %789 = vmin.xlane.f32.xlu1 %v788_v36  ;;  %v793_v39 = vshll.u32 %v792_v37, 16 }
0x2c29   :  { %v790_v38 = vpop.xlane.xlu1 %789 }
0x2c2a   :  { %v791_v41 = vcvt.f32.s32 %v790_v38 }
0x2c2c   :  { %v794_v43 = vadd.s32 %v793_v39, %v791_v41 }
0x2c2e   :  { %v796_v44 = vadd.s32 %v794_v43, %v1097_v3  ;;  %vm798_vm13 = vcmp.eq.s32.totalorder %v1095_v1, %v794_v43 }
0x2c2f   :  { %v804_v46 = vsel %vm798_vm13, %v1238_v40, 0.0  ;;  %v799_v47 = vsel %vm798_vm13, %v1241_v42, 0.0  ;;  %v810_v49 = vsel %vm798_vm13, %v1244_v45, 0.0 }
0x2c30   :  { %v797_v48 = vsel %vm795_vm12, %v796_v44, %v757_v18  ;;  %805 = vadd.xlane.f32.xlu1 %v804_v46  ;;  %800 = vadd.xlane.f32.xlu0 %v799_v47  ;;  %vm955_vm12 = vcmp.eq.s32.totalorder %v1095_v1, 23 }
0x2c34   :  { %811 = vadd.xlane.f32.xlu0 %v810_v49 }
0x2cbd   :  { %v806_v50 = vpop.xlane.xlu1 %805  ;;  %v801_v51 = vpop.xlane.xlu0 %800 }
0x2cbe   :  { %v807_v52 = vsub.f32 %v1238_v40, %v806_v50  ;;  %v802_v53 = vsub.f32 %v1241_v42, %v801_v51 }
0x2cc0   :  { %v808_v54 = vmul.f32 %v807_v52, %v807_v52  ;;  %v803_v55 = vmul.f32 %v802_v53, %v802_v53 }
0x2cc1   :  { %v812_v56 = vpop.xlane.xlu0 %811 }
0x2cc2   :  { %v813_v57 = vsub.f32 %v1244_v45, %v812_v56  ;;  %v809_v58 = vadd.f32 %v808_v54, %v803_v55 }
0x2cc4   :  { %v814_v59 = vmul.f32 %v813_v57, %v813_v57 }
0x2cc6   :  { %v815_v60 = vadd.f32 %v814_v59, %v809_v58 }
0x2cc8   :  { %v816_v61 = vmin.f32 %v776_v31, %v815_v60 }
0x2cca   :  { %817 = vmax.xlane.f32.xlu1 %v816_v61 }
0x2d57   :  { %v818_v62 = vpop.xlane.xlu1 %817 }
0x2d58   :  { %vm819_vm14 = vcmp.eq.f32.partialorder %v816_v61, %v818_v62 }
0x2d59   :  { %v820_v63 = vsel %vm819_vm14, %v1095_v1, 128 }
0x2d5a   :  { %v822_v0 = vshra.s32 %v820_v63, 16  ;;  %v821_v4 = vand.u32 65535, %v820_v63 }
0x2d5c   :  { %v824_v2 = vcvt.s32.f32 %v822_v0  ;;  %v823_v8 = vcvt.s32.f32 %v821_v4 }
0x2d5e   :  { %825 = vmin.xlane.f32.xlu0 %v824_v2 }
0x2deb   :  { %v826_v9 = vpop.xlane.xlu0 %825 }
0x2dec   :  { %vm827_vm15 = vcmp.eq.f32.partialorder %v824_v2, %v826_v9  ;;  %v832_v11 = vcvt.f32.s32 %v826_v9 }
0x2ded   :  { %v828_v10 = vsel %vm827_vm15, %v823_v8, inf }
0x2dee   :  { %829 = vmin.xlane.f32.xlu1 %v828_v10  ;;  %v833_v13 = vshll.u32 %v832_v11, 16 }
0x2e7b   :  { %v830_v12 = vpop.xlane.xlu1 %829 }
0x2e7c   :  { %v831_v14 = vcvt.f32.s32 %v830_v12 }
0x2e7e   :  { %v834_v15 = vadd.s32 %v833_v13, %v831_v14 }
0x2e80   :  { %v836_v16 = vadd.s32 %v834_v15, %v1097_v3  ;;  %vm838_vm1 = vcmp.eq.s32.totalorder %v1095_v1, %v834_v15 }
0x2e81   :  { %v844_v17 = vsel %vm838_vm1, %v1238_v40, 0.0  ;;  %v839_v18 = vsel %vm838_vm1, %v1241_v42, 0.0  ;;  %v850_v20 = vsel %vm838_vm1, %v1244_v45, 0.0 }
0x2e82   :  { %v837_v19 = vsel %vm835_vm0, %v836_v16, %v797_v48  ;;  %845 = vadd.xlane.f32.xlu1 %v844_v17  ;;  %840 = vadd.xlane.f32.xlu0 %v839_v18  ;;  %vm995_vm0 = vcmp.eq.s32.totalorder %v1095_v1, 24 }
0x2e86   :  { %851 = vadd.xlane.f32.xlu0 %v850_v20 }
0x2f0f   :  { %v846_v21 = vpop.xlane.xlu1 %845  ;;  %v841_v22 = vpop.xlane.xlu0 %840 }
0x2f10   :  { %v847_v23 = vsub.f32 %v1238_v40, %v846_v21  ;;  %v842_v24 = vsub.f32 %v1241_v42, %v841_v22 }
0x2f12   :  { %v848_v25 = vmul.f32 %v847_v23, %v847_v23  ;;  %v843_v26 = vmul.f32 %v842_v24, %v842_v24 }
0x2f13   :  { %v852_v27 = vpop.xlane.xlu0 %851 }
0x2f14   :  { %v853_v28 = vsub.f32 %v1244_v45, %v852_v27  ;;  %v849_v29 = vadd.f32 %v848_v25, %v843_v26 }
0x2f16   :  { %v854_v30 = vmul.f32 %v853_v28, %v853_v28 }
0x2f18   :  { %v855_v31 = vadd.f32 %v854_v30, %v849_v29 }
0x2f1a   :  { %v856_v32 = vmin.f32 %v816_v61, %v855_v31 }
0x2f1c   :  { %857 = vmax.xlane.f32.xlu1 %v856_v32 }
0x2fa9   :  { %v858_v6 = vpop.xlane.xlu1 %857 }
0x2faa   :  { %vm859_vm2 = vcmp.eq.f32.partialorder %v856_v32, %v858_v6 }
0x2fab   :  { %v860_v33 = vsel %vm859_vm2, %v1095_v1, 128 }
0x2fac   :  { %v862_v5 = vshra.s32 %v860_v33, 16  ;;  %v861_v35 = vand.u32 65535, %v860_v33 }
0x2fae   :  { %v864_v34 = vcvt.s32.f32 %v862_v5  ;;  %v863_v7 = vcvt.s32.f32 %v861_v35 }
0x2fb0   :  { %865 = vmin.xlane.f32.xlu0 %v864_v34 }
0x303d   :  { %v866_v36 = vpop.xlane.xlu0 %865 }
0x303e   :  { %vm867_vm3 = vcmp.eq.f32.partialorder %v864_v34, %v866_v36  ;;  %v872_v38 = vcvt.f32.s32 %v866_v36 }
0x303f   :  { %v868_v37 = vsel %vm867_vm3, %v863_v7, inf }
0x3040   :  { %869 = vmin.xlane.f32.xlu1 %v868_v37  ;;  %v873_v41 = vshll.u32 %v872_v38, 16 }
0x30cd   :  { %v870_v39 = vpop.xlane.xlu1 %869 }
0x30ce   :  { %v871_v43 = vcvt.f32.s32 %v870_v39 }
0x30d0   :  { %v874_v44 = vadd.s32 %v873_v41, %v871_v43 }
0x30d2   :  { %v876_v46 = vadd.s32 %v874_v44, %v1097_v3  ;;  %vm878_vm5 = vcmp.eq.s32.totalorder %v1095_v1, %v874_v44 }
0x30d3   :  { %v884_v47 = vsel %vm878_vm5, %v1238_v40, 0.0  ;;  %v879_v48 = vsel %vm878_vm5, %v1241_v42, 0.0  ;;  %v890_v50 = vsel %vm878_vm5, %v1244_v45, 0.0 }
0x30d4   :  { %v877_v49 = vsel %vm875_vm4, %v876_v46, %v837_v19  ;;  %885 = vadd.xlane.f32.xlu1 %v884_v47  ;;  %880 = vadd.xlane.f32.xlu0 %v879_v48 }
0x30d8   :  { %891 = vadd.xlane.f32.xlu0 %v890_v50 }
0x3161   :  { %v886_v51 = vpop.xlane.xlu1 %885  ;;  %v881_v52 = vpop.xlane.xlu0 %880 }
0x3162   :  { %v887_v53 = vsub.f32 %v1238_v40, %v886_v51  ;;  %v882_v54 = vsub.f32 %v1241_v42, %v881_v52 }
0x3164   :  { %v888_v55 = vmul.f32 %v887_v53, %v887_v53  ;;  %v883_v56 = vmul.f32 %v882_v54, %v882_v54 }
0x3165   :  { %v892_v57 = vpop.xlane.xlu0 %891 }
0x3166   :  { %v893_v58 = vsub.f32 %v1244_v45, %v892_v57  ;;  %v889_v59 = vadd.f32 %v888_v55, %v883_v56 }
0x3168   :  { %v894_v60 = vmul.f32 %v893_v58, %v893_v58 }
0x316a   :  { %v895_v61 = vadd.f32 %v894_v60, %v889_v59 }
0x316c   :  { %v896_v62 = vmin.f32 %v856_v32, %v895_v61 }
0x316e   :  { %897 = vmax.xlane.f32.xlu1 %v896_v62 }
0x31fb   :  { %v898_v63 = vpop.xlane.xlu1 %897 }
0x31fc   :  { %vm899_vm6 = vcmp.eq.f32.partialorder %v896_v62, %v898_v63 }
0x31fd   :  { %v900_v0 = vsel %vm899_vm6, %v1095_v1, 128 }
0x31fe   :  { %v902_v2 = vshra.s32 %v900_v0, 16  ;;  %v901_v8 = vand.u32 65535, %v900_v0 }
0x3200   :  { %v904_v4 = vcvt.s32.f32 %v902_v2  ;;  %v903_v9 = vcvt.s32.f32 %v901_v8 }
0x3202   :  { %905 = vmin.xlane.f32.xlu0 %v904_v4 }
0x328f   :  { %v906_v10 = vpop.xlane.xlu0 %905 }
0x3290   :  { %vm907_vm7 = vcmp.eq.f32.partialorder %v904_v4, %v906_v10  ;;  %v912_v12 = vcvt.f32.s32 %v906_v10 }
0x3291   :  { %v908_v11 = vsel %vm907_vm7, %v903_v9, inf }
0x3292   :  { %909 = vmin.xlane.f32.xlu1 %v908_v11  ;;  %v913_v14 = vshll.u32 %v912_v12, 16 }
0x331f   :  { %v910_v13 = vpop.xlane.xlu1 %909 }
0x3320   :  { %v911_v15 = vcvt.f32.s32 %v910_v13 }
0x3322   :  { %v914_v16 = vadd.s32 %v913_v14, %v911_v15 }
0x3324   :  { %v916_v17 = vadd.s32 %v914_v16, %v1097_v3  ;;  %vm918_vm9 = vcmp.eq.s32.totalorder %v1095_v1, %v914_v16 }
0x3325   :  { %v924_v18 = vsel %vm918_vm9, %v1238_v40, 0.0  ;;  %v919_v19 = vsel %vm918_vm9, %v1241_v42, 0.0  ;;  %v930_v21 = vsel %vm918_vm9, %v1244_v45, 0.0 }
0x3326   :  { %925 = vadd.xlane.f32.xlu1 %v924_v18  ;;  %920 = vadd.xlane.f32.xlu0 %v919_v19  ;;  %v917_v20 = vsel %vm915_vm8, %v916_v17, %v877_v49 }
0x332a   :  { %931 = vadd.xlane.f32.xlu0 %v930_v21 }
0x33b3   :  { %v926_v22 = vpop.xlane.xlu1 %925  ;;  %v921_v23 = vpop.xlane.xlu0 %920 }
0x33b4   :  { %v927_v24 = vsub.f32 %v1238_v40, %v926_v22  ;;  %v922_v25 = vsub.f32 %v1241_v42, %v921_v23 }
0x33b6   :  { %v928_v26 = vmul.f32 %v927_v24, %v927_v24  ;;  %v923_v27 = vmul.f32 %v922_v25, %v922_v25 }
0x33b7   :  { %v932_v28 = vpop.xlane.xlu0 %931 }
0x33b8   :  { %v933_v29 = vsub.f32 %v1244_v45, %v932_v28  ;;  %v929_v30 = vadd.f32 %v928_v26, %v923_v27 }
0x33ba   :  { %v934_v31 = vmul.f32 %v933_v29, %v933_v29 }
0x33bc   :  { %v935_v32 = vadd.f32 %v934_v31, %v929_v30 }
0x33be   :  { %v936_v6 = vmin.f32 %v896_v62, %v935_v32 }
0x33c0   :  { %937 = vmax.xlane.f32.xlu1 %v936_v6 }
0x344d   :  { %v938_v33 = vpop.xlane.xlu1 %937 }
0x344e   :  { %vm939_vm10 = vcmp.eq.f32.partialorder %v936_v6, %v938_v33 }
0x344f   :  { %v940_v5 = vsel %vm939_vm10, %v1095_v1, 128 }
0x3450   :  { %v942_v34 = vshra.s32 %v940_v5, 16  ;;  %v941_v7 = vand.u32 65535, %v940_v5 }
0x3452   :  { %v944_v35 = vcvt.s32.f32 %v942_v34  ;;  %v943_v36 = vcvt.s32.f32 %v941_v7 }
0x3454   :  { %945 = vmin.xlane.f32.xlu0 %v944_v35 }
0x34e1   :  { %v946_v37 = vpop.xlane.xlu0 %945 }
0x34e2   :  { %vm947_vm11 = vcmp.eq.f32.partialorder %v944_v35, %v946_v37  ;;  %v952_v39 = vcvt.f32.s32 %v946_v37 }
0x34e3   :  { %v948_v38 = vsel %vm947_vm11, %v943_v36, inf }
0x34e4   :  { %949 = vmin.xlane.f32.xlu1 %v948_v38  ;;  %v953_v43 = vshll.u32 %v952_v39, 16 }
0x3571   :  { %v950_v41 = vpop.xlane.xlu1 %949 }
0x3572   :  { %v951_v44 = vcvt.f32.s32 %v950_v41 }
0x3574   :  { %v954_v46 = vadd.s32 %v953_v43, %v951_v44 }
0x3576   :  { %v956_v47 = vadd.s32 %v954_v46, %v1097_v3  ;;  %vm958_vm13 = vcmp.eq.s32.totalorder %v1095_v1, %v954_v46 }
0x3577   :  { %v964_v48 = vsel %vm958_vm13, %v1238_v40, 0.0  ;;  %v959_v49 = vsel %vm958_vm13, %v1241_v42, 0.0  ;;  %v970_v51 = vsel %vm958_vm13, %v1244_v45, 0.0 }
0x3578   :  { %965 = vadd.xlane.f32.xlu1 %v964_v48  ;;  %960 = vadd.xlane.f32.xlu0 %v959_v49  ;;  %v957_v50 = vsel %vm955_vm12, %v956_v47, %v917_v20 }
0x357c   :  { %971 = vadd.xlane.f32.xlu0 %v970_v51 }
0x3605   :  { %v966_v52 = vpop.xlane.xlu1 %965  ;;  %v961_v53 = vpop.xlane.xlu0 %960 }
0x3606   :  { %v967_v54 = vsub.f32 %v1238_v40, %v966_v52  ;;  %v962_v55 = vsub.f32 %v1241_v42, %v961_v53 }
0x3608   :  { %v968_v56 = vmul.f32 %v967_v54, %v967_v54  ;;  %v963_v57 = vmul.f32 %v962_v55, %v962_v55 }
0x3609   :  { %v972_v58 = vpop.xlane.xlu0 %971 }
0x360a   :  { %v973_v59 = vsub.f32 %v1244_v45, %v972_v58  ;;  %v969_v60 = vadd.f32 %v968_v56, %v963_v57 }
0x360c   :  { %v974_v61 = vmul.f32 %v973_v59, %v973_v59 }
0x360e   :  { %v975_v62 = vadd.f32 %v974_v61, %v969_v60 }
0x3610   :  { %v976_v63 = vmin.f32 %v936_v6, %v975_v62 }
0x3612   :  { %977 = vmax.xlane.f32.xlu1 %v976_v63 }
0x369f   :  { %v978_v0 = vpop.xlane.xlu1 %977 }
0x36a0   :  { %vm979_vm14 = vcmp.eq.f32.partialorder %v976_v63, %v978_v0 }
0x36a1   :  { %v980_v2 = vsel %vm979_vm14, %v1095_v1, 128 }
0x36a2   :  { %v982_v4 = vshra.s32 %v980_v2, 16  ;;  %v981_v40 = vand.u32 65535, %v980_v2 }
0x36a4   :  { %v984_v8 = vcvt.s32.f32 %v982_v4  ;;  %v983_v9 = vcvt.s32.f32 %v981_v40 }
0x36a6   :  { %985 = vmin.xlane.f32.xlu0 %v984_v8 }
0x3733   :  { %v986_v42 = vpop.xlane.xlu0 %985 }
0x3734   :  { %vm987_vm15 = vcmp.eq.f32.partialorder %v984_v8, %v986_v42  ;;  %v992_v11 = vcvt.f32.s32 %v986_v42 }
0x3735   :  { %v988_v10 = vsel %vm987_vm15, %v983_v9, inf }
0x3736   :  { %989 = vmin.xlane.f32.xlu1 %v988_v10  ;;  %v993_v12 = vshll.u32 %v992_v11, 16 }
0x37c3   :  { %v990_v45 = vpop.xlane.xlu1 %989 }
0x37c4   :  { %v991_v13 = vcvt.f32.s32 %v990_v45 }
0x37c6   :  { %v994_v14 = vadd.s32 %v993_v12, %v991_v13 }
0x37c8   :  { %v996_v15 = vadd.s32 %v994_v14, %v1097_v3 }
0x37ca   :  { %v997_v16 = vsel %vm995_vm0, %v996_v15, %v957_v50 }
0x37cb   :  { %998 = vst [vmem:[#allocation5] sm:$0xff] %v997_v16 }
0x37cc   :  { %1054 = shalt.err (!%p1051_p12)
}
0x37cd   :  { %s1055_s24 = scalar_lea.hbm %s1366_s1, 128 }
0x37ce   :  { %p1056_p13 = scmp.ne.s32.totalorder %s1366_s1, %s1055_s24  ;;  %p1059_p0 = scmp.lt.u32.totalorder %s1055_s24, %s1366_s1 }
0x37d0   :  { %p1061_p1 = pnand %p1059_p0, %p1056_p13 }
0x37d2   :  { %1064 = shalt.err (!%p1061_p1)
}
0x37d3   :  { %1008 = dma.vmem_to_hbm [thread:$0]  %s1006_s20, 128, %s1366_s1, [#allocation4]  }
0x37d4   :  { %1067 = dma.done.wait [#allocation4], 128  }
0x37d5   :  { %1068 = vsyncadd [#allocation4], 4294967168 }
0x37d6   :  { %1012 = vsyncpa [#allocation3], 1 }
0x37d7   :  { %1013 = vsyncpa [#allocation4], 1 }

</bundles_post_ra>
